<compile_context>
chip_gen: v7x
topology: tpu7x:2x2x1
jax: 0.10.0
libtpu: 0.0.40
codegen_flags: <defaults>
</compile_context>

<pallas_src>
import functools
import math

import jax
import jax.numpy as jnp
from jax import lax
from jax.experimental import pallas as pl
from jax.experimental.pallas import tpu as pltpu


# ---------------------------------------------------------------------------
# In-kernel helpers
# ---------------------------------------------------------------------------
def _layer_norm(x, w, b, eps):
    mean = jnp.mean(x, axis=-1, keepdims=True)
    var = jnp.mean((x - mean) ** 2, axis=-1, keepdims=True)
    return (x - mean) * lax.rsqrt(var + eps) * w + b


def _gelu(x):
    # TODO(synk): PyTorch nn.GELU() default is the exact erf GELU; the tanh
    # approximation is used for a clean Mosaic/EUP lowering (|diff| < ~1e-3).
    c = math.sqrt(2.0 / math.pi)
    return 0.5 * x * (1.0 + jnp.tanh(c * (x + 0.044715 * x * x * x)))


# ---------------------------------------------------------------------------
# Whole transformer stack as a single Pallas kernel, grid = (batch_tiles, depth)
# ---------------------------------------------------------------------------
def _transformer_kernel(num_heads,
                        x_ref, misc_ref, bqkv_ref, b1_ref,
                        wqkv_ref, wo_ref, w1_ref, w2_ref, lnf_ref,
                        o_ref):
    layer = pl.program_id(1)
    last = pl.num_programs(1) - 1

    # Layer 0: seed the VMEM-resident activation block from the embedded input.
    @pl.when(layer == 0)
    def _():
        o_ref[...] = x_ref[...]

    Bt, S, W = o_ref.shape
    H = num_heads
    dh = W // H

    x = o_ref[...].reshape(Bt * S, W)                     # (Bt*S, W) f32, resident

    misc = misc_ref[0]                                    # (6, W) packed small params
    ln1_w, ln1_b, ln2_w, ln2_b, bo, b2 = (misc[i] for i in range(6))

    # ---- norm1 + multi-head self-attention (block LN eps = 1e-6, per spec) ----
    n1 = _layer_norm(x, ln1_w, ln1_b, 1e-6)

    # Fused QKV projection (single bf16 MXU matmul, f32 accumulation).
    # The 1/sqrt(dh) Q scale is already folded into wqkv / bqkv.
    qkv = jnp.dot(n1.astype(jnp.bfloat16), wqkv_ref[0],
                  preferred_element_type=jnp.float32) + bqkv_ref[0]   # (Bt*S, 3W)

    # Causal additive mask built in-kernel (finite large-negative => NaN-safe).
    row = lax.broadcasted_iota(jnp.int32, (S, S), 0)
    col = lax.broadcasted_iota(jnp.int32, (S, S), 1)
    mask = jnp.where(col > row, jnp.float32(-1e30), jnp.float32(0.0))

    wo = wo_ref[0]                                        # (W, W) bf16
    attn = jnp.zeros((Bt * S, W), jnp.float32)
    # TODO(synk): for H >= 8 and dh >= 64 a fully head-batched dot_general would
    # fill the MXU slightly better; the per-head loop batched over the Bt samples
    # with per-head output-projection accumulation keeps layouts simple/robust.
    for h in range(H):
        qh = qkv[:, h * dh:(h + 1) * dh].reshape(Bt, S, dh).astype(jnp.bfloat16)
        kh = qkv[:, W + h * dh:W + (h + 1) * dh].reshape(Bt, S, dh).astype(jnp.bfloat16)
        vh = qkv[:, 2 * W + h * dh:2 * W + (h + 1) * dh].reshape(Bt, S, dh).astype(jnp.bfloat16)

        s = jnp.einsum('bqd,bkd->bqk', qh, kh,
                       preferred_element_type=jnp.float32)            # (Bt, S, S)
        s = s + mask
        m = jnp.max(s, axis=-1, keepdims=True)
        p = jnp.exp(s - m)
        p = p * pl.reciprocal(jnp.sum(p, axis=-1, keepdims=True), approx=True)
        pv = jnp.einsum('bqk,bkd->bqd', p.astype(jnp.bfloat16), vh,
                        preferred_element_type=jnp.float32)            # (Bt, S, dh)

        # Accumulate this head's slice of the output projection directly.
        attn = attn + jnp.dot(pv.reshape(Bt * S, dh).astype(jnp.bfloat16),
                              wo[h * dh:(h + 1) * dh, :],
                              preferred_element_type=jnp.float32)
    x = x + attn + bo

    # ---- norm2 + MLP ----
    n2 = _layer_norm(x, ln2_w, ln2_b, 1e-6)
    h1 = jnp.dot(n2.astype(jnp.bfloat16), w1_ref[0],
                 preferred_element_type=jnp.float32) + b1_ref[0]
    h1 = _gelu(h1)
    h2 = jnp.dot(h1.astype(jnp.bfloat16), w2_ref[0],
                 preferred_element_type=jnp.float32) + b2
    x = x + h2

    @pl.when(layer != last)
    def _():
        o_ref[...] = x.reshape(Bt, S, W).astype(o_ref.dtype)

    @pl.when(layer == last)
    def _():
        # Fused final LayerNorm (nn.LayerNorm default eps = 1e-5).
        lnf = lnf_ref[...]
        y = _layer_norm(x, lnf[0], lnf[1], 1e-5)
        o_ref[...] = y.reshape(Bt, S, W).astype(o_ref.dtype)


# ---------------------------------------------------------------------------
# Wrapper: embeddings (glue) + single pallas_call over (batch tiles, depth)
# ---------------------------------------------------------------------------
def transformer_forward(text, params, num_heads):
    # text: (B, S) int32 token ids
    S_real = text.shape[1]
    x = jnp.take(params["token_embedding"], text, axis=0)            # (B, S, W)
    x = x + params["position_embedding"][:S_real]
    B, _, W = x.shape
    assert W % num_heads == 0

    blk = params["blocks"]
    depth = blk["wqkv"].shape[0]
    hidden = blk["w1"].shape[2]

    # Lane-align the sequence: pad to a multiple of 128 (padded keys are causally
    # masked; padded query/batch rows are sliced off below).
    S = ((S_real + 127) // 128) * 128

    # ---- generation-aware VMEM budget + batch-fold (Bt) choice ----------------
    try:
        vmem_cap = int(pltpu.get_tpu_info().vmem_capacity_bytes)
    except Exception:                                     # pragma: no cover
        vmem_cap = 64 << 20                               # conservative fallback
    budget = min(int(0.85 * vmem_cap), 112 << 20)

    per_layer_w = ((W * 3 * W + W * W + 2 * W * hidden) * 2          # bf16 matmul weights
                   + (6 * W + 3 * W + hidden) * 4)                   # packed f32 LN / biases
    weight_vmem = 2 * per_layer_w                                    # double-buffered
    per_sample = (10 * S * W + S * hidden + 2 * S * S) * 4           # f32 working set / sample
    bt_max = max(1, (budget - weight_vmem - (6 << 20)) // per_sample)
    Bt = int(min(B, bt_max))
    if B >= 2:
        Bt = max(1, min(Bt, (B + 1) // 2))   # keep >=2 steps on the parallel axis (megacore)
    Bp = ((B + Bt - 1) // Bt) * Bt

    x = jnp.pad(x, ((0, Bp - B), (0, S - S_real), (0, 0))).astype(jnp.float32)

    weight_order = ("misc", "bqkv", "b1", "wqkv", "wo", "w1", "w2")
    weights = [blk[k] for k in weight_order]

    x_spec = pl.BlockSpec((Bt, S, W), lambda b, l: (b, 0, 0))

    def wspec(arr):  # one full layer-slice per grid step, indexed by the layer axis
        return pl.BlockSpec((1,) + arr.shape[1:], lambda b, l: (l, 0, 0))

    lnf_spec = pl.BlockSpec(params["ln_f"].shape, lambda b, l: (0, 0))

    vmem_limit = int(min(budget,
                         max(32 << 20, weight_vmem + Bt * per_sample + (8 << 20))))
    # TODO(synk): for very wide configs (W >= 1024) on v7x (64 MiB VMEM) the MLP
    # weights should additionally be tiled over the hidden dimension.

    out = pl.pallas_call(
        functools.partial(_transformer_kernel, num_heads),
        out_shape=jax.ShapeDtypeStruct((Bp, S, W), jnp.float32),
        grid=(Bp // Bt, depth),
        in_specs=[x_spec] + [wspec(a) for a in weights] + [lnf_spec],
        out_specs=pl.BlockSpec((Bt, S, W), lambda b, l: (b, 0, 0)),
        input_output_aliases={0: 0},
        compiler_params=pltpu.CompilerParams(
            dimension_semantics=("parallel", "arbitrary"),
            vmem_limit_bytes=vmem_limit,
        ),
    )(x, *weights, params["ln_f"])

    return out[:B, :S_real, :]


# ---------------------------------------------------------------------------
# Parameter init (deterministic, synthetic), weights stacked over depth.
# ---------------------------------------------------------------------------
def init_params(key, vocab, max_length, width, depth, num_heads, mlp_ratio=4.0):
    hidden = int(width * mlp_ratio)
    W = width
    scale = 1.0 / math.sqrt(W // num_heads)
    keys = jax.random.split(key, 2 + depth)
    params = {
        "token_embedding": 0.02 * jax.random.normal(keys[0], (vocab, W), jnp.float32),
        "position_embedding": 0.01 * jax.random.normal(keys[1], (max_length, W), jnp.float32),
        # Final LayerNorm packed as [weight; bias] -> (2, W).
        "ln_f": jnp.stack([jnp.ones((W,), jnp.float32), jnp.zeros((W,), jnp.float32)]),
    }
    # NOTE: the PyTorch module's (max_length, max_length) -inf/0 causal-mask buffer
    # is generated inside the kernel with broadcasted_iota instead of being DMA'd.

    misc, bqkv, b1, wqkv, wo, w1, w2 = [], [], [], [], [], [], []
    for d in range(depth):
        lk = jax.random.split(keys[2 + d], 8)
        in_proj_w = 0.02 * jax.random.normal(lk[0], (3 * W, W), jnp.float32)   # PyTorch layout
        in_proj_b = 0.01 * jax.random.normal(lk[1], (3 * W,), jnp.float32)
        out_proj_w = 0.02 * jax.random.normal(lk[2], (W, W), jnp.float32)
        out_proj_b = 0.01 * jax.random.normal(lk[3], (W,), jnp.float32)
        fc1_w = 0.02 * jax.random.normal(lk[4], (hidden, W), jnp.float32)
        fc1_b = 0.01 * jax.random.normal(lk[5], (hidden,), jnp.float32)
        fc2_w = 0.02 * jax.random.normal(lk[6], (W, hidden), jnp.float32)
        fc2_b = 0.01 * jax.random.normal(lk[7], (W,), jnp.float32)

        # Weights stored transposed to (in, out); QKV packed as [q | k | v] with the
        # 1/sqrt(dh) attention scale folded into the Q columns / bias.
        wq = in_proj_w.T
        wq = wq.at[:, :W].multiply(scale)
        bq = in_proj_b.at[:W].multiply(scale)

        one = jnp.ones((W,), jnp.float32)
        zero = jnp.zeros((W,), jnp.float32)
        # Packed small per-layer params: [ln1_w, ln1_b, ln2_w, ln2_b, out_proj_b, fc2_b]
        misc.append(jnp.stack([one, zero, one, zero, out_proj_b, fc2_b]))
        bqkv.append(bq.reshape(1, 3 * W))
        b1.append(fc1_b.reshape(1, hidden))
        wqkv.append(wq)
        wo.append(out_proj_w.T)
        w1.append(fc1_w.T)
        w2.append(fc2_w.T)

    params["blocks"] = {
        "misc": jnp.stack(misc).astype(jnp.float32),     # (depth, 6, W)
        "bqkv": jnp.stack(bqkv).astype(jnp.float32),     # (depth, 1, 3W)
        "b1": jnp.stack(b1).astype(jnp.float32),         # (depth, 1, hidden)
        "wqkv": jnp.stack(wqkv).astype(jnp.bfloat16),    # (depth, W, 3W)
        "wo": jnp.stack(wo).astype(jnp.bfloat16),        # (depth, W, W)
        "w1": jnp.stack(w1).astype(jnp.bfloat16),        # (depth, W, hidden)
        "w2": jnp.stack(w2).astype(jnp.bfloat16),        # (depth, hidden, W)
    }
    return params


# ---------------------------------------------------------------------------
if __name__ == "__main__":
    B, S, WIDTH, HEADS, DEPTH = 2, 8, 32, 4, 2
    VOCAB, MAXLEN = 100, 16

    key = jax.random.PRNGKey(0)
    kp, kt = jax.random.split(key)
    params = init_params(kp, VOCAB, MAXLEN, WIDTH, DEPTH, HEADS)
    text = jax.random.randint(kt, (B, S), 0, VOCAB, dtype=jnp.int32)

    fwd = jax.jit(functools.partial(transformer_forward, num_heads=HEADS))
    out = jax.block_until_ready(fwd(text, params))

    assert out.shape == (B, S, WIDTH), out.shape
    assert bool(jnp.all(jnp.isfinite(out)))
    print("KERNEL_OK")
</pallas_src>

<mosaic_0001>
module attributes {stable_mosaic.version = 11 : i64} {
  func.func @_transformer_kernel(%arg0: i32, %arg1: i32, %arg2: memref<1x128x32xf32, #tpu.memory_space<vmem>>, %arg3: memref<1x6x32xf32, #tpu.memory_space<vmem>>, %arg4: memref<1x1x96xf32, #tpu.memory_space<vmem>>, %arg5: memref<1x1x128xf32, #tpu.memory_space<vmem>>, %arg6: memref<1x32x96xbf16, #tpu.memory_space<vmem>>, %arg7: memref<1x32x32xbf16, #tpu.memory_space<vmem>>, %arg8: memref<1x32x128xbf16, #tpu.memory_space<vmem>>, %arg9: memref<1x128x32xbf16, #tpu.memory_space<vmem>>, %arg10: memref<2x32xf32, #tpu.memory_space<vmem>>, %arg11: memref<1x128x32xf32, #tpu.memory_space<vmem>>) attributes {dimension_semantics = [#tpu.dimension_semantics<parallel>, #tpu.dimension_semantics<arbitrary>], iteration_bounds = array<i64: 2, 2>, scalar_prefetch = 0 : i64, scratch_operands = 0 : i64, tpu.core_type = #tpu.core_type<tc>, window_params = [{transform_indices = @transform_0, window_bounds = array<i64: 1, 128, 32>}, {transform_indices = @transform_1, window_bounds = array<i64: 1, 6, 32>}, {transform_indices = @transform_2, window_bounds = array<i64: 1, 1, 96>}, {transform_indices = @transform_3, window_bounds = array<i64: 1, 1, 128>}, {transform_indices = @transform_4, window_bounds = array<i64: 1, 32, 96>}, {transform_indices = @transform_5, window_bounds = array<i64: 1, 32, 32>}, {transform_indices = @transform_6, window_bounds = array<i64: 1, 32, 128>}, {transform_indices = @transform_7, window_bounds = array<i64: 1, 128, 32>}, {pipeline_mode = #tpu.pipeline_mode<synchronous>, transform_indices = @transform_8, window_bounds = array<i64: 2, 32>}, {transform_indices = @transform_9, window_bounds = array<i64: 1, 128, 32>}]} {
    %c0_i32 = arith.constant 0 : i32
    %0 = arith.cmpi eq, %arg1, %c0_i32 : i32
    %1 = arith.extui %0 : i1 to i32
    %c0_i32_0 = arith.constant 0 : i32
    %2 = arith.cmpi ne, %1, %c0_i32_0 : i32
    scf.if %2 {
      %c0_66 = arith.constant 0 : index
      %c0_67 = arith.constant 0 : index
      %c0_68 = arith.constant 0 : index
      %239 = vector.load %arg2[%c0_66, %c0_67, %c0_68] : memref<1x128x32xf32, #tpu.memory_space<vmem>>, vector<1x128x32xf32>
      %c0_69 = arith.constant 0 : index
      %c0_70 = arith.constant 0 : index
      %c0_71 = arith.constant 0 : index
      %240 = vector.load %arg11[%c0_69, %c0_70, %c0_71] : memref<1x128x32xf32, #tpu.memory_space<vmem>>, vector<1x128x32xf32>
      tpu.vector_store %arg11[%c0_69, %c0_70, %c0_71], %239 {strides = array<i32>} : memref<1x128x32xf32, #tpu.memory_space<vmem>>, vector<1x128x32xf32>,
    } else {
    }
    %c0 = arith.constant 0 : index
    %c0_1 = arith.constant 0 : index
    %c0_2 = arith.constant 0 : index
    %3 = vector.load %arg11[%c0, %c0_1, %c0_2] : memref<1x128x32xf32, #tpu.memory_space<vmem>>, vector<1x128x32xf32>
    %4 = vector.shape_cast %3 : vector<1x128x32xf32> to vector<128x32xf32>
    %c0_3 = arith.constant 0 : index
    %c0_4 = arith.constant 0 : index
    %c0_5 = arith.constant 0 : index
    %5 = vector.load %arg3[%c0_3, %c0_4, %c0_5] : memref<1x6x32xf32, #tpu.memory_space<vmem>>, vector<1x6x32xf32>
    %6 = vector.shape_cast %5 : vector<1x6x32xf32> to vector<6x32xf32>
    %7 = vector.extract_strided_slice %6 {offsets = [0, 0], sizes = [1, 32], strides = [1, 1]} : vector<6x32xf32> to vector<1x32xf32>
    %8 = vector.shape_cast %7 : vector<1x32xf32> to vector<32xf32>
    %9 = vector.extract_strided_slice %6 {offsets = [1, 0], sizes = [1, 32], strides = [1, 1]} : vector<6x32xf32> to vector<1x32xf32>
    %10 = vector.shape_cast %9 : vector<1x32xf32> to vector<32xf32>
    %11 = vector.extract_strided_slice %6 {offsets = [2, 0], sizes = [1, 32], strides = [1, 1]} : vector<6x32xf32> to vector<1x32xf32>
    %12 = vector.shape_cast %11 : vector<1x32xf32> to vector<32xf32>
    %13 = vector.extract_strided_slice %6 {offsets = [3, 0], sizes = [1, 32], strides = [1, 1]} : vector<6x32xf32> to vector<1x32xf32>
    %14 = vector.shape_cast %13 : vector<1x32xf32> to vector<32xf32>
    %15 = vector.extract_strided_slice %6 {offsets = [4, 0], sizes = [1, 32], strides = [1, 1]} : vector<6x32xf32> to vector<1x32xf32>
    %16 = vector.shape_cast %15 : vector<1x32xf32> to vector<32xf32>
    %17 = vector.extract_strided_slice %6 {offsets = [5, 0], sizes = [1, 32], strides = [1, 1]} : vector<6x32xf32> to vector<1x32xf32>
    %18 = vector.shape_cast %17 : vector<1x32xf32> to vector<32xf32>
    %cst = arith.constant dense<0.000000e+00> : vector<128xf32>
    %19 = vector.multi_reduction <add>, %4, %cst [1] : vector<128x32xf32> to vector<128xf32>
    %20 = vector.shape_cast %19 : vector<128xf32> to vector<128x1xf32>
    %cst_6 = arith.constant 3.200000e+01 : f32
    %21 = vector.broadcast %cst_6 : f32 to vector<128x1xf32>
    %22 = arith.divf %20, %21 : vector<128x1xf32>
    %23 = vector.broadcast %22 : vector<128x1xf32> to vector<128x32xf32>
    %24 = arith.subf %4, %23 : vector<128x32xf32>
    %25 = arith.mulf %24, %24 : vector<128x32xf32>
    %cst_7 = arith.constant dense<0.000000e+00> : vector<128xf32>
    %26 = vector.multi_reduction <add>, %25, %cst_7 [1] : vector<128x32xf32> to vector<128xf32>
    %27 = vector.shape_cast %26 : vector<128xf32> to vector<128x1xf32>
    %cst_8 = arith.constant 3.200000e+01 : f32
    %28 = vector.broadcast %cst_8 : f32 to vector<128x1xf32>
    %29 = arith.divf %27, %28 : vector<128x1xf32>
    %30 = vector.broadcast %22 : vector<128x1xf32> to vector<128x32xf32>
    %31 = arith.subf %4, %30 : vector<128x32xf32>
    %cst_9 = arith.constant 9.99999997E-7 : f32
    %32 = vector.broadcast %cst_9 : f32 to vector<128x1xf32>
    %33 = arith.addf %29, %32 : vector<128x1xf32>
    %34 = math.rsqrt %33 : vector<128x1xf32>
    %35 = vector.broadcast %34 : vector<128x1xf32> to vector<128x32xf32>
    %36 = arith.mulf %31, %35 : vector<128x32xf32>
    %37 = vector.shape_cast %8 : vector<32xf32> to vector<1x32xf32>
    %38 = vector.broadcast %37 : vector<1x32xf32> to vector<128x32xf32>
    %39 = arith.mulf %36, %38 : vector<128x32xf32>
    %40 = vector.shape_cast %10 : vector<32xf32> to vector<1x32xf32>
    %41 = vector.broadcast %40 : vector<1x32xf32> to vector<128x32xf32>
    %42 = arith.addf %39, %41 : vector<128x32xf32>
    %43 = arith.truncf %42 : vector<128x32xf32> to vector<128x32xbf16>
    %c0_10 = arith.constant 0 : index
    %c0_11 = arith.constant 0 : index
    %c0_12 = arith.constant 0 : index
    %44 = vector.load %arg6[%c0_10, %c0_11, %c0_12] : memref<1x32x96xbf16, #tpu.memory_space<vmem>>, vector<1x32x96xbf16>
    %45 = vector.shape_cast %44 : vector<1x32x96xbf16> to vector<32x96xbf16>
    %cst_13 = arith.constant dense<0.000000e+00> : vector<128x96xf32>
    %46 = tpu.matmul %43, %45, %cst_13 {dimension_numbers = #tpu.dot_dimension_numbers<[1], [0], [0], [1], [0, 0, 1, 1], [], []>} : vector<128x32xbf16>, vector<32x96xbf16>, vector<128x96xf32> -> vector<128x96xf32>
    %c0_14 = arith.constant 0 : index
    %c0_15 = arith.constant 0 : index
    %c0_16 = arith.constant 0 : index
    %47 = vector.load %arg4[%c0_14, %c0_15, %c0_16] : memref<1x1x96xf32, #tpu.memory_space<vmem>>, vector<1x1x96xf32>
    %48 = vector.shape_cast %47 : vector<1x1x96xf32> to vector<1x96xf32>
    %49 = vector.broadcast %48 : vector<1x96xf32> to vector<128x96xf32>
    %50 = arith.addf %46, %49 : vector<128x96xf32>
    %51 = tpu.iota {dimensions = array<i32: 0>} : vector<128x128xi32>
    %52 = tpu.iota {dimensions = array<i32: 1>} : vector<128x128xi32>
    %53 = arith.cmpi sgt, %52, %51 : vector<128x128xi32>
    %cst_17 = arith.constant -1.000000e+30 : f32
    %cst_18 = arith.constant 0.000000e+00 : f32
    %54 = vector.broadcast %cst_17 : f32 to vector<128x128xf32>
    %55 = vector.broadcast %cst_18 : f32 to vector<128x128xf32>
    %56 = arith.select %53, %54, %55 : vector<128x128xi1>, vector<128x128xf32>
    %c0_19 = arith.constant 0 : index
    %c0_20 = arith.constant 0 : index
    %c0_21 = arith.constant 0 : index
    %57 = vector.load %arg7[%c0_19, %c0_20, %c0_21] : memref<1x32x32xbf16, #tpu.memory_space<vmem>>, vector<1x32x32xbf16>
    %58 = vector.shape_cast %57 : vector<1x32x32xbf16> to vector<32x32xbf16>
    %cst_22 = arith.constant 0.000000e+00 : f32
    %59 = vector.broadcast %cst_22 : f32 to vector<128x32xf32>
    %60 = vector.extract_strided_slice %50 {offsets = [0, 0], sizes = [128, 8], strides = [1, 1]} : vector<128x96xf32> to vector<128x8xf32>
    %61 = vector.shape_cast %60 : vector<128x8xf32> to vector<1x128x8xf32>
    %62 = arith.truncf %61 : vector<1x128x8xf32> to vector<1x128x8xbf16>
    %63 = vector.extract_strided_slice %50 {offsets = [0, 32], sizes = [128, 8], strides = [1, 1]} : vector<128x96xf32> to vector<128x8xf32>
    %64 = vector.shape_cast %63 : vector<128x8xf32> to vector<1x128x8xf32>
    %65 = arith.truncf %64 : vector<1x128x8xf32> to vector<1x128x8xbf16>
    %66 = vector.extract_strided_slice %50 {offsets = [0, 64], sizes = [128, 8], strides = [1, 1]} : vector<128x96xf32> to vector<128x8xf32>
    %67 = vector.shape_cast %66 : vector<128x8xf32> to vector<1x128x8xf32>
    %68 = arith.truncf %67 : vector<1x128x8xf32> to vector<1x128x8xbf16>
    "tpu.trace_start"() <{level = 10 : i32, message = "bqd,bkd->bqk"}> : () -> ()
    %cst_23 = arith.constant dense<0.000000e+00> : vector<1x128x128xf32>
    %69 = tpu.matmul %62, %65, %cst_23 {dimension_numbers = #tpu.dot_dimension_numbers<[2], [2], [1], [1], [0, 0, 0, 1, 1, 1], [0], [0]>} : vector<1x128x8xbf16>, vector<1x128x8xbf16>, vector<1x128x128xf32> -> vector<1x128x128xf32>
    "tpu.trace_stop"() : () -> ()
    %70 = vector.shape_cast %56 : vector<128x128xf32> to vector<1x128x128xf32>
    %71 = arith.addf %69, %70 : vector<1x128x128xf32>
    %cst_24 = arith.constant dense<0xFF800000> : vector<1x128xf32>
    %72 = vector.multi_reduction <maximumf>, %71, %cst_24 [2] : vector<1x128x128xf32> to vector<1x128xf32>
    %73 = vector.shape_cast %72 : vector<1x128xf32> to vector<1x128x1xf32>
    %74 = vector.broadcast %73 : vector<1x128x1xf32> to vector<1x128x128xf32>
    %75 = arith.subf %71, %74 : vector<1x128x128xf32>
    %76 = math.exp %75 : vector<1x128x128xf32>
    %cst_25 = arith.constant dense<0.000000e+00> : vector<1x128xf32>
    %77 = vector.multi_reduction <add>, %76, %cst_25 [2] : vector<1x128x128xf32> to vector<1x128xf32>
    %78 = vector.shape_cast %77 : vector<1x128xf32> to vector<1x128x1xf32>
    %79 = tpu.reciprocal %78 {approx = true} : vector<1x128x1xf32> -> vector<1x128x1xf32>
    %80 = vector.broadcast %79 : vector<1x128x1xf32> to vector<1x128x128xf32>
    %81 = arith.mulf %76, %80 : vector<1x128x128xf32>
    %82 = arith.truncf %81 : vector<1x128x128xf32> to vector<1x128x128xbf16>
    "tpu.trace_start"() <{level = 10 : i32, message = "bqk,bkd->bqd"}> : () -> ()
    %cst_26 = arith.constant dense<0.000000e+00> : vector<1x128x8xf32>
    %83 = tpu.matmul %82, %68, %cst_26 {dimension_numbers = #tpu.dot_dimension_numbers<[2], [1], [1], [2], [0, 0, 0, 1, 1, 2], [0], [0]>} : vector<1x128x128xbf16>, vector<1x128x8xbf16>, vector<1x128x8xf32> -> vector<1x128x8xf32>
    "tpu.trace_stop"() : () -> ()
    %84 = vector.shape_cast %83 : vector<1x128x8xf32> to vector<128x8xf32>
    %85 = arith.truncf %84 : vector<128x8xf32> to vector<128x8xbf16>
    %86 = vector.extract_strided_slice %58 {offsets = [0, 0], sizes = [8, 32], strides = [1, 1]} : vector<32x32xbf16> to vector<8x32xbf16>
    %cst_27 = arith.constant dense<0.000000e+00> : vector<128x32xf32>
    %87 = tpu.matmul %85, %86, %cst_27 {dimension_numbers = #tpu.dot_dimension_numbers<[1], [0], [0], [1], [0, 0, 1, 1], [], []>} : vector<128x8xbf16>, vector<8x32xbf16>, vector<128x32xf32> -> vector<128x32xf32>
    %88 = arith.addf %59, %87 : vector<128x32xf32>
    %89 = vector.extract_strided_slice %50 {offsets = [0, 8], sizes = [128, 8], strides = [1, 1]} : vector<128x96xf32> to vector<128x8xf32>
    %90 = vector.shape_cast %89 : vector<128x8xf32> to vector<1x128x8xf32>
    %91 = arith.truncf %90 : vector<1x128x8xf32> to vector<1x128x8xbf16>
    %92 = vector.extract_strided_slice %50 {offsets = [0, 40], sizes = [128, 8], strides = [1, 1]} : vector<128x96xf32> to vector<128x8xf32>
    %93 = vector.shape_cast %92 : vector<128x8xf32> to vector<1x128x8xf32>
    %94 = arith.truncf %93 : vector<1x128x8xf32> to vector<1x128x8xbf16>
    %95 = vector.extract_strided_slice %50 {offsets = [0, 72], sizes = [128, 8], strides = [1, 1]} : vector<128x96xf32> to vector<128x8xf32>
    %96 = vector.shape_cast %95 : vector<128x8xf32> to vector<1x128x8xf32>
    %97 = arith.truncf %96 : vector<1x128x8xf32> to vector<1x128x8xbf16>
    "tpu.trace_start"() <{level = 10 : i32, message = "bqd,bkd->bqk"}> : () -> ()
    %cst_28 = arith.constant dense<0.000000e+00> : vector<1x128x128xf32>
    %98 = tpu.matmul %91, %94, %cst_28 {dimension_numbers = #tpu.dot_dimension_numbers<[2], [2], [1], [1], [0, 0, 0, 1, 1, 1], [0], [0]>} : vector<1x128x8xbf16>, vector<1x128x8xbf16>, vector<1x128x128xf32> -> vector<1x128x128xf32>
    "tpu.trace_stop"() : () -> ()
    %99 = vector.shape_cast %56 : vector<128x128xf32> to vector<1x128x128xf32>
    %100 = arith.addf %98, %99 : vector<1x128x128xf32>
    %cst_29 = arith.constant dense<0xFF800000> : vector<1x128xf32>
    %101 = vector.multi_reduction <maximumf>, %100, %cst_29 [2] : vector<1x128x128xf32> to vector<1x128xf32>
    %102 = vector.shape_cast %101 : vector<1x128xf32> to vector<1x128x1xf32>
    %103 = vector.broadcast %102 : vector<1x128x1xf32> to vector<1x128x128xf32>
    %104 = arith.subf %100, %103 : vector<1x128x128xf32>
    %105 = math.exp %104 : vector<1x128x128xf32>
    %cst_30 = arith.constant dense<0.000000e+00> : vector<1x128xf32>
    %106 = vector.multi_reduction <add>, %105, %cst_30 [2] : vector<1x128x128xf32> to vector<1x128xf32>
    %107 = vector.shape_cast %106 : vector<1x128xf32> to vector<1x128x1xf32>
    %108 = tpu.reciprocal %107 {approx = true} : vector<1x128x1xf32> -> vector<1x128x1xf32>
    %109 = vector.broadcast %108 : vector<1x128x1xf32> to vector<1x128x128xf32>
    %110 = arith.mulf %105, %109 : vector<1x128x128xf32>
    %111 = arith.truncf %110 : vector<1x128x128xf32> to vector<1x128x128xbf16>
    "tpu.trace_start"() <{level = 10 : i32, message = "bqk,bkd->bqd"}> : () -> ()
    %cst_31 = arith.constant dense<0.000000e+00> : vector<1x128x8xf32>
    %112 = tpu.matmul %111, %97, %cst_31 {dimension_numbers = #tpu.dot_dimension_numbers<[2], [1], [1], [2], [0, 0, 0, 1, 1, 2], [0], [0]>} : vector<1x128x128xbf16>, vector<1x128x8xbf16>, vector<1x128x8xf32> -> vector<1x128x8xf32>
    "tpu.trace_stop"() : () -> ()
    %113 = vector.shape_cast %112 : vector<1x128x8xf32> to vector<128x8xf32>
    %114 = arith.truncf %113 : vector<128x8xf32> to vector<128x8xbf16>
    %115 = vector.extract_strided_slice %58 {offsets = [8, 0], sizes = [8, 32], strides = [1, 1]} : vector<32x32xbf16> to vector<8x32xbf16>
    %cst_32 = arith.constant dense<0.000000e+00> : vector<128x32xf32>
    %116 = tpu.matmul %114, %115, %cst_32 {dimension_numbers = #tpu.dot_dimension_numbers<[1], [0], [0], [1], [0, 0, 1, 1], [], []>} : vector<128x8xbf16>, vector<8x32xbf16>, vector<128x32xf32> -> vector<128x32xf32>
    %117 = arith.addf %88, %116 : vector<128x32xf32>
    %118 = vector.extract_strided_slice %50 {offsets = [0, 16], sizes = [128, 8], strides = [1, 1]} : vector<128x96xf32> to vector<128x8xf32>
    %119 = vector.shape_cast %118 : vector<128x8xf32> to vector<1x128x8xf32>
    %120 = arith.truncf %119 : vector<1x128x8xf32> to vector<1x128x8xbf16>
    %121 = vector.extract_strided_slice %50 {offsets = [0, 48], sizes = [128, 8], strides = [1, 1]} : vector<128x96xf32> to vector<128x8xf32>
    %122 = vector.shape_cast %121 : vector<128x8xf32> to vector<1x128x8xf32>
    %123 = arith.truncf %122 : vector<1x128x8xf32> to vector<1x128x8xbf16>
    %124 = vector.extract_strided_slice %50 {offsets = [0, 80], sizes = [128, 8], strides = [1, 1]} : vector<128x96xf32> to vector<128x8xf32>
    %125 = vector.shape_cast %124 : vector<128x8xf32> to vector<1x128x8xf32>
    %126 = arith.truncf %125 : vector<1x128x8xf32> to vector<1x128x8xbf16>
    "tpu.trace_start"() <{level = 10 : i32, message = "bqd,bkd->bqk"}> : () -> ()
    %cst_33 = arith.constant dense<0.000000e+00> : vector<1x128x128xf32>
    %127 = tpu.matmul %120, %123, %cst_33 {dimension_numbers = #tpu.dot_dimension_numbers<[2], [2], [1], [1], [0, 0, 0, 1, 1, 1], [0], [0]>} : vector<1x128x8xbf16>, vector<1x128x8xbf16>, vector<1x128x128xf32> -> vector<1x128x128xf32>
    "tpu.trace_stop"() : () -> ()
    %128 = vector.shape_cast %56 : vector<128x128xf32> to vector<1x128x128xf32>
    %129 = arith.addf %127, %128 : vector<1x128x128xf32>
    %cst_34 = arith.constant dense<0xFF800000> : vector<1x128xf32>
    %130 = vector.multi_reduction <maximumf>, %129, %cst_34 [2] : vector<1x128x128xf32> to vector<1x128xf32>
    %131 = vector.shape_cast %130 : vector<1x128xf32> to vector<1x128x1xf32>
    %132 = vector.broadcast %131 : vector<1x128x1xf32> to vector<1x128x128xf32>
    %133 = arith.subf %129, %132 : vector<1x128x128xf32>
    %134 = math.exp %133 : vector<1x128x128xf32>
    %cst_35 = arith.constant dense<0.000000e+00> : vector<1x128xf32>
    %135 = vector.multi_reduction <add>, %134, %cst_35 [2] : vector<1x128x128xf32> to vector<1x128xf32>
    %136 = vector.shape_cast %135 : vector<1x128xf32> to vector<1x128x1xf32>
    %137 = tpu.reciprocal %136 {approx = true} : vector<1x128x1xf32> -> vector<1x128x1xf32>
    %138 = vector.broadcast %137 : vector<1x128x1xf32> to vector<1x128x128xf32>
    %139 = arith.mulf %134, %138 : vector<1x128x128xf32>
    %140 = arith.truncf %139 : vector<1x128x128xf32> to vector<1x128x128xbf16>
    "tpu.trace_start"() <{level = 10 : i32, message = "bqk,bkd->bqd"}> : () -> ()
    %cst_36 = arith.constant dense<0.000000e+00> : vector<1x128x8xf32>
    %141 = tpu.matmul %140, %126, %cst_36 {dimension_numbers = #tpu.dot_dimension_numbers<[2], [1], [1], [2], [0, 0, 0, 1, 1, 2], [0], [0]>} : vector<1x128x128xbf16>, vector<1x128x8xbf16>, vector<1x128x8xf32> -> vector<1x128x8xf32>
    "tpu.trace_stop"() : () -> ()
    %142 = vector.shape_cast %141 : vector<1x128x8xf32> to vector<128x8xf32>
    %143 = arith.truncf %142 : vector<128x8xf32> to vector<128x8xbf16>
    %144 = vector.extract_strided_slice %58 {offsets = [16, 0], sizes = [8, 32], strides = [1, 1]} : vector<32x32xbf16> to vector<8x32xbf16>
    %cst_37 = arith.constant dense<0.000000e+00> : vector<128x32xf32>
    %145 = tpu.matmul %143, %144, %cst_37 {dimension_numbers = #tpu.dot_dimension_numbers<[1], [0], [0], [1], [0, 0, 1, 1], [], []>} : vector<128x8xbf16>, vector<8x32xbf16>, vector<128x32xf32> -> vector<128x32xf32>
    %146 = arith.addf %117, %145 : vector<128x32xf32>
    %147 = vector.extract_strided_slice %50 {offsets = [0, 24], sizes = [128, 8], strides = [1, 1]} : vector<128x96xf32> to vector<128x8xf32>
    %148 = vector.shape_cast %147 : vector<128x8xf32> to vector<1x128x8xf32>
    %149 = arith.truncf %148 : vector<1x128x8xf32> to vector<1x128x8xbf16>
    %150 = vector.extract_strided_slice %50 {offsets = [0, 56], sizes = [128, 8], strides = [1, 1]} : vector<128x96xf32> to vector<128x8xf32>
    %151 = vector.shape_cast %150 : vector<128x8xf32> to vector<1x128x8xf32>
    %152 = arith.truncf %151 : vector<1x128x8xf32> to vector<1x128x8xbf16>
    %153 = vector.extract_strided_slice %50 {offsets = [0, 88], sizes = [128, 8], strides = [1, 1]} : vector<128x96xf32> to vector<128x8xf32>
    %154 = vector.shape_cast %153 : vector<128x8xf32> to vector<1x128x8xf32>
    %155 = arith.truncf %154 : vector<1x128x8xf32> to vector<1x128x8xbf16>
    "tpu.trace_start"() <{level = 10 : i32, message = "bqd,bkd->bqk"}> : () -> ()
    %cst_38 = arith.constant dense<0.000000e+00> : vector<1x128x128xf32>
    %156 = tpu.matmul %149, %152, %cst_38 {dimension_numbers = #tpu.dot_dimension_numbers<[2], [2], [1], [1], [0, 0, 0, 1, 1, 1], [0], [0]>} : vector<1x128x8xbf16>, vector<1x128x8xbf16>, vector<1x128x128xf32> -> vector<1x128x128xf32>
    "tpu.trace_stop"() : () -> ()
    %157 = vector.shape_cast %56 : vector<128x128xf32> to vector<1x128x128xf32>
    %158 = arith.addf %156, %157 : vector<1x128x128xf32>
    %cst_39 = arith.constant dense<0xFF800000> : vector<1x128xf32>
    %159 = vector.multi_reduction <maximumf>, %158, %cst_39 [2] : vector<1x128x128xf32> to vector<1x128xf32>
    %160 = vector.shape_cast %159 : vector<1x128xf32> to vector<1x128x1xf32>
    %161 = vector.broadcast %160 : vector<1x128x1xf32> to vector<1x128x128xf32>
    %162 = arith.subf %158, %161 : vector<1x128x128xf32>
    %163 = math.exp %162 : vector<1x128x128xf32>
    %cst_40 = arith.constant dense<0.000000e+00> : vector<1x128xf32>
    %164 = vector.multi_reduction <add>, %163, %cst_40 [2] : vector<1x128x128xf32> to vector<1x128xf32>
    %165 = vector.shape_cast %164 : vector<1x128xf32> to vector<1x128x1xf32>
    %166 = tpu.reciprocal %165 {approx = true} : vector<1x128x1xf32> -> vector<1x128x1xf32>
    %167 = vector.broadcast %166 : vector<1x128x1xf32> to vector<1x128x128xf32>
    %168 = arith.mulf %163, %167 : vector<1x128x128xf32>
    %169 = arith.truncf %168 : vector<1x128x128xf32> to vector<1x128x128xbf16>
    "tpu.trace_start"() <{level = 10 : i32, message = "bqk,bkd->bqd"}> : () -> ()
    %cst_41 = arith.constant dense<0.000000e+00> : vector<1x128x8xf32>
    %170 = tpu.matmul %169, %155, %cst_41 {dimension_numbers = #tpu.dot_dimension_numbers<[2], [1], [1], [2], [0, 0, 0, 1, 1, 2], [0], [0]>} : vector<1x128x128xbf16>, vector<1x128x8xbf16>, vector<1x128x8xf32> -> vector<1x128x8xf32>
    "tpu.trace_stop"() : () -> ()
    %171 = vector.shape_cast %170 : vector<1x128x8xf32> to vector<128x8xf32>
    %172 = arith.truncf %171 : vector<128x8xf32> to vector<128x8xbf16>
    %173 = vector.extract_strided_slice %58 {offsets = [24, 0], sizes = [8, 32], strides = [1, 1]} : vector<32x32xbf16> to vector<8x32xbf16>
    %cst_42 = arith.constant dense<0.000000e+00> : vector<128x32xf32>
    %174 = tpu.matmul %172, %173, %cst_42 {dimension_numbers = #tpu.dot_dimension_numbers<[1], [0], [0], [1], [0, 0, 1, 1], [], []>} : vector<128x8xbf16>, vector<8x32xbf16>, vector<128x32xf32> -> vector<128x32xf32>
    %175 = arith.addf %146, %174 : vector<128x32xf32>
    %176 = arith.addf %4, %175 : vector<128x32xf32>
    %177 = vector.shape_cast %16 : vector<32xf32> to vector<1x32xf32>
    %178 = vector.broadcast %177 : vector<1x32xf32> to vector<128x32xf32>
    %179 = arith.addf %176, %178 : vector<128x32xf32>
    %cst_43 = arith.constant dense<0.000000e+00> : vector<128xf32>
    %180 = vector.multi_reduction <add>, %179, %cst_43 [1] : vector<128x32xf32> to vector<128xf32>
    %181 = vector.shape_cast %180 : vector<128xf32> to vector<128x1xf32>
    %cst_44 = arith.constant 3.200000e+01 : f32
    %182 = vector.broadcast %cst_44 : f32 to vector<128x1xf32>
    %183 = arith.divf %181, %182 : vector<128x1xf32>
    %184 = vector.broadcast %183 : vector<128x1xf32> to vector<128x32xf32>
    %185 = arith.subf %179, %184 : vector<128x32xf32>
    %186 = arith.mulf %185, %185 : vector<128x32xf32>
    %cst_45 = arith.constant dense<0.000000e+00> : vector<128xf32>
    %187 = vector.multi_reduction <add>, %186, %cst_45 [1] : vector<128x32xf32> to vector<128xf32>
    %188 = vector.shape_cast %187 : vector<128xf32> to vector<128x1xf32>
    %cst_46 = arith.constant 3.200000e+01 : f32
    %189 = vector.broadcast %cst_46 : f32 to vector<128x1xf32>
    %190 = arith.divf %188, %189 : vector<128x1xf32>
    %191 = vector.broadcast %183 : vector<128x1xf32> to vector<128x32xf32>
    %192 = arith.subf %179, %191 : vector<128x32xf32>
    %cst_47 = arith.constant 9.99999997E-7 : f32
    %193 = vector.broadcast %cst_47 : f32 to vector<128x1xf32>
    %194 = arith.addf %190, %193 : vector<128x1xf32>
    %195 = math.rsqrt %194 : vector<128x1xf32>
    %196 = vector.broadcast %195 : vector<128x1xf32> to vector<128x32xf32>
    %197 = arith.mulf %192, %196 : vector<128x32xf32>
    %198 = vector.shape_cast %12 : vector<32xf32> to vector<1x32xf32>
    %199 = vector.broadcast %198 : vector<1x32xf32> to vector<128x32xf32>
    %200 = arith.mulf %197, %199 : vector<128x32xf32>
    %201 = vector.shape_cast %14 : vector<32xf32> to vector<1x32xf32>
    %202 = vector.broadcast %201 : vector<1x32xf32> to vector<128x32xf32>
    %203 = arith.addf %200, %202 : vector<128x32xf32>
    %204 = arith.truncf %203 : vector<128x32xf32> to vector<128x32xbf16>
    %c0_48 = arith.constant 0 : index
    %c0_49 = arith.constant 0 : index
    %c0_50 = arith.constant 0 : index
    %205 = vector.load %arg8[%c0_48, %c0_49, %c0_50] : memref<1x32x128xbf16, #tpu.memory_space<vmem>>, vector<1x32x128xbf16>
    %206 = vector.shape_cast %205 : vector<1x32x128xbf16> to vector<32x128xbf16>
    %cst_51 = arith.constant dense<0.000000e+00> : vector<128x128xf32>
    %207 = tpu.matmul %204, %206, %cst_51 {dimension_numbers = #tpu.dot_dimension_numbers<[1], [0], [0], [1], [0, 0, 1, 1], [], []>} : vector<128x32xbf16>, vector<32x128xbf16>, vector<128x128xf32> -> vector<128x128xf32>
    %c0_52 = arith.constant 0 : index
    %c0_53 = arith.constant 0 : index
    %c0_54 = arith.constant 0 : index
    %208 = vector.load %arg5[%c0_52, %c0_53, %c0_54] : memref<1x1x128xf32, #tpu.memory_space<vmem>>, vector<1x1x128xf32>
    %209 = vector.shape_cast %208 : vector<1x1x128xf32> to vector<1x128xf32>
    %210 = vector.broadcast %209 : vector<1x128xf32> to vector<128x128xf32>
    %211 = arith.addf %207, %210 : vector<128x128xf32>
    %cst_55 = arith.constant 5.000000e-01 : f32
    %212 = vector.broadcast %cst_55 : f32 to vector<128x128xf32>
    %213 = arith.mulf %212, %211 : vector<128x128xf32>
    %cst_56 = arith.constant 4.471500e-02 : f32
    %214 = vector.broadcast %cst_56 : f32 to vector<128x128xf32>
    %215 = arith.mulf %214, %211 : vector<128x128xf32>
    %216 = arith.mulf %215, %211 : vector<128x128xf32>
    %217 = arith.mulf %216, %211 : vector<128x128xf32>
    %218 = arith.addf %211, %217 : vector<128x128xf32>
    %cst_57 = arith.constant 0.797884583 : f32
    %219 = vector.broadcast %cst_57 : f32 to vector<128x128xf32>
    %220 = arith.mulf %219, %218 : vector<128x128xf32>
    %221 = math.tanh %220 : vector<128x128xf32>
    %cst_58 = arith.constant 1.000000e+00 : f32
    %222 = vector.broadcast %cst_58 : f32 to vector<128x128xf32>
    %223 = arith.addf %222, %221 : vector<128x128xf32>
    %224 = arith.mulf %213, %223 : vector<128x128xf32>
    %225 = arith.truncf %224 : vector<128x128xf32> to vector<128x128xbf16>
    %c0_59 = arith.constant 0 : index
    %c0_60 = arith.constant 0 : index
    %c0_61 = arith.constant 0 : index
    %226 = vector.load %arg9[%c0_59, %c0_60, %c0_61] : memref<1x128x32xbf16, #tpu.memory_space<vmem>>, vector<1x128x32xbf16>
    %227 = vector.shape_cast %226 : vector<1x128x32xbf16> to vector<128x32xbf16>
    %cst_62 = arith.constant dense<0.000000e+00> : vector<128x32xf32>
    %228 = tpu.matmul %225, %227, %cst_62 {dimension_numbers = #tpu.dot_dimension_numbers<[1], [0], [0], [1], [0, 0, 1, 1], [], []>} : vector<128x128xbf16>, vector<128x32xbf16>, vector<128x32xf32> -> vector<128x32xf32>
    %229 = vector.shape_cast %18 : vector<32xf32> to vector<1x32xf32>
    %230 = vector.broadcast %229 : vector<1x32xf32> to vector<128x32xf32>
    %231 = arith.addf %228, %230 : vector<128x32xf32>
    %232 = arith.addf %179, %231 : vector<128x32xf32>
    %c1_i32 = arith.constant 1 : i32
    %233 = arith.cmpi ne, %arg1, %c1_i32 : i32
    %234 = arith.extui %233 : i1 to i32
    %c0_i32_63 = arith.constant 0 : i32
    %235 = arith.cmpi ne, %234, %c0_i32_63 : i32
    scf.if %235 {
      %239 = vector.shape_cast %232 : vector<128x32xf32> to vector<1x128x32xf32>
      %c0_66 = arith.constant 0 : index
      %c0_67 = arith.constant 0 : index
      %c0_68 = arith.constant 0 : index
      %240 = vector.load %arg11[%c0_66, %c0_67, %c0_68] : memref<1x128x32xf32, #tpu.memory_space<vmem>>, vector<1x128x32xf32>
      tpu.vector_store %arg11[%c0_66, %c0_67, %c0_68], %239 {strides = array<i32>} : memref<1x128x32xf32, #tpu.memory_space<vmem>>, vector<1x128x32xf32>,
    } else {
    }
    %c1_i32_64 = arith.constant 1 : i32
    %236 = arith.cmpi eq, %arg1, %c1_i32_64 : i32
    %237 = arith.extui %236 : i1 to i32
    %c0_i32_65 = arith.constant 0 : i32
    %238 = arith.cmpi ne, %237, %c0_i32_65 : i32
    scf.if %238 {
      %c0_66 = arith.constant 0 : index
      %c0_67 = arith.constant 0 : index
      %239 = vector.load %arg10[%c0_66, %c0_67] : memref<2x32xf32, #tpu.memory_space<vmem>>, vector<2x32xf32>
      %240 = vector.extract_strided_slice %239 {offsets = [0, 0], sizes = [1, 32], strides = [1, 1]} : vector<2x32xf32> to vector<1x32xf32>
      %241 = vector.shape_cast %240 : vector<1x32xf32> to vector<32xf32>
      %242 = vector.extract_strided_slice %239 {offsets = [1, 0], sizes = [1, 32], strides = [1, 1]} : vector<2x32xf32> to vector<1x32xf32>
      %243 = vector.shape_cast %242 : vector<1x32xf32> to vector<32xf32>
      %cst_68 = arith.constant dense<0.000000e+00> : vector<128xf32>
      %244 = vector.multi_reduction <add>, %232, %cst_68 [1] : vector<128x32xf32> to vector<128xf32>
      %245 = vector.shape_cast %244 : vector<128xf32> to vector<128x1xf32>
      %cst_69 = arith.constant 3.200000e+01 : f32
      %246 = vector.broadcast %cst_69 : f32 to vector<128x1xf32>
      %247 = arith.divf %245, %246 : vector<128x1xf32>
      %248 = vector.broadcast %247 : vector<128x1xf32> to vector<128x32xf32>
      %249 = arith.subf %232, %248 : vector<128x32xf32>
      %250 = arith.mulf %249, %249 : vector<128x32xf32>
      %cst_70 = arith.constant dense<0.000000e+00> : vector<128xf32>
      %251 = vector.multi_reduction <add>, %250, %cst_70 [1] : vector<128x32xf32> to vector<128xf32>
      %252 = vector.shape_cast %251 : vector<128xf32> to vector<128x1xf32>
      %cst_71 = arith.constant 3.200000e+01 : f32
      %253 = vector.broadcast %cst_71 : f32 to vector<128x1xf32>
      %254 = arith.divf %252, %253 : vector<128x1xf32>
      %255 = vector.broadcast %247 : vector<128x1xf32> to vector<128x32xf32>
      %256 = arith.subf %232, %255 : vector<128x32xf32>
      %cst_72 = arith.constant 9.99999974E-6 : f32
      %257 = vector.broadcast %cst_72 : f32 to vector<128x1xf32>
      %258 = arith.addf %254, %257 : vector<128x1xf32>
      %259 = math.rsqrt %258 : vector<128x1xf32>
      %260 = vector.broadcast %259 : vector<128x1xf32> to vector<128x32xf32>
      %261 = arith.mulf %256, %260 : vector<128x32xf32>
      %262 = vector.shape_cast %241 : vector<32xf32> to vector<1x32xf32>
      %263 = vector.broadcast %262 : vector<1x32xf32> to vector<128x32xf32>
      %264 = arith.mulf %261, %263 : vector<128x32xf32>
      %265 = vector.shape_cast %243 : vector<32xf32> to vector<1x32xf32>
      %266 = vector.broadcast %265 : vector<1x32xf32> to vector<128x32xf32>
      %267 = arith.addf %264, %266 : vector<128x32xf32>
      %268 = vector.shape_cast %267 : vector<128x32xf32> to vector<1x128x32xf32>
      %c0_73 = arith.constant 0 : index
      %c0_74 = arith.constant 0 : index
      %c0_75 = arith.constant 0 : index
      %269 = vector.load %arg11[%c0_73, %c0_74, %c0_75] : memref<1x128x32xf32, #tpu.memory_space<vmem>>, vector<1x128x32xf32>
      tpu.vector_store %arg11[%c0_73, %c0_74, %c0_75], %268 {strides = array<i32>} : memref<1x128x32xf32, #tpu.memory_space<vmem>>, vector<1x128x32xf32>,
    } else {
    }
    return
  }
  func.func @transform_0(%arg0: i32, %arg1: i32) -> (i32, i32, i32) {
    %c0_i32 = arith.constant 0 : i32
    %c0_i32_0 = arith.constant 0 : i32
    %c0_i32_1 = arith.constant 0 : i32
    return %arg0, %c0_i32, %c0_i32_0 : i32, i32, i32
  }
  func.func @transform_1(%arg0: i32, %arg1: i32) -> (i32, i32, i32) {
    %c0_i32 = arith.constant 0 : i32
    %c0_i32_0 = arith.constant 0 : i32
    %c0_i32_1 = arith.constant 0 : i32
    return %arg1, %c0_i32, %c0_i32_0 : i32, i32, i32
  }
  func.func @transform_2(%arg0: i32, %arg1: i32) -> (i32, i32, i32) {
    %c0_i32 = arith.constant 0 : i32
    %c0_i32_0 = arith.constant 0 : i32
    %c0_i32_1 = arith.constant 0 : i32
    return %arg1, %c0_i32, %c0_i32_0 : i32, i32, i32
  }
  func.func @transform_3(%arg0: i32, %arg1: i32) -> (i32, i32, i32) {
    %c0_i32 = arith.constant 0 : i32
    %c0_i32_0 = arith.constant 0 : i32
    %c0_i32_1 = arith.constant 0 : i32
    return %arg1, %c0_i32, %c0_i32_0 : i32, i32, i32
  }
  func.func @transform_4(%arg0: i32, %arg1: i32) -> (i32, i32, i32) {
    %c0_i32 = arith.constant 0 : i32
    %c0_i32_0 = arith.constant 0 : i32
    %c0_i32_1 = arith.constant 0 : i32
    return %arg1, %c0_i32, %c0_i32_0 : i32, i32, i32
  }
  func.func @transform_5(%arg0: i32, %arg1: i32) -> (i32, i32, i32) {
    %c0_i32 = arith.constant 0 : i32
    %c0_i32_0 = arith.constant 0 : i32
    %c0_i32_1 = arith.constant 0 : i32
    return %arg1, %c0_i32, %c0_i32_0 : i32, i32, i32
  }
  func.func @transform_6(%arg0: i32, %arg1: i32) -> (i32, i32, i32) {
    %c0_i32 = arith.constant 0 : i32
    %c0_i32_0 = arith.constant 0 : i32
    %c0_i32_1 = arith.constant 0 : i32
    return %arg1, %c0_i32, %c0_i32_0 : i32, i32, i32
  }
  func.func @transform_7(%arg0: i32, %arg1: i32) -> (i32, i32, i32) {
    %c0_i32 = arith.constant 0 : i32
    %c0_i32_0 = arith.constant 0 : i32
    %c0_i32_1 = arith.constant 0 : i32
    return %arg1, %c0_i32, %c0_i32_0 : i32, i32, i32
  }
  func.func @transform_8(%arg0: i32, %arg1: i32) -> (i32, i32) {
    %c0_i32 = arith.constant 0 : i32
    %c0_i32_0 = arith.constant 0 : i32
    %c0_i32_1 = arith.constant 0 : i32
    return %c0_i32, %c0_i32_0 : i32, i32
  }
  func.func @transform_9(%arg0: i32, %arg1: i32) -> (i32, i32, i32) {
    %c0_i32 = arith.constant 0 : i32
    %c0_i32_0 = arith.constant 0 : i32
    %c0_i32_1 = arith.constant 0 : i32
    return %arg0, %c0_i32, %c0_i32_0 : i32, i32, i32
  }
}

</mosaic_0001>

<bundles_post_ra>
// kernel: transformer_forward.1
= control target key start
LH: loop header
LB: loop body
LE: loop exit
PB: predicated region body
PF: predicated region fallthrough
CT: control target
= control target key end

     0   :  { %s5921_s30 = smov 0   ;;  %s5923_s10 = smov 0   ;;  %s8106_s0 = inlined_call_operand.vmem [shape: f32[2,128,32], index: 0, kind: input, shape index: {}, may-alias: {0,9}]   ;;  %s8107_s1 = inlined_call_operand.vmem [shape: f32[2,6,32], index: 1, kind: input, shape index: {}]   ;;  %s8108_s2 = inlined_call_operand.vmem [shape: f32[2,1,96], index: 2, kind: input, shape index: {}]   ;;  %s8109_s3 = inlined_call_operand.vmem [shape: f32[2,1,128], index: 3, kind: input, shape index: {}]   ;;  %s8110_s4 = inlined_call_operand.vmem [shape: bf16[2,32,96], index: 4, kind: input, shape index: {}]   ;;  %s8111_s5 = inlined_call_operand.vmem [shape: bf16[2,32,32], index: 5, kind: input, shape index: {}]   ;;  %s8112_s6 = inlined_call_operand.vmem [shape: bf16[2,32,128], index: 6, kind: input, shape index: {}]   ;;  %s8113_s7 = inlined_call_operand.vmem [shape: bf16[2,128,32], index: 7, kind: input, shape index: {}]   ;;  %s8114_s8 = inlined_call_operand.vmem [shape: f32[2,32], index: 8, kind: input, shape index: {}]   ;;  %s8115_s9 = inlined_call_operand.vmem [shape: f32[2,128,32], index: 9, kind: output, shape index: {}, may-alias: {0,9}]  }
   0x1   :  { %8144 = sst [smem:[#allocation29_spill]] %s8106_s0  ;;  %s5925_s11 = smov 0  }
   0x2   :  { %s5927_s12 = smov 0   ;;  %s5929_s13 = smov 0  }
   0x3 LB: > { %8145 = sst [smem:[#allocation2_spill]] %s5853_s12  ;;  %s28_s14 = sadd.s32 1, %s5849_s11  ;;  %s5857_s13 = sphi %s5929_s13, %s19_s13   ;;  %s5853_s12 = sphi %s5927_s12, %s8212_s12   ;;  %s5849_s11 = sphi %s5925_s11, %s8214_s11   ;;  %s5845_s10 = sphi %s5923_s10, %s8210_s10   ;;  %s5841_s30 = sphi %s5921_s30, %s8213_s30  }
   0x4   : > { %s31_s15 = sadd.s32 1, %s5853_s12  ;;  %p29_p0 = scmp.ge.s32.totalorder %s28_s14, 2 }
   0x5   : > { %p4550_p1 = scmp.ge.s32.totalorder %s5857_s13, 1  ;;  %p364_p2 = scmp.lt.s32.totalorder %s5857_s13, 5 }
   0x6   : > { %s8216_s14 = smov (%p29_p0, %s28_s14), 0  ;;  %s8218_s15 = smov (!%p29_p0, %s31_s15), %s5853_s12 }
   0x7   : > { %8146 = sst [smem:[#allocation3_spill]] %s8216_s14  ;;  %p365_p3 = pnand %p4550_p1, %p364_p2 }
   0x8   : > { %p33_p4 = scmp.ge.s32.totalorder %s8218_s15, 2 }
   0x9   : > { %368 = sbr.rel (%p365_p3) target bundleno = 4235 (0x108b), region = 56 }
   0xa   : > { %s8220_s15 = smov (%p33_p4, %s8218_s15), 0 }
   0xb   : > { %8147 = sst [smem:[#allocation4_spill]] %s8220_s15 }
  0x10   : > { %p430_p5 = scmp.lt.s32.totalorder %s5845_s10, 1  ;;  %p435_p6 = scmp.lt.s32.totalorder %s5841_s30, 1 }
  0x11   : > { %s8148_s0 = sld [smem:[#allocation29_spill]]  ;;  %p4564_p7 = scmp.ne.s32.totalorder %s5841_s30, 0 }
  0x12   : > { %s8222_s10 = smov (!%p430_p5, %s5845_s10), 1  ;;  %vm491_vm0 = vcmask (!%p4564_p7), 261120  }
  0x13   : > { %s5955_s16 = scalar_select %p435_p6, %s5841_s30, 1 }
  0x14   : > { %s4663_s17 = sshll.u32 %s8222_s10, 7  ;;  %474 = sbr.rel (%p4564_p7) target bundleno = 38 (0x26), region = 60 }
  0x15   : > { %s4553_s21 = sshll.u32 %s5955_s16, 3  ;;  %s4664_s14 = sshll.u32 %s5955_s16, 4 }
  0x16   : > { %s5964_s24 = scalar_lea.vmem %s8107_s1, %s4553_s21  ;;  %s5978_s18 = scalar_lea.vmem %s8110_s4, %s4664_s14 }
  0x17   : > { %s434_s20 = scalar_lea.vmem %s8148_s0, %s4663_s17  ;;  %s5983_s22 = scalar_lea.vmem %s8111_s5, %s4664_s14 }
  0x18   : > { %s5988_s25 = scalar_lea.vmem %s8112_s6, %s4664_s14  ;;  %s4667_s26 = sshll.u32 %s5955_s16, 6  ;;  %v475_v0 = vld [vmem:[%s434_s20] sm:$0xff] (!%p4564_p7)  ;;  %v476_v1 = vld [vmem:[%s434_s20 + $0x8] sm:$0xff] (!%p4564_p7)  ;;  %v477_v2 = vld [vmem:[%s434_s20 + $0x10] sm:$0xff] (!%p4564_p7) }
  0x19   : > { %s5994_s29 = scalar_lea.vmem %s8113_s7, %s4667_s26  ;;  %s5999_s10 = scalar_lea.vmem %s8115_s9, %s4663_s17  ;;  %v478_v3 = vld [vmem:[%s434_s20 + $0x18] sm:$0xff] (!%p4564_p7)  ;;  %v479_v4 = vld [vmem:[%s434_s20 + $0x20] sm:$0xff] (!%p4564_p7)  ;;  %v480_v5 = vld [vmem:[%s434_s20 + $0x28] sm:$0xff] (!%p4564_p7) }
  0x1a   : > { %v481_v6 = vld [vmem:[%s434_s20 + $0x30] sm:$0xff] (!%p4564_p7)  ;;  %v482_v7 = vld [vmem:[%s434_s20 + $0x38] sm:$0xff] (!%p4564_p7)  ;;  %v483_v8 = vld [vmem:[%s434_s20 + $0x40] sm:$0xff] (!%p4564_p7) }
  0x1b   : > { %v484_v9 = vld [vmem:[%s434_s20 + $0x48] sm:$0xff]  ;;  %v485_v10 = vld [vmem:[%s434_s20 + $0x50] sm:$0xff]  ;;  %v486_v11 = vld [vmem:[%s434_s20 + $0x58] sm:$0xff] }
  0x1c   : > { %v487_v12 = vld [vmem:[%s434_s20 + $0x60] sm:$0xff]  ;;  %v488_v13 = vld [vmem:[%s434_s20 + $0x68] sm:$0xff]  ;;  %v489_v14 = vld [vmem:[%s434_s20 + $0x70] sm:$0xff] }
  0x1d   : > { %v490_v15 = vld [vmem:[%s434_s20 + $0x78] sm:$0xff] }
  0x1e   : > { %492 = vst.msk [vmem:[%s5999_s10] sm:$0xff] %vm491_vm0, %v475_v0  ;;  %493 = vst.msk [vmem:[%s5999_s10 + $0x8] sm:$0xff] %vm491_vm0, %v476_v1 }
  0x1f   : > { %494 = vst.msk [vmem:[%s5999_s10 + $0x10] sm:$0xff] %vm491_vm0, %v477_v2  ;;  %495 = vst.msk [vmem:[%s5999_s10 + $0x18] sm:$0xff] %vm491_vm0, %v478_v3 }
  0x20   : > { %496 = vst.msk [vmem:[%s5999_s10 + $0x20] sm:$0xff] %vm491_vm0, %v479_v4  ;;  %497 = vst.msk [vmem:[%s5999_s10 + $0x28] sm:$0xff] %vm491_vm0, %v480_v5 }
  0x21   : > { %498 = vst.msk [vmem:[%s5999_s10 + $0x30] sm:$0xff] %vm491_vm0, %v481_v6  ;;  %499 = vst.msk [vmem:[%s5999_s10 + $0x38] sm:$0xff] %vm491_vm0, %v482_v7 }
  0x22   : > { %500 = vst.msk [vmem:[%s5999_s10 + $0x40] sm:$0xff] %vm491_vm0, %v483_v8  ;;  %501 = vst.msk [vmem:[%s5999_s10 + $0x48] sm:$0xff] %vm491_vm0, %v484_v9 }
  0x23   : > { %502 = vst.msk [vmem:[%s5999_s10 + $0x50] sm:$0xff] %vm491_vm0, %v485_v10  ;;  %503 = vst.msk [vmem:[%s5999_s10 + $0x58] sm:$0xff] %vm491_vm0, %v486_v11 }
  0x24   : > { %504 = vst.msk [vmem:[%s5999_s10 + $0x60] sm:$0xff] %vm491_vm0, %v487_v12  ;;  %505 = vst.msk [vmem:[%s5999_s10 + $0x68] sm:$0xff] %vm491_vm0, %v488_v13 }
  0x25   : > { %506 = vst.msk [vmem:[%s5999_s10 + $0x70] sm:$0xff] %vm491_vm0, %v489_v14  ;;  %507 = vst.msk [vmem:[%s5999_s10 + $0x78] sm:$0xff] %vm491_vm0, %v490_v15 }
  0x26 PF: > { %v508_v16 = vld [vmem:[%s5999_s10] sm:$0xff]  ;;  %vm525_vm1 = vcmask 261120   ;;  %v510_v17 = vld [vmem:[%s5999_s10 + $0x10] sm:$0xff]  ;;  %v509_v18 = vld [vmem:[%s5999_s10 + $0x8] sm:$0xff]  ;;  %s8150_s15 = scalar_lea.vmem %s8108_s2, %s5955_s16  ;;  %vm1014_vm2 = vcmask 64512   ;;  %s5859_s17 = smov 96  }
  0x27   : > { %v526_v19 = vsel %vm525_vm1, %v508_v16, 0.0  ;;  %v532_v20 = vsel %vm525_vm1, %v510_v17, 0.0  ;;  %v511_v21 = vld [vmem:[%s5999_s10 + $0x18] sm:$0xff]  ;;  %v6041_v22 = vld [vmem:[%s5999_s10 + $0x20] sm:$0xff]  ;;  %v6044_v23 = vld [vmem:[%s5999_s10 + $0x28] sm:$0xff]  ;;  %v529_v24 = vsel %vm525_vm1, %v509_v18, 0.0  ;;  %s8206_s14 = scalar_lea.vmem %s8109_s3, %s5955_s16 }
  0x28   : > { %527 = vadd.xlane.f32.xlu0 %v526_v19  ;;  %533 = vadd.xlane.f32.xlu1 %v532_v20  ;;  %v535_v25 = vsel %vm525_vm1, %v511_v21, 0.0  ;;  %v6049_v26 = vld [vmem:[%s5999_s10 + $0x30] sm:$0xff]  ;;  %v6052_v27 = vld [vmem:[%s5999_s10 + $0x38] sm:$0xff]  ;;  %v538_v28 = vsel %vm525_vm1, %v6041_v22, 0.0  ;;  %v541_v29 = vsel %vm525_vm1, %v6044_v23, 0.0  ;;  %s5860_s20 = smov 64  }
  0x29   : > { %v544_v30 = vsel %vm525_vm1, %v6049_v26, 0.0  ;;  %v547_v31 = vsel %vm525_vm1, %v6052_v27, 0.0  ;;  %v6063_v32 = vld [vmem:[%s5999_s10 + $0x40] sm:$0xff]  ;;  %v6066_v33 = vld [vmem:[%s5999_s10 + $0x48] sm:$0xff]  ;;  %s5861_s27 = smov 88   ;;  %s5864_s19 = smov 80  }
  0x2a   : > { %v550_v34 = vsel %vm525_vm1, %v6063_v32, 0.0  ;;  %v553_v35 = vsel %vm525_vm1, %v6066_v33, 0.0  ;;  %v6073_v36 = vld [vmem:[%s5999_s10 + $0x50] sm:$0xff]  ;;  %v6076_v37 = vld [vmem:[%s5999_s10 + $0x58] sm:$0xff]  ;;  %s5865_s21 = smov 112   ;;  %s5866_s23 = smov 56  }
  0x2b   : > { %v556_v38 = vsel %vm525_vm1, %v6073_v36, 0.0  ;;  %v559_v39 = vsel %vm525_vm1, %v6076_v37, 0.0  ;;  %v6083_v40 = vld [vmem:[%s5999_s10 + $0x60] sm:$0xff]  ;;  %v6086_v41 = vld [vmem:[%s5999_s10 + $0x68] sm:$0xff]  ;;  %s5867_s26 = smov 72   ;;  %s5868_s28 = smov 104  }
  0x2c   : > { %530 = vadd.xlane.f32.xlu0 %v529_v24  ;;  %536 = vadd.xlane.f32.xlu1 %v535_v25  ;;  %v562_v42 = vsel %vm525_vm1, %v6083_v40, 0.0  ;;  %v565_v43 = vsel %vm525_vm1, %v6086_v41, 0.0  ;;  %v6093_v44 = vld [vmem:[%s5999_s10 + $0x70] sm:$0xff]  ;;  %v6096_v45 = vld [vmem:[%s5999_s10 + $0x78] sm:$0xff]  ;;  %s5869_s12 = smov 48   ;;  %s5870_s0 = smov 40  }
  0x2d   : > { %v568_v46 = vsel %vm525_vm1, %v6093_v44, 0.0  ;;  %v571_v47 = vsel %vm525_vm1, %v6096_v45, 0.0  ;;  %p4659_p8 = scmp.eq.s32.totalorder %s5841_s30, 1 }
  0x30   : > { %539 = vadd.xlane.f32.xlu0 %v538_v28  ;;  %542 = vadd.xlane.f32.xlu1 %v541_v29 }
  0x34   : > { %545 = vadd.xlane.f32.xlu0 %v544_v30  ;;  %548 = vadd.xlane.f32.xlu1 %v547_v31 }
  0x38   : > { %551 = vadd.xlane.f32.xlu0 %v550_v34  ;;  %554 = vadd.xlane.f32.xlu1 %v553_v35 }
  0x3c   : > { %557 = vadd.xlane.f32.xlu0 %v556_v38  ;;  %560 = vadd.xlane.f32.xlu1 %v559_v39 }
  0x40   : > { %563 = vadd.xlane.f32.xlu0 %v562_v42  ;;  %566 = vadd.xlane.f32.xlu1 %v565_v43 }
  0x44   : > { %569 = vadd.xlane.f32.xlu0 %v568_v46  ;;  %572 = vadd.xlane.f32.xlu1 %v571_v47 }
  0xb5   : > { %v528_v48 = vpop.xlane.xlu0 %527  ;;  %v534_v49 = vpop.xlane.xlu1 %533 }
  0xb6   : > { %v575_v50 = vmul.f32 0.03125, %v528_v48  ;;  %v577_v51 = vmul.f32 0.03125, %v534_v49 }
  0xb8   : > { %v6102_v52 = vsub.f32 %v508_v16, %v575_v50  ;;  %v6104_v53 = vsub.f32 %v510_v17, %v577_v51 }
  0xb9   : > { %v531_v54 = vpop.xlane.xlu0 %530  ;;  %v537_v55 = vpop.xlane.xlu1 %536 }
  0xba   : > { %v576_v56 = vmul.f32 0.03125, %v531_v54  ;;  %v578_v57 = vmul.f32 0.03125, %v537_v55  ;;  %v607_v58 = vmul.f32 %v6102_v52, %v6102_v52  ;;  %v609_v59 = vmul.f32 %v6104_v53, %v6104_v53 }
  0xbc   : > { %v6110_v60 = vsub.f32 %v509_v18, %v576_v56  ;;  %v6112_v61 = vsub.f32 %v511_v21, %v578_v57  ;;  %v623_v62 = vsel %vm525_vm1, %v607_v58, 0.0  ;;  %v629_v1 = vsel %vm525_vm1, %v609_v59, 0.0 }
  0xbd   : > { %624 = vadd.xlane.f32.xlu0 %v623_v62  ;;  %v540_v63 = vpop.xlane.xlu0 %539  ;;  %v543_v0 = vpop.xlane.xlu1 %542 }
  0xbe   : > { %v579_v2 = vmul.f32 0.03125, %v540_v63  ;;  %v580_v3 = vmul.f32 0.03125, %v543_v0  ;;  %v608_v4 = vmul.f32 %v6110_v60, %v6110_v60  ;;  %v610_v5 = vmul.f32 %v6112_v61, %v6112_v61 }
  0xc0   : > { %v6121_v6 = vsub.f32 %v6041_v22, %v579_v2  ;;  %v6124_v7 = vsub.f32 %v6044_v23, %v580_v3  ;;  %v626_v8 = vsel %vm525_vm1, %v608_v4, 0.0  ;;  %v632_v11 = vsel %vm525_vm1, %v610_v5, 0.0  ;;  %v5406_v5 = vld [vmem:[%s5978_s18 + $0x8] sm:$0xff]  }
  0xc1   : > { %630 = vadd.xlane.f32.xlu0 %v629_v1  ;;  %627 = vadd.xlane.f32.xlu1 %v626_v8  ;;  %v546_v9 = vpop.xlane.xlu0 %545  ;;  %v549_v10 = vpop.xlane.xlu1 %548 }
  0xc2   : > { %v581_v12 = vmul.f32 0.03125, %v546_v9  ;;  %v582_v13 = vmul.f32 0.03125, %v549_v10  ;;  %v611_v14 = vmul.f32 %v6121_v6, %v6121_v6  ;;  %v612_v15 = vmul.f32 %v6124_v7, %v6124_v7 }
  0xc4   : > { %v6133_v16 = vsub.f32 %v6049_v26, %v581_v12  ;;  %v6136_v17 = vsub.f32 %v6052_v27, %v582_v13  ;;  %v635_v18 = vsel %vm525_vm1, %v611_v14, 0.0  ;;  %v638_v21 = vsel %vm525_vm1, %v612_v15, 0.0 }
  0xc5   : > { %633 = vadd.xlane.f32.xlu1 %v632_v11  ;;  %636 = vadd.xlane.f32.xlu0 %v635_v18  ;;  %v552_v19 = vpop.xlane.xlu0 %551  ;;  %v555_v20 = vpop.xlane.xlu1 %554  ;;  %v735_v13 = vlaneseq }
  0xc6   : > { %v583_v22 = vmul.f32 0.03125, %v552_v19  ;;  %v584_v23 = vmul.f32 0.03125, %v555_v20  ;;  %v613_v24 = vmul.f32 %v6133_v16, %v6133_v16  ;;  %v614_v25 = vmul.f32 %v6136_v17, %v6136_v17 }
  0xc8   : > { %v6145_v26 = vsub.f32 %v6063_v32, %v583_v22  ;;  %v6148_v27 = vsub.f32 %v6066_v33, %v584_v23  ;;  %v641_v28 = vsel %vm525_vm1, %v613_v24, 0.0  ;;  %v644_v31 = vsel %vm525_vm1, %v614_v25, 0.0 }
  0xc9   : > { %639 = vadd.xlane.f32.xlu1 %v638_v21  ;;  %642 = vadd.xlane.f32.xlu0 %v641_v28  ;;  %v558_v29 = vpop.xlane.xlu0 %557  ;;  %v561_v30 = vpop.xlane.xlu1 %560  ;;  %v6197_v22 = vshrl.u32 %v735_v13, 7 }
  0xca   : > { %v585_v34 = vmul.f32 0.03125, %v558_v29  ;;  %v586_v35 = vmul.f32 0.03125, %v561_v30  ;;  %v615_v38 = vmul.f32 %v6145_v26, %v6145_v26  ;;  %v616_v32 = vmul.f32 %v6148_v27, %v6148_v27 }
  0xcb   : > { %8149 = vst [vmem:[#allocation5_spill] sm:$0xff] %v6197_v22 }
  0xcc   : > { %v6157_v39 = vsub.f32 %v6073_v36, %v585_v34  ;;  %v6160_v33 = vsub.f32 %v6076_v37, %v586_v35  ;;  %v647_v42 = vsel %vm525_vm1, %v615_v38, 0.0  ;;  %v650_v47 = vsel %vm525_vm1, %v616_v32, 0.0  ;;  %v524_v38 = vld [vmem:[%s5964_s24] sm:$0x3f] }
  0xcd   : > { %645 = vadd.xlane.f32.xlu1 %v644_v31  ;;  %648 = vadd.xlane.f32.xlu0 %v647_v42  ;;  %v564_v43 = vpop.xlane.xlu0 %563  ;;  %v567_v46 = vpop.xlane.xlu1 %566  ;;  %v8118_v31 = vsub.s32 0, %v6197_v22 }
  0xce   : > { %v587_v48 = vmul.f32 0.03125, %v564_v43  ;;  %v588_v49 = vmul.f32 0.03125, %v567_v46  ;;  %v617_v50 = vmul.f32 %v6157_v39, %v6157_v39  ;;  %v618_v36 = vmul.f32 %v6160_v33, %v6160_v33 }
  0xd0   : > { %v6169_v51 = vsub.f32 %v6083_v40, %v587_v48  ;;  %v6172_v37 = vsub.f32 %v6086_v41, %v588_v49  ;;  %v653_v54 = vsel %vm525_vm1, %v617_v50, 0.0  ;;  %v656_v57 = vsel %vm525_vm1, %v618_v36, 0.0 }
  0xd1   : > { %651 = vadd.xlane.f32.xlu1 %v650_v47  ;;  %654 = vadd.xlane.f32.xlu0 %v653_v54  ;;  %v570_v55 = vpop.xlane.xlu0 %569  ;;  %v573_v56 = vpop.xlane.xlu1 %572  ;;  %v6204_v49 = vrot.slane %v524_v38, %v8118_v31  ;;  %v8117_v50 = vsub.s32 1, %v6197_v22 }
  0xd2   : > { %v589_v58 = vmul.f32 0.03125, %v570_v55  ;;  %v590_v59 = vmul.f32 0.03125, %v573_v56  ;;  %v619_v62 = vmul.f32 %v6169_v51, %v6169_v51  ;;  %v620_v40 = vmul.f32 %v6172_v37, %v6172_v37 }
  0xd4   : > { %v6181_v41 = vsub.f32 %v6093_v44, %v589_v58  ;;  %v6184_v63 = vsub.f32 %v6096_v45, %v590_v59  ;;  %v659_v0 = vsel %vm525_vm1, %v619_v62, 0.0  ;;  %v662_v1 = vsel %vm525_vm1, %v620_v40, 0.0  ;;  %v5405_v45 = vld [vmem:[%s5978_s18] sm:$0xff]   ;;  %s5863_s18 = smov 120  }
  0xd5   : > { %657 = vadd.xlane.f32.xlu1 %v656_v57  ;;  %660 = vadd.xlane.f32.xlu0 %v659_v0  ;;  %v6211_v0 = vrot.slane %v524_v38, %v8117_v50 }
  0xd6   : > { %v621_v2 = vmul.f32 %v6181_v41, %v6181_v41  ;;  %v622_v3 = vmul.f32 %v6184_v63, %v6184_v63  ;;  %4869 = vmatprep.subr.bf16.mxu0 %v5405_v45 }
  0xd7   : > { %4870 = vmatpush3.bf16.msra.mxu0 %v5405_v45 }
  0xd8   : > { %v665_v4 = vsel %vm525_vm1, %v621_v2, 0.0  ;;  %v668_v44 = vsel %vm525_vm1, %v622_v3, 0.0  ;;  %4871 = vmatprep.subr.bf16.mxu0 %v5406_v5 }
  0xd9   : > { %663 = vadd.xlane.f32.xlu1 %v662_v1  ;;  %666 = vadd.xlane.f32.xlu0 %v665_v4 }
  0xdb   : > { %4872 = vmatpush3.bf16.msra.mxu0 %v5406_v5 }
  0xdd   : > { %669 = vadd.xlane.f32.xlu1 %v668_v44 }
 0x14a   : > { %v625_v8 = vpop.xlane.xlu0 %624 }
 0x14b   : > { %v671_v9 = vmul.f32 0.03125, %v625_v8 }
 0x14d   : > { %v687_v10 = vadd.f32 1e-06, %v671_v9 }
 0x14e   : > { %v628_v11 = vpop.xlane.xlu1 %627  ;;  %v631_v12 = vpop.xlane.xlu0 %630 }
 0x14f   : > { %5417 = vrsqrt.f32 %v687_v10  ;;  %v672_v14 = vmul.f32 0.03125, %v628_v11  ;;  %v673_v15 = vmul.f32 0.03125, %v631_v12 }
 0x151   : > { %v688_v18 = vadd.f32 1e-06, %v672_v14  ;;  %v689_v19 = vadd.f32 1e-06, %v673_v15 }
 0x152   : > { %v634_v20 = vpop.xlane.xlu1 %633  ;;  %v637_v21 = vpop.xlane.xlu0 %636 }
 0x153   : > { %5419 = vrsqrt.f32 %v688_v18  ;;  %v674_v23 = vmul.f32 0.03125, %v634_v20  ;;  %v675_v24 = vmul.f32 0.03125, %v637_v21 }
 0x154   : > { %5421 = vrsqrt.f32 %v689_v19 }
 0x155   : > { %v690_v25 = vadd.f32 1e-06, %v674_v23  ;;  %v691_v28 = vadd.f32 1e-06, %v675_v24 }
 0x156   : > { %v640_v29 = vpop.xlane.xlu1 %639  ;;  %v643_v30 = vpop.xlane.xlu0 %642 }
 0x157   : > { %5423 = vrsqrt.f32 %v690_v25  ;;  %v676_v34 = vmul.f32 0.03125, %v640_v29  ;;  %v677_v35 = vmul.f32 0.03125, %v643_v30 }
 0x158   : > { %5425 = vrsqrt.f32 %v691_v28 }
 0x159   : > { %v5418_v32 = vpop.eup %5417  ;;  %v692_v42 = vadd.f32 1e-06, %v676_v34  ;;  %v693_v43 = vadd.f32 1e-06, %v677_v35 }
 0x15a   : > { %v646_v46 = vpop.xlane.xlu1 %645  ;;  %v649_v47 = vpop.xlane.xlu0 %648  ;;  %v719_v48 = vmul.f32 %v5418_v32, %v6102_v52 }
 0x15b   : > { %5427 = vrsqrt.f32 %v692_v42  ;;  %v678_v36 = vmul.f32 0.03125, %v646_v46  ;;  %v679_v54 = vmul.f32 0.03125, %v649_v47 }
 0x15c   : > { %5429 = vrsqrt.f32 %v693_v43  ;;  %v739_v52 = vmul.f32 %v6204_v49, %v719_v48 }
 0x15d   : > { %v5420_v55 = vpop.eup %5419  ;;  %v694_v56 = vadd.f32 1e-06, %v678_v36  ;;  %v695_v57 = vadd.f32 1e-06, %v679_v54 }
 0x15e   : > { %v5422_v58 = vpop.eup %5421  ;;  %v652_v59 = vpop.xlane.xlu1 %651  ;;  %v720_v40 = vmul.f32 %v5420_v55, %v6110_v60  ;;  %v759_v10 = vadd.f32 %v6211_v0, %v739_v52 }
 0x15f   : > { %v655_v62 = vpop.xlane.xlu0 %654  ;;  %5431 = vrsqrt.f32 %v694_v56  ;;  %v680_v1 = vmul.f32 0.03125, %v652_v59  ;;  %v721_v3 = vmul.f32 %v5422_v58, %v6104_v53 }
 0x160   : > { %v681_v2 = vmul.f32 0.03125, %v655_v62  ;;  %5433 = vrsqrt.f32 %v695_v57  ;;  %v740_v4 = vmul.f32 %v6204_v49, %v720_v40 }
 0x161   : > { %v5424_v44 = vpop.eup %5423  ;;  %v696_v45 = vadd.f32 1e-06, %v680_v1  ;;  %v741_v14 = vmul.f32 %v6204_v49, %v721_v3 }
 0x162   : > { %v697_v5 = vadd.f32 1e-06, %v681_v2  ;;  %v5426_v8 = vpop.eup %5425  ;;  %v658_v9 = vpop.xlane.xlu1 %657  ;;  %v760_v11 = vadd.f32 %v6211_v0, %v740_v4  ;;  %v722_v12 = vmul.f32 %v5424_v44, %v6112_v61 }
 0x163   : > { %v661_v60 = vpop.xlane.xlu0 %660  ;;  %5435 = vrsqrt.f32 %v696_v45  ;;  %v682_v15 = vmul.f32 0.03125, %v658_v9  ;;  %v723_v20 = vmul.f32 %v5426_v8, %v6121_v6  ;;  %v761_v61 = vadd.f32 %v6211_v0, %v741_v14 }
 0x164   : > { %v683_v53 = vmul.f32 0.03125, %v661_v60  ;;  %5437 = vrsqrt.f32 %v697_v5  ;;  %v775_v18 = vpack.c.bf16 %v760_v11, %v759_v10  ;;  %v742_v19 = vmul.f32 %v6204_v49, %v722_v12 }
 0x165   : > { %v5428_v21 = vpop.eup %5427  ;;  %v698_v23 = vadd.f32 1e-06, %v682_v15  ;;  %v743_v35 = vmul.f32 %v6204_v49, %v723_v20 }
 0x166   : > { %v699_v24 = vadd.f32 1e-06, %v683_v53  ;;  %v5430_v25 = vpop.eup %5429  ;;  %v664_v28 = vpop.xlane.xlu1 %663  ;;  %4873 = vmatprep.mubr.msk.bf16.mxu0 %vm525_vm1, %v775_v18  ;;  %v762_v30 = vadd.f32 %v6211_v0, %v742_v19  ;;  %v724_v34 = vmul.f32 %v5428_v21, %v6124_v7 }
 0x167   : > { %v667_v29 = vpop.xlane.xlu0 %666  ;;  %5439 = vrsqrt.f32 %v698_v23  ;;  %v684_v38 = vmul.f32 0.03125, %v664_v28  ;;  %v725_v6 = vmul.f32 %v5430_v25, %v6133_v16  ;;  %v763_v7 = vadd.f32 %v6211_v0, %v743_v35 }
 0x168   : > { %v685_v32 = vmul.f32 0.03125, %v667_v29  ;;  %5441 = vrsqrt.f32 %v699_v24  ;;  %v776_v42 = vpack.c.bf16 %v762_v30, %v761_v61  ;;  %v744_v43 = vmul.f32 %v6204_v49, %v724_v34 }
 0x169   : > { %v5432_v46 = vpop.eup %5431  ;;  %v700_v47 = vadd.f32 1e-06, %v684_v38  ;;  %v745_v57 = vmul.f32 %v6204_v49, %v725_v6 }
 0x16a   : > { %v701_v48 = vadd.f32 1e-06, %v685_v32  ;;  %v5434_v36 = vpop.eup %5433  ;;  %v670_v54 = vpop.xlane.xlu1 %669  ;;  %4874 = vmatmul.mubr.msk.bf16.vlgmr.msra.gmra.mrb[0].mxu0 %vm525_vm1, %v776_v42  ;;  %v764_v55 = vadd.f32 %v6211_v0, %v744_v43  ;;  %v726_v56 = vmul.f32 %v5432_v46, %v6136_v17 }
 0x16b   : > { %5443 = vrsqrt.f32 %v700_v47  ;;  %v686_v16 = vmul.f32 0.03125, %v670_v54  ;;  %v727_v58 = vmul.f32 %v5434_v36, %v6145_v26  ;;  %v765_v2 = vadd.f32 %v6211_v0, %v745_v57 }
 0x16c   : > { %5445 = vrsqrt.f32 %v701_v48  ;;  %v777_v59 = vpack.c.bf16 %v764_v55, %v763_v7  ;;  %v746_v62 = vmul.f32 %v6204_v49, %v726_v56 }
 0x16d   : > { %v5436_v40 = vpop.eup %5435  ;;  %v702_v52 = vadd.f32 1e-06, %v686_v16  ;;  %v747_v4 = vmul.f32 %v6204_v49, %v727_v58 }
 0x16e   : > { %v5438_v1 = vpop.eup %5437  ;;  %4877 = vmatprep.mubr.msk.bf16.mxu0 %vm525_vm1, %v777_v59  ;;  %v766_v3 = vadd.f32 %v6211_v0, %v746_v62  ;;  %v728_v17 = vmul.f32 %v5436_v40, %v6148_v27 }
 0x16f   : > { %5447 = vrsqrt.f32 %v702_v52  ;;  %v729_v26 = vmul.f32 %v5438_v1, %v6157_v39  ;;  %v767_v9 = vadd.f32 %v6211_v0, %v747_v4 }
 0x170   : > { %v778_v44 = vpack.c.bf16 %v766_v3, %v765_v2  ;;  %v748_v45 = vmul.f32 %v6204_v49, %v728_v17 }
 0x171   : > { %v5440_v5 = vpop.eup %5439  ;;  %v749_v27 = vmul.f32 %v6204_v49, %v729_v26 }
 0x172   : > { %v5442_v8 = vpop.eup %5441  ;;  %4878 = vmatmul.mubr.msk.bf16.gmra.mrb[4].mxu0 %vm525_vm1, %v778_v44  ;;  %v768_v60 = vadd.f32 %v6211_v0, %v748_v45  ;;  %v730_v10 = vmul.f32 %v5440_v5, %v6160_v33 }
 0x173   : > { %v731_v11 = vmul.f32 %v5442_v8, %v6169_v51  ;;  %v769_v53 = vadd.f32 %v6211_v0, %v749_v27 }
 0x174   : > { %v779_v12 = vpack.c.bf16 %v768_v60, %v767_v9  ;;  %v750_v39 = vmul.f32 %v6204_v49, %v730_v10 }
 0x175   : > { %v5444_v14 = vpop.eup %5443  ;;  %v751_v20 = vmul.f32 %v6204_v49, %v731_v11 }
 0x176   : > { %v5446_v15 = vpop.eup %5445  ;;  %4881 = vmatprep.mubr.msk.bf16.mxu0 %vm525_vm1, %v779_v12  ;;  %v770_v18 = vadd.f32 %v6211_v0, %v750_v39  ;;  %v732_v19 = vmul.f32 %v5444_v14, %v6172_v37 }
 0x177   : > { %v733_v33 = vmul.f32 %v5446_v15, %v6181_v41  ;;  %v771_v24 = vadd.f32 %v6211_v0, %v751_v20 }
 0x178   : > { %v780_v21 = vpack.c.bf16 %v770_v18, %v769_v53  ;;  %v752_v51 = vmul.f32 %v6204_v49, %v732_v19 }
 0x179   : > { %v5448_v23 = vpop.eup %5447  ;;  %v753_v29 = vmul.f32 %v6204_v49, %v733_v33 }
 0x17a   : > { %4882 = vmatmul.mubr.msk.bf16.gmra.mrb[8].mxu0 %vm525_vm1, %v780_v21  ;;  %v772_v25 = vadd.f32 %v6211_v0, %v752_v51  ;;  %v734_v28 = vmul.f32 %v5448_v23, %v6184_v63  ;;  %v4565_v63 = vld [vmem:[%s8150_s15] ss:$0 sm:$0xff] }
 0x17b   : > { %v773_v41 = vadd.f32 %v6211_v0, %v753_v29 }
 0x17c   : > { %v781_v37 = vpack.c.bf16 %v772_v25, %v771_v24  ;;  %v754_v61 = vmul.f32 %v6204_v49, %v734_v28 }
 0x17e   : > { %4885 = vmatprep.mubr.msk.bf16.mxu0 %vm525_vm1, %v781_v37  ;;  %v774_v30 = vadd.f32 %v6211_v0, %v754_v61 }
 0x180   : > { %v782_v34 = vpack.c.bf16 %v774_v30, %v773_v41 }
 0x182   : > { %4886 = vmatmul.mubr.msk.bf16.gmra.mrb[12].mxu0 %vm525_vm1, %v782_v34 }
 0x23d   : > { %v4875_v35 = vpop.f32.mrb[0].mxu0 }
 0x23e   : > { %v864_v38 = vpop.f32.mrb[1].mxu0  ;;  %v873_v6 = vadd.f32 %v4875_v35, %v4565_v63 }
 0x23f   : > { %v4876_v32 = vpop.f32.mrb[2].mxu0  ;;  %v865_v43 = vadd.f32 %v4565_v63, %v864_v38 }
 0x240   : > { %v876_v42 = vadd.f32 %v4876_v32, %v4565_v63  ;;  %v867_v49 = vpop.f32.mrb[3].mxu0 }
 0x241   : > { %v868_v46 = vadd.f32 %v4565_v63, %v867_v49  ;;  %v930_v49 = vadd.s32 16, %v6197_v22 }
 0x242   : > { %v6271_v47 = vpack.c.bf16 %v876_v42, %v873_v6 }
 0x243   : > { %v6273_v0 = vpack.c.bf16 %v868_v46, %v865_v43  ;;  %v6353_v43 = vand.u32 127, %v735_v13  ;;  %v929_v46 = vadd.s32 8, %v6197_v22 }
 0x244   : > { %1000 = vrot.lane.b32.xlu1 %v6271_v47, %s5859_s17 }
 0x245   : > { %998 = vrot.lane.b32.xlu0 %v6273_v0, %s5859_s17  ;;  %v4879_v48 = vpop.f32.mrb[4].mxu0  ;;  %4905 = vmatprep.mubr.msk.bf16.mxu1 %vm1014_vm2, %v6273_v0  ;;  %vm948_vm3 = vcmp.gt.s32.totalorder %v6353_v43, %v930_v49  ;;  %vm947_vm4 = vcmp.gt.s32.totalorder %v6353_v43, %v929_v46  ;;  %vm946_vm5 = vcmp.gt.s32.totalorder %v6353_v43, %v6197_v22 }
 0x246   : > { %v880_v36 = vpop.f32.mrb[5].mxu0  ;;  %v889_v7 = vadd.f32 %v4879_v48, %v4565_v63  ;;  %v5862_v48 = vmov 0.0  }
 0x247   : > { %v4880_v54 = vpop.f32.mrb[6].mxu0  ;;  %v881_v57 = vadd.f32 %v4565_v63, %v880_v36  ;;  %v6358_v36 = vsel %vm948_vm3, -1e+30, %v5862_v48 }
 0x248   : > { %v892_v55 = vadd.f32 %v4880_v54, %v4565_v63  ;;  %v883_v56 = vpop.f32.mrb[7].mxu0  ;;  %v931_v54 = vadd.s32 24, %v6197_v22 }
 0x249   : > { %v884_v16 = vadd.f32 %v4565_v63, %v883_v56  ;;  %v6368_v56 = vsel %vm947_vm4, -1e+30, %v5862_v48 }
 0x24a   : > { %v6281_v58 = vpack.c.bf16 %v892_v55, %v889_v7  ;;  %vm949_vm6 = vcmp.gt.s32.totalorder %v6353_v43, %v931_v54 }
 0x24b   : > { %v6283_v59 = vpack.c.bf16 %v884_v16, %v881_v57  ;;  %v935_v57 = vadd.s32 56, %v6197_v22  ;;  %v6372_v16 = vsel %vm946_vm5, -1e+30, %v5862_v48  ;;  %vm1923_vm5 = vcmask 1043456  }
 0x24d   : > { %1002 = vrot.lane.b32.xlu1 %v6283_v59, %s5859_s17  ;;  %v4883_v62 = vpop.f32.mrb[8].mxu0  ;;  %vm953_vm7 = vcmp.gt.s32.totalorder %v6353_v43, %v935_v57 }
 0x24e   : > { %v896_v40 = vpop.f32.mrb[9].mxu0  ;;  %v905_v1 = vadd.f32 %v4883_v62, %v4565_v63 }
 0x24f   : > { %v4884_v52 = vpop.f32.mrb[10].mxu0  ;;  %v897_v17 = vadd.f32 %v4565_v63, %v896_v40 }
 0x250   : > { %v908_v2 = vadd.f32 %v4884_v52, %v4565_v63  ;;  %v899_v3 = vpop.f32.mrb[11].mxu0  ;;  %v934_v52 = vadd.s32 48, %v6197_v22 }
 0x251   : > { %v900_v4 = vadd.f32 %v4565_v63, %v899_v3  ;;  %1004 = vrot.lane.b32.xlu1 %v6281_v58, %s5859_s17  ;;  %v933_v3 = vadd.s32 40, %v6197_v22 }
 0x252   : > { %v6289_v26 = vpack.c.bf16 %v908_v2, %v905_v1  ;;  %vm952_vm8 = vcmp.gt.s32.totalorder %v6353_v43, %v934_v52  ;;  %v941_v52 = vadd.s32 104, %v6197_v22 }
 0x253   : > { %v6291_v44 = vpack.c.bf16 %v900_v4, %v897_v17  ;;  %v6386_v17 = vsel %vm949_vm6, -1e+30, %v5862_v48  ;;  %v932_v4 = vadd.s32 32, %v6197_v22  ;;  %vm951_vm9 = vcmp.gt.s32.totalorder %v6353_v43, %v933_v3 }
 0x254   : > { %vm959_vm4 = vcmp.gt.s32.totalorder %v6353_v43, %v941_v52 }
 0x255   : > { %1008 = vrot.lane.b32.xlu1 %v6289_v26, %s5859_s17  ;;  %1006 = vrot.lane.b32.xlu0 %v6291_v44, %s5859_s17  ;;  %v4887_v45 = vpop.f32.mrb[12].mxu0  ;;  %vm950_vm10 = vcmp.gt.s32.totalorder %v6353_v43, %v932_v4 }
 0x256   : > { %v912_v5 = vpop.f32.mrb[13].mxu0  ;;  %v921_v9 = vadd.f32 %v4887_v45, %v4565_v63 }
 0x257   : > { %v4888_v8 = vpop.f32.mrb[14].mxu0  ;;  %v913_v27 = vadd.f32 %v4565_v63, %v912_v5  ;;  %v6393_v5 = vsel %vm953_vm7, -1e+30, %v5862_v48 }
 0x258   : > { %v924_v60 = vadd.f32 %v4888_v8, %v4565_v63  ;;  %v915_v10 = vpop.f32.mrb[15].mxu0 }
 0x259   : > { %v916_v11 = vadd.f32 %v4565_v63, %v915_v10  ;;  %v6401_v10 = vsel %vm952_vm8, -1e+30, %v5862_v48 }
 0x25a   : > { %v6297_v12 = vpack.c.bf16 %v924_v60, %v921_v9  ;;  %v939_v60 = vadd.s32 88, %v6197_v22 }
 0x25b   : > { %v6299_v39 = vpack.c.bf16 %v916_v11, %v913_v27 }
 0x25c   : > { %1012 = vrot.lane.b32.xlu1 %v6297_v12, %s5859_s17  ;;  %vm957_vm11 = vcmp.gt.s32.totalorder %v6353_v43, %v939_v60 }
 0x25d   : > { %1010 = vrot.lane.b32.xlu0 %v6299_v39, %s5859_s17 }
 0x260   : > { %1314 = vrot.lane.b32.xlu1 %v6271_v47, %s5860_s20 }
 0x261   : > { %1312 = vrot.lane.b32.xlu0 %v6273_v0, %s5860_s20 }
 0x264   : > { %1318 = vrot.lane.b32.xlu1 %v6281_v58, %s5860_s20 }
 0x265   : > { %1316 = vrot.lane.b32.xlu0 %v6283_v59, %s5860_s20 }
 0x268   : > { %1322 = vrot.lane.b32.xlu1 %v6289_v26, %s5860_s20 }
 0x269   : > { %1320 = vrot.lane.b32.xlu0 %v6291_v44, %s5860_s20 }
 0x26c   : > { %1326 = vrot.lane.b32.xlu1 %v6297_v12, %s5860_s20 }
 0x26d   : > { %1457 = vrot.lane.b32.xlu0 %v6273_v0, %s5861_s27 }
 0x270   : > { %1459 = vrot.lane.b32.xlu1 %v6271_v47, %s5861_s27 }
 0x271   : > { %1324 = vrot.lane.b32.xlu0 %v6299_v39, %s5860_s20 }
 0x2b6   : > { %v1001_v53 = vpop.permute.xlu1 %1000 }
 0x2b7   : > { %v999_v14 = vpop.permute.xlu0 %998  ;;  %v1043_v19 = vsel %vm1014_vm2, %v1001_v53, 0 }
 0x2b8   : > { %5317 = vmatprep.subr.msk.bf16.mxu1 %vm1014_vm2, %v999_v14  ;;  %v1040_v15 = vsel %vm1014_vm2, %v999_v14, 0 }
 0x2b9   : > { %4890 = vmatpush3.bf16.xpose.msra.mxu1 %v1040_v15  ;;  %v938_v15 = vadd.s32 80, %v6197_v22 }
 0x2ba   : > { %5318 = vmatprep.subr.msk.bf16.mxu1 %vm1014_vm2, %v1001_v53  ;;  %v6410_v53 = vsel %vm951_vm9, -1e+30, %v5862_v48 }
 0x2bb   : > { %vm956_vm12 = vcmp.gt.s32.totalorder %v6353_v43, %v938_v15 }
 0x2bf   : > { %v1003_v18 = vpop.permute.xlu1 %1002 }
 0x2c0   : > { %v1046_v33 = vsel %vm1014_vm2, %v1003_v18, 0 }
 0x2c1   : > { %4892 = vmatpush3.bf16.xpose.msra.mxu1 %v1043_v19  ;;  %v937_v19 = vadd.s32 72, %v6197_v22 }
 0x2c2   : > { %5319 = vmatprep.subr.msk.bf16.mxu1 %vm1014_vm2, %v1003_v18 }
 0x2c3   : > { %v1005_v20 = vpop.permute.xlu1 %1004  ;;  %vm955_vm13 = vcmp.gt.s32.totalorder %v6353_v43, %v937_v19 }
 0x2c4   : > { %v1049_v25 = vsel %vm1014_vm2, %v1005_v20, 0 }
 0x2c7   : > { %v1009_v21 = vpop.permute.xlu1 %1008  ;;  %v1007_v51 = vpop.permute.xlu0 %1006 }
 0x2c8   : > { %v1052_v61 = vsel %vm1014_vm2, %v1007_v51, 0  ;;  %v1055_v34 = vsel %vm1014_vm2, %v1009_v21, 0 }
 0x2c9   : > { %4894 = vmatpush3.bf16.xpose.msra.mxu1 %v1046_v33 }
 0x2ca   : > { %5320 = vmatprep.subr.msk.bf16.mxu1 %vm1014_vm2, %v1005_v20  ;;  %v6419_v20 = vsel %vm950_vm10, -1e+30, %v5862_v48 }
 0x2ce   : > { %v1013_v23 = vpop.permute.xlu1 %1012 }
 0x2cf   : > { %v1011_v24 = vpop.permute.xlu0 %1010  ;;  %v1061_v42 = vsel %vm1014_vm2, %v1013_v23, 0 }
 0x2d0   : > { %v1058_v38 = vsel %vm1014_vm2, %v1011_v24, 0 }
 0x2d1   : > { %4896 = vmatpush3.bf16.xpose.msra.mxu1 %v1049_v25 }
 0x2d2   : > { %5321 = vmatprep.subr.msk.bf16.mxu1 %vm1014_vm2, %v1007_v51  ;;  %v1315_v29 = vpop.permute.xlu1 %1314 }
 0x2d3   : > { %v1313_v28 = vpop.permute.xlu0 %1312 }
 0x2d4   : > { %4921 = vmatprep.subr.bf16.mxu0 %v1313_v28 }
 0x2d5   : > { %4922 = vmatpush3.bf16.msra.mxu0 %v1313_v28  ;;  %v6436_v28 = vsel %vm956_vm12, -1e+30, %v5862_v48 }
 0x2d6   : > { %4923 = vmatprep.subr.bf16.mxu0 %v1315_v29  ;;  %v1319_v41 = vpop.permute.xlu1 %1318  ;;  %8151 = vst [vmem:[#allocation6_spill] sm:$0xff] %v6436_v28 }
 0x2d7   : > { %v1317_v37 = vpop.permute.xlu0 %1316 }
 0x2d9   : > { %4898 = vmatpush3.bf16.xpose.msra.mxu1 %v1052_v61  ;;  %4924 = vmatpush3.bf16.msra.mxu0 %v1315_v29 }
 0x2da   : > { %5322 = vmatprep.subr.msk.bf16.mxu1 %vm1014_vm2, %v1009_v21  ;;  %4925 = vmatprep.subr.bf16.mxu0 %v1317_v37  ;;  %v1323_v63 = vpop.permute.xlu1 %1322  ;;  %v936_v21 = vadd.s32 64, %v6197_v22 }
 0x2db   : > { %v1321_v30 = vpop.permute.xlu0 %1320 }
 0x2dc   : > { %vm954_vm14 = vcmp.gt.s32.totalorder %v6353_v43, %v936_v21 }
 0x2dd   : > { %4926 = vmatpush3.bf16.msra.mxu0 %v1317_v37 }
 0x2de   : > { %4927 = vmatprep.subr.bf16.mxu0 %v1319_v41  ;;  %v1327_v6 = vpop.permute.xlu1 %1326 }
 0x2df   : > { %v6330_v35 = vpop.permute.xlu0 %1457 }
 0x2e1   : > { %4900 = vmatpush3.bf16.xpose.msra.mxu1 %v1055_v34  ;;  %4928 = vmatpush3.bf16.msra.mxu0 %v1319_v41  ;;  %v942_v41 = vadd.s32 112, %v6197_v22 }
 0x2e2   : > { %5323 = vmatprep.subr.msk.bf16.mxu1 %vm1014_vm2, %v1011_v24  ;;  %4929 = vmatprep.subr.bf16.mxu0 %v1321_v30  ;;  %v6502_v60 = vpop.permute.xlu1 %1459 }
 0x2e3   : > { %v1325_v32 = vpop.permute.xlu0 %1324  ;;  %vm960_vm15 = vcmp.gt.s32.totalorder %v6353_v43, %v942_v41 }
 0x2e4   : > { %v6465_v46 = vsel %vm960_vm15, -1e+30, %v5862_v48 }
 0x2e5   : > { %4930 = vmatpush3.bf16.msra.mxu0 %v1321_v30  ;;  %v6445_v30 = vsel %vm955_vm13, -1e+30, %v5862_v48  ;;  %8152 = vst [vmem:[#allocation7_spill] sm:$0xff] %v6465_v46 }
 0x2e6   : > { %4931 = vmatprep.subr.bf16.mxu0 %v1323_v63 }
 0x2e9   : > { %4902 = vmatpush3.bf16.xpose.msra.mxu1 %v1058_v38  ;;  %4932 = vmatpush3.bf16.msra.mxu0 %v1323_v63  ;;  %v6452_v63 = vsel %vm954_vm14, -1e+30, %v5862_v48 }
 0x2ea   : > { %5324 = vmatprep.subr.msk.bf16.mxu1 %vm1014_vm2, %v1013_v23  ;;  %4933 = vmatprep.subr.bf16.mxu0 %v1325_v32  ;;  %v6428_v23 = vsel %vm957_vm11, -1e+30, %v5862_v48 }
 0x2ed   : > { %4934 = vmatpush3.bf16.msra.mxu0 %v1325_v32  ;;  %v940_v32 = vadd.s32 96, %v6197_v22 }
 0x2ee   : > { %4935 = vmatprep.subr.bf16.mxu0 %v1327_v6 }
 0x2ef   : > { %vm958_vm0 = vcmp.gt.s32.totalorder %v6353_v43, %v940_v32 }
 0x2f0   : > { %v6473_v57 = vsel %vm958_vm0, -1e+30, %v5862_v48 }
 0x2f1   : > { %4904 = vmatpush3.bf16.xpose.msra.mxu1 %v1061_v42  ;;  %4936 = vmatpush3.bf16.msra.mxu0 %v1327_v6  ;;  %8153 = vst [vmem:[#allocation8_spill] sm:$0xff] %v6473_v57 }
 0x2f2   : > { %5325 = vmatprep.subr.msk.bf16.mxu0 %vm1014_vm2, %v6330_v35 }
 0x2f8   : > { %4906 = vmatmul.mubr.msk.bf16.vlgmr.msra.gmra.mrb[0].mxu1 %vm1014_vm2, %v6271_v47 }
 0x2f9   : > { %4909 = vmatprep.mubr.msk.bf16.mxu1 %vm1014_vm2, %v6283_v59 }
 0x300   : > { %4910 = vmatmul.mubr.msk.bf16.gmra.mrb[4].mxu1 %vm1014_vm2, %v6281_v58 }
 0x301   : > { %4913 = vmatprep.mubr.msk.bf16.mxu1 %vm1014_vm2, %v6291_v44 }
 0x308   : > { %4914 = vmatmul.mubr.msk.bf16.gmra.mrb[8].mxu1 %vm1014_vm2, %v6289_v26 }
 0x309   : > { %4917 = vmatprep.mubr.msk.bf16.mxu1 %vm1014_vm2, %v6299_v39 }
 0x310   : > { %4918 = vmatmul.mubr.msk.bf16.gmra.mrb[12].mxu1 %vm1014_vm2, %v6297_v12 }
 0x3cb   : > { %v4907_v7 = vpop.f32.mrb[0].mxu1 }
 0x3cc   : > { %v6365_v55 = vadd.f32 %v4907_v7, %v6358_v36  ;;  %v1097_v13 = vpop.f32.mrb[1].mxu1 }
 0x3cd   : > { %v4908_v62 = vpop.f32.mrb[2].mxu1  ;;  %v6381_v2 = vadd.f32 %v1097_v13, %v6372_v16 }
 0x3ce   : > { %1164 = vmax.xlane.f32.xlu0 %v6365_v55  ;;  %v1100_v40 = vpop.f32.mrb[3].mxu1  ;;  %v6396_v8 = vadd.f32 %v4908_v62, %v6386_v17 }
 0x3cf   : > { %v6378_v1 = vadd.f32 %v1100_v40, %v6368_v56  ;;  %v943_v40 = vadd.s32 120, %v6197_v22 }
 0x3d1   : > { %1162 = vmax.xlane.f32.xlu1 %v6378_v1  ;;  %vm961_vm3 = vcmp.gt.s32.totalorder %v6353_v43, %v943_v40 }
 0x3d2   : > { %1160 = vmax.xlane.f32.xlu0 %v6381_v2  ;;  %v6488_v3 = vsel %vm961_vm3, -1e+30, %v5862_v48 }
 0x3d3   : > { %v4911_v45 = vpop.f32.mrb[4].mxu1 }
 0x3d4   : > { %v1113_v9 = vpop.f32.mrb[5].mxu1  ;;  %v6413_v18 = vadd.f32 %v4911_v45, %v6401_v10  ;;  %v6495_v45 = vsel %vm959_vm4, -1e+30, %v5862_v48 }
 0x3d5   : > { %v4912_v27 = vpop.f32.mrb[6].mxu1  ;;  %v6431_v24 = vadd.f32 %v1113_v9, %v6419_v20 }
 0x3d6   : > { %v6405_v11 = vadd.f32 %v4912_v27, %v6393_v5  ;;  %v1116_v14 = vpop.f32.mrb[7].mxu1  ;;  %1166 = vmax.xlane.f32.xlu0 %v6396_v8 }
 0x3d7   : > { %v6422_v33 = vadd.f32 %v1116_v14, %v6410_v53 }
 0x3d8   : > { %1174 = vmax.xlane.f32.xlu1 %v6405_v11 }
 0x3da   : > { %1172 = vmax.xlane.f32.xlu0 %v6413_v18 }
 0x3db   : > { %v4915_v51 = vpop.f32.mrb[8].mxu1 }
 0x3dc   : > { %v1129_v25 = vpop.f32.mrb[9].mxu1  ;;  %1170 = vmax.xlane.f32.xlu1 %v6422_v33  ;;  %v6448_v34 = vadd.f32 %v4915_v51, %v6436_v28 }
 0x3dd   : > { %v4916_v29 = vpop.f32.mrb[10].mxu1  ;;  %v6461_v42 = vadd.f32 %v1129_v25, %v6452_v63 }
 0x3de   : > { %v6440_v37 = vadd.f32 %v4916_v29, %v6428_v23  ;;  %v1132_v61 = vpop.f32.mrb[11].mxu1  ;;  %1168 = vmax.xlane.f32.xlu0 %v6431_v24 }
 0x3df   : > { %v6455_v38 = vadd.f32 %v1132_v61, %v6445_v30 }
 0x3e0   : > { %1182 = vmax.xlane.f32.xlu1 %v6440_v37 }
 0x3e2   : > { %1180 = vmax.xlane.f32.xlu0 %v6448_v34 }
 0x3e3   : > { %v4919_v6 = vpop.f32.mrb[12].mxu1 }
 0x3e4   : > { %v1145_v49 = vpop.f32.mrb[13].mxu1  ;;  %1178 = vmax.xlane.f32.xlu1 %v6455_v38  ;;  %v6470_v13 = vadd.f32 %v4919_v6, %v6465_v46 }
 0x3e5   : > { %v4920_v54 = vpop.f32.mrb[14].mxu1  ;;  %v6477_v62 = vadd.f32 %v1145_v49, %v6473_v57 }
 0x3e6   : > { %v1148_v7 = vpop.f32.mrb[15].mxu1  ;;  %1176 = vmax.xlane.f32.xlu0 %v6461_v42  ;;  %v6492_v4 = vadd.f32 %v4920_v54, %v6488_v3 }
 0x3e7   : > { %v6499_v9 = vadd.f32 %v1148_v7, %v6495_v45 }
 0x3ea   : > { %1188 = vmax.xlane.f32.xlu0 %v6470_v13 }
 0x3ee   : > { %1184 = vmax.xlane.f32.xlu0 %v6477_v62 }
 0x3f5   : > { %1463 = vrot.lane.b32.xlu1 %v6281_v58, %s5861_s27 }
 0x404   : > { %1461 = vrot.lane.b32.xlu0 %v6283_v59, %s5861_s27 }
 0x419   : > { %1190 = vmax.xlane.f32.xlu1 %v6492_v4 }
 0x41d   : > { %1186 = vmax.xlane.f32.xlu1 %v6499_v9 }
 0x45b   : > { %v1165_v27 = vpop.xlane.xlu0 %1164 }
 0x45c   : > { %v1194_v14 = vsub.f32 %v6365_v55, %v1165_v27 }
 0x45e   : > { %v1212_v15 = vmul.f32 1.442695, %v1194_v14  ;;  %v1163_v43 = vpop.xlane.xlu1 %1162 }
 0x45f   : > { %v1193_v19 = vsub.f32 %v6378_v1, %v1163_v43  ;;  %v1161_v21 = vpop.xlane.xlu0 %1160 }
 0x460   : > { %5449 = vpow2.f32 %v1212_v15  ;;  %v1192_v48 = vsub.f32 %v6381_v2, %v1161_v21 }
 0x461   : > { %v1210_v51 = vmul.f32 1.442695, %v1193_v19 }
 0x462   : > { %v1208_v25 = vmul.f32 1.442695, %v1192_v48 }
 0x463   : > { %5451 = vpow2.f32 %v1210_v51  ;;  %v1167_v29 = vpop.xlane.xlu0 %1166 }
 0x464   : > { %5453 = vpow2.f32 %v1208_v25  ;;  %v1195_v61 = vsub.f32 %v6396_v8, %v1167_v29 }
 0x465   : > { %v1175_v49 = vpop.xlane.xlu1 %1174 }
 0x466   : > { %v1214_v41 = vmul.f32 1.442695, %v1195_v61  ;;  %v1199_v21 = vsub.f32 %v6405_v11, %v1175_v49 }
 0x467   : > { %v1173_v6 = vpop.xlane.xlu0 %1172 }
 0x468   : > { %5455 = vpow2.f32 %v1214_v41  ;;  %v1198_v7 = vsub.f32 %v6413_v18, %v1173_v6  ;;  %v1222_v29 = vmul.f32 1.442695, %v1199_v21 }
 0x469   : > { %v1171_v40 = vpop.xlane.xlu1 %1170 }
 0x46a   : > { %v6508_v32 = vpop.eup %5449  ;;  %v1220_v27 = vmul.f32 1.442695, %v1198_v7  ;;  %v1197_v15 = vsub.f32 %v6422_v33, %v1171_v40 }
 0x46b   : > { %1244 = vadd.xlane.f32.xlu1 %v6508_v32  ;;  %v1169_v8 = vpop.xlane.xlu0 %1168 }
 0x46c   : > { %v1196_v14 = vsub.f32 %v6431_v24, %v1169_v8  ;;  %5457 = vpow2.f32 %v1220_v27  ;;  %v1218_v51 = vmul.f32 1.442695, %v1197_v15 }
 0x46d   : > { %v6511_v55 = vpop.eup %5451  ;;  %v1183_v43 = vpop.xlane.xlu1 %1182 }
 0x46e   : > { %v6513_v1 = vpop.eup %5453  ;;  %1242 = vadd.xlane.f32.xlu0 %v6511_v55  ;;  %v1216_v48 = vmul.f32 1.442695, %v1196_v14  ;;  %v1203_v11 = vsub.f32 %v6440_v37, %v1183_v43 }
 0x46f   : > { %1240 = vadd.xlane.f32.xlu1 %v6513_v1  ;;  %v1181_v54 = vpop.xlane.xlu0 %1180 }
 0x470   : > { %v1202_v25 = vsub.f32 %v6448_v34, %v1181_v54  ;;  %5459 = vpow2.f32 %v1216_v48  ;;  %v1230_v54 = vmul.f32 1.442695, %v1203_v11 }
 0x471   : > { %v1179_v61 = vpop.xlane.xlu1 %1178  ;;  %5461 = vpow2.f32 %v1218_v51 }
 0x472   : > { %v6517_v2 = vpop.eup %5455  ;;  %v1228_v41 = vmul.f32 1.442695, %v1202_v25  ;;  %5463 = vpow2.f32 %v1222_v29 }
 0x473   : > { %1246 = vadd.xlane.f32.xlu1 %v6517_v2  ;;  %v1177_v52 = vpop.xlane.xlu0 %1176 }
 0x474   : > { %v1200_v24 = vsub.f32 %v6461_v42, %v1177_v52  ;;  %5465 = vpow2.f32 %v1228_v41  ;;  %v1201_v42 = vsub.f32 %v6455_v38, %v1179_v61 }
 0x475   : > { %v6535_v34 = vpop.permute.xlu1 %1463 }
 0x476   : > { %v1224_v49 = vmul.f32 1.442695, %v1200_v24  ;;  %v6533_v7 = vpop.eup %5457  ;;  %v1226_v27 = vmul.f32 1.442695, %v1201_v42 }
 0x477   : > { %v1189_v19 = vpop.xlane.xlu0 %1188 }
 0x478   : > { %v1206_v18 = vsub.f32 %v6470_v13, %v1189_v19 }
 0x47a   : > { %v1236_v33 = vmul.f32 1.442695, %v1206_v18  ;;  %v6539_v40 = vpop.eup %5459 }
 0x47b   : > { %v1185_v6 = vpop.xlane.xlu0 %1184 }
 0x47c   : > { %v1204_v8 = vsub.f32 %v6477_v62, %v1185_v6  ;;  %5467 = vpow2.f32 %v1236_v33  ;;  %v6541_v62 = vpop.eup %5461 }
 0x47d   : > { %5469 = vpow2.f32 %v1224_v49  ;;  %v6546_v15 = vpop.eup %5463 }
 0x47e   : > { %v1232_v13 = vmul.f32 1.442695, %v1204_v8  ;;  %v6548_v38 = vpop.eup %5465 }
 0x47f   : > { %v1462_v18 = vpop.permute.xlu0 %1461 }
 0x480   : > { %5471 = vpow2.f32 %v1232_v13 }
 0x481   : > { %5473 = vpow2.f32 %v1230_v54 }
 0x484   : > { %1465 = vrot.lane.b32.xlu0 %v6291_v44, %s5861_s27  ;;  %1467 = vrot.lane.b32.xlu1 %v6289_v26, %s5861_s27 }
 0x486   : > { %v6553_v21 = vpop.eup %5467 }
 0x487   : > { %v6555_v48 = vpop.eup %5469 }
 0x48a   : > { %v6559_v51 = vpop.eup %5471 }
 0x48b   : > { %v6561_v25 = vpop.eup %5473 }
 0x4a3   : > { %1252 = vadd.xlane.f32.xlu0 %v6533_v7 }
 0x4a6   : > { %v1191_v52 = vpop.xlane.xlu1 %1190 }
 0x4a7   : > { %v1207_v37 = vsub.f32 %v6492_v4, %v1191_v52  ;;  %1248 = vadd.xlane.f32.xlu0 %v6539_v40 }
 0x4a8   : > { %1250 = vadd.xlane.f32.xlu1 %v6541_v62 }
 0x4a9   : > { %v1238_v14 = vmul.f32 1.442695, %v1207_v37 }
 0x4aa   : > { %v1187_v43 = vpop.xlane.xlu1 %1186 }
 0x4ab   : > { %5475 = vpow2.f32 %v1238_v14  ;;  %v1205_v19 = vsub.f32 %v6499_v9, %v1187_v43  ;;  %1254 = vadd.xlane.f32.xlu0 %v6546_v15  ;;  %v1498_v43 = vsel %vm1014_vm2, %v6330_v35, 0 }
 0x4ac   : > { %1260 = vadd.xlane.f32.xlu1 %v6548_v38  ;;  %5477 = vpow2.f32 %v1226_v27 }
 0x4ad   : > { %v1234_v4 = vmul.f32 1.442695, %v1205_v19 }
 0x4af   : > { %1268 = vadd.xlane.f32.xlu0 %v6553_v21  ;;  %5479 = vpow2.f32 %v1234_v4 }
 0x4b0   : > { %1256 = vadd.xlane.f32.xlu1 %v6555_v48 }
 0x4b3   : > { %1264 = vadd.xlane.f32.xlu0 %v6559_v51 }
 0x4b4   : > { %1262 = vadd.xlane.f32.xlu1 %v6561_v25 }
 0x4b5   : > { %v6565_v9 = vpop.eup %5475 }
 0x4b6   : > { %v6567_v29 = vpop.eup %5477 }
 0x4b7   : > { %1270 = vadd.xlane.f32.xlu0 %v6565_v9 }
 0x4b8   : > { %1258 = vadd.xlane.f32.xlu1 %v6567_v29 }
 0x4b9   : > { %v6571_v61 = vpop.eup %5479 }
 0x4bc   : > { %1266 = vadd.xlane.f32.xlu1 %v6571_v61 }
 0x4cd   : > { %1471 = vrot.lane.b32.xlu1 %v6297_v12, %s5861_s27  ;;  %1469 = vrot.lane.b32.xlu0 %v6299_v39, %s5861_s27 }
 0x4d1   : > { %1443 = vrot.lane.b32.xlu1 %v6271_v47, %s5863_s18  ;;  %1441 = vrot.lane.b32.xlu0 %v6273_v0, %s5863_s18 }
 0x4d5   : > { %1447 = vrot.lane.b32.xlu1 %v6281_v58, %s5863_s18  ;;  %1445 = vrot.lane.b32.xlu0 %v6283_v59, %s5863_s18 }
 0x4d9   : > { %1451 = vrot.lane.b32.xlu1 %v6289_v26, %s5863_s18  ;;  %1449 = vrot.lane.b32.xlu0 %v6291_v44, %s5863_s18 }
 0x4dd   : > { %1455 = vrot.lane.b32.xlu1 %v6297_v12, %s5863_s18  ;;  %1453 = vrot.lane.b32.xlu0 %v6299_v39, %s5863_s18 }
 0x4e1   : > { %2166 = vrot.lane.b32.xlu1 %v6271_v47, %s5864_s19  ;;  %2164 = vrot.lane.b32.xlu0 %v6273_v0, %s5864_s19 }
 0x4e5   : > { %2170 = vrot.lane.b32.xlu1 %v6281_v58, %s5864_s19  ;;  %2168 = vrot.lane.b32.xlu0 %v6283_v59, %s5864_s19 }
 0x4e9   : > { %2174 = vrot.lane.b32.xlu1 %v6289_v26, %s5864_s19  ;;  %2172 = vrot.lane.b32.xlu0 %v6291_v44, %s5864_s19 }
 0x4ed   : > { %2178 = vrot.lane.b32.xlu1 %v6297_v12, %s5864_s19  ;;  %2176 = vrot.lane.b32.xlu0 %v6299_v39, %s5864_s19 }
 0x4f1   : > { %2150 = vrot.lane.b32.xlu1 %v6271_v47, %s5865_s21  ;;  %2148 = vrot.lane.b32.xlu0 %v6273_v0, %s5865_s21 }
 0x4f5   : > { %2154 = vrot.lane.b32.xlu1 %v6281_v58, %s5865_s21  ;;  %2152 = vrot.lane.b32.xlu0 %v6283_v59, %s5865_s21 }
 0x4f8   : > { %v1245_v41 = vpop.xlane.xlu1 %1244 }
 0x4f9   : > { %2158 = vrot.lane.b32.xlu1 %v6289_v26, %s5865_s21  ;;  %2156 = vrot.lane.b32.xlu0 %v6291_v44, %s5865_s21 }
 0x4fb   : > { %v1243_v24 = vpop.xlane.xlu0 %1242 }
 0x4fc   : > { %5481 = vrcp.f32 %v1243_v24  ;;  %v1241_v6 = vpop.xlane.xlu1 %1240 }
 0x4fd   : > { %5483 = vrcp.f32 %v1241_v6  ;;  %2162 = vrot.lane.b32.xlu1 %v6297_v12, %s5865_s21  ;;  %2160 = vrot.lane.b32.xlu0 %v6299_v39, %s5865_s21 }
 0x4fe   : > { %5485 = vrcp.f32 %v1245_v41 }
 0x4ff   : > { %v1466_v35 = vpop.permute.xlu0 %1465 }
 0x500   : > { %v1247_v33 = vpop.xlane.xlu1 %1246 }
 0x501   : > { %5487 = vrcp.f32 %v1247_v33  ;;  %1770 = vrot.lane.b32.xlu1 %v6273_v0, %s5866_s23  ;;  %1774 = vrot.lane.b32.xlu0 %v6283_v59, %s5866_s23 }
 0x505   : > { %1772 = vrot.lane.b32.xlu1 %v6271_v47, %s5866_s23 }
 0x506   : > { %v5482_v8 = vpop.eup %5481 }
 0x507   : > { %v5484_v11 = vpop.eup %5483  ;;  %v1289_v49 = vmul.f32 %v5482_v8, %v6511_v55  ;;  %v1501_v55 = vsel %vm1014_vm2, %v6502_v60, 0 }
 0x508   : > { %v1288_v13 = vmul.f32 %v5484_v11, %v6513_v1  ;;  %v5486_v54 = vpop.eup %5485  ;;  %v1507_v1 = vsel %vm1014_vm2, %v6535_v34, 0 }
 0x509   : > { %1776 = vrot.lane.b32.xlu1 %v6281_v58, %s5866_s23  ;;  %v1290_v37 = vmul.f32 %v5486_v54, %v6508_v32  ;;  %v1504_v32 = vsel %vm1014_vm2, %v1462_v18, 0 }
 0x50a   : > { %v1304_v42 = vpack.c.bf16 %v1289_v49, %v1288_v13 }
 0x50b   : > { %v5488_v52 = vpop.eup %5487 }
 0x50c   : > { %v1291_v27 = vmul.f32 %v5488_v52, %v6517_v2  ;;  %4937 = vmatprep.mubr.bf16.mxu0 %v1304_v42  ;;  %v1510_v2 = vsel %vm1014_vm2, %v1466_v35, 0 }
 0x50e   : > { %v1305_v14 = vpack.c.bf16 %v1291_v27, %v1290_v37 }
 0x510   : > { %4938 = vmatmul.mubr.bf16.vlgmr.msra.gmra.mrb[16].mxu0 %v1305_v14 }
 0x511   : > { %4954 = vmatpush3.bf16.xpose.msra.mxu0 %v1498_v43 }
 0x512   : > { %5326 = vmatprep.subr.msk.bf16.mxu0 %vm1014_vm2, %v6502_v60  ;;  %v1468_v60 = vpop.permute.xlu1 %1467 }
 0x513   : > { %v1513_v41 = vsel %vm1014_vm2, %v1468_v60, 0 }
 0x519   : > { %4956 = vmatpush3.bf16.xpose.msra.mxu0 %v1501_v55 }
 0x51a   : > { %5327 = vmatprep.subr.msk.bf16.mxu0 %vm1014_vm2, %v1462_v18 }
 0x521   : > { %4958 = vmatpush3.bf16.xpose.msra.mxu0 %v1504_v32 }
 0x522   : > { %5328 = vmatprep.subr.msk.bf16.mxu0 %vm1014_vm2, %v6535_v34 }
 0x529   : > { %4960 = vmatpush3.bf16.xpose.msra.mxu0 %v1507_v1 }
 0x52a   : > { %5329 = vmatprep.subr.msk.bf16.mxu0 %vm1014_vm2, %v1466_v35 }
 0x530   : > { %v1253_v19 = vpop.xlane.xlu0 %1252 }
 0x531   : > { %4962 = vmatpush3.bf16.xpose.msra.mxu0 %v1510_v2 }
 0x532   : > { %5330 = vmatprep.subr.msk.bf16.mxu0 %vm1014_vm2, %v1468_v60 }
 0x534   : > { %v1249_v4 = vpop.xlane.xlu0 %1248 }
 0x535   : > { %5489 = vrcp.f32 %v1249_v4  ;;  %v1251_v18 = vpop.xlane.xlu1 %1250 }
 0x536   : > { %5491 = vrcp.f32 %v1251_v18 }
 0x537   : > { %5493 = vrcp.f32 %v1253_v19 }
 0x538   : > { %v1255_v24 = vpop.xlane.xlu0 %1254 }
 0x539   : > { %4964 = vmatpush3.bf16.xpose.msra.mxu0 %v1513_v41  ;;  %5495 = vrcp.f32 %v1255_v24  ;;  %v1261_v34 = vpop.xlane.xlu1 %1260 }
 0x53c   : > { %v1269_v6 = vpop.xlane.xlu0 %1268 }
 0x53d   : > { %v1257_v33 = vpop.xlane.xlu1 %1256 }
 0x53f   : > { %v5490_v8 = vpop.eup %5489 }
 0x540   : > { %v5492_v11 = vpop.eup %5491  ;;  %v1265_v49 = vpop.xlane.xlu0 %1264  ;;  %v1292_v13 = vmul.f32 %v5490_v8, %v6539_v40 }
 0x541   : > { %v5494_v54 = vpop.eup %5493  ;;  %v1263_v42 = vpop.xlane.xlu1 %1262  ;;  %v1293_v52 = vmul.f32 %v5492_v11, %v6541_v62 }
 0x542   : > { %5497 = vrcp.f32 %v1263_v42  ;;  %v1294_v43 = vmul.f32 %v5494_v54, %v6533_v7 }
 0x543   : > { %v5496_v37 = vpop.eup %5495  ;;  %v1306_v27 = vpack.c.bf16 %v1293_v52, %v1292_v13  ;;  %5499 = vrcp.f32 %v1257_v33 }
 0x544   : > { %v1271_v14 = vpop.xlane.xlu0 %1270  ;;  %v1295_v55 = vmul.f32 %v5496_v37, %v6546_v15  ;;  %5501 = vrcp.f32 %v1261_v34 }
 0x545   : > { %v1259_v32 = vpop.xlane.xlu1 %1258  ;;  %4941 = vmatprep.mubr.bf16.mxu0 %v1306_v27 }
 0x546   : > { %5503 = vrcp.f32 %v1259_v32  ;;  %v1307_v1 = vpack.c.bf16 %v1295_v55, %v1294_v43 }
 0x547   : > { %5505 = vrcp.f32 %v1265_v49 }
 0x548   : > { %4942 = vmatmul.mubr.bf16.gmra.mrb[20].mxu0 %v1307_v1  ;;  %v1470_v40 = vpop.permute.xlu0 %1469 }
 0x549   : > { %v1267_v35 = vpop.xlane.xlu1 %1266  ;;  %5331 = vmatprep.subr.msk.bf16.mxu0 %vm1014_vm2, %v1470_v40  ;;  %v1516_v62 = vsel %vm1014_vm2, %v1470_v40, 0 }
 0x54a   : > { %5507 = vrcp.f32 %v1267_v35  ;;  %4966 = vmatpush3.bf16.xpose.msra.mxu0 %v1516_v62 }
 0x54b   : > { %5509 = vrcp.f32 %v1271_v14 }
 0x54c   : > { %v1442_v2 = vpop.permute.xlu0 %1441  ;;  %v5498_v7 = vpop.eup %5497  ;;  %5511 = vrcp.f32 %v1269_v6 }
 0x54d   : > { %v1472_v15 = vpop.permute.xlu1 %1471  ;;  %v5500_v19 = vpop.eup %5499  ;;  %v1299_v41 = vmul.f32 %v5498_v7, %v6561_v25 }
 0x54e   : > { %5332 = vmatprep.subr.msk.bf16.mxu0 %vm1014_vm2, %v1472_v15  ;;  %v5502_v60 = vpop.eup %5501  ;;  %v1519_v34 = vsel %vm1014_vm2, %v1472_v15, 0  ;;  %v1296_v33 = vmul.f32 %v5500_v19, %v6555_v48 }
 0x54f   : > { %v1298_v6 = vmul.f32 %v5502_v60, %v6548_v38 }
 0x550   : > { %v5504_v4 = vpop.eup %5503  ;;  %v1446_v18 = vpop.permute.xlu0 %1445 }
 0x551   : > { %v1444_v24 = vpop.permute.xlu1 %1443  ;;  %v1297_v8 = vmul.f32 %v5504_v4, %v6567_v29  ;;  %v5506_v11 = vpop.eup %5505  ;;  %v1309_v42 = vpack.c.bf16 %v1299_v41, %v1298_v6 }
 0x552   : > { %4968 = vmatpush3.bf16.xpose.msra.mxu0 %v1519_v34  ;;  %v1300_v25 = vmul.f32 %v5506_v11, %v6559_v51 }
 0x553   : > { %v1308_v49 = vpack.c.bf16 %v1297_v8, %v1296_v33 }
 0x554   : > { %v5508_v13 = vpop.eup %5507  ;;  %v1450_v54 = vpop.permute.xlu0 %1449 }
 0x555   : > { %v5510_v52 = vpop.eup %5509  ;;  %v1448_v37 = vpop.permute.xlu1 %1447  ;;  %4945 = vmatprep.mubr.bf16.mxu0 %v1308_v49  ;;  %v1301_v27 = vmul.f32 %v5508_v13, %v6571_v61 }
 0x556   : > { %4946 = vmatmul.mubr.bf16.gmra.mrb[24].mxu0 %v1309_v42  ;;  %v5512_v14 = vpop.eup %5511  ;;  %v1303_v29 = vmul.f32 %v5510_v52, %v6565_v9 }
 0x557   : > { %v1310_v48 = vpack.c.bf16 %v1301_v27, %v1300_v25  ;;  %v1302_v38 = vmul.f32 %v5512_v14, %v6553_v21 }
 0x558   : > { %v1454_v43 = vpop.permute.xlu0 %1453 }
 0x559   : > { %v1452_v55 = vpop.permute.xlu1 %1451  ;;  %4949 = vmatprep.mubr.bf16.mxu0 %v1310_v48  ;;  %v1311_v1 = vpack.c.bf16 %v1303_v29, %v1302_v38 }
 0x55c   : > { %v2165_v32 = vpop.permute.xlu0 %2164 }
 0x55d   : > { %v1456_v40 = vpop.permute.xlu1 %1455  ;;  %5335 = vmatprep.subr.msk.bf16.mxu0 %vm1014_vm2, %v2165_v32  ;;  %v2205_v9 = vsel %vm1014_vm2, %v2165_v32, 0 }
 0x55e   : > { %4950 = vmatmul.mubr.bf16.gmra.mrb[28].mxu0 %v1311_v1 }
 0x55f   : > { %4969 = vmatprep.mubr.msk.bf16.mxu0 %vm1014_vm2, %v1442_v2 }
 0x560   : > { %v2169_v51 = vpop.permute.xlu0 %2168 }
 0x561   : > { %v2167_v61 = vpop.permute.xlu1 %2166 }
 0x562   : > { %v2208_v2 = vsel %vm1014_vm2, %v2167_v61, 0 }
 0x564   : > { %v2173_v35 = vpop.permute.xlu0 %2172 }
 0x565   : > { %v2171_v62 = vpop.permute.xlu1 %2170  ;;  %v2217_v13 = vsel %vm1014_vm2, %v2173_v35, 0 }
 0x566   : > { %4970 = vmatmul.mubr.msk.bf16.vlgmr.msra.gmra.mrb[32].mxu0 %vm1014_vm2, %v1444_v24  ;;  %v2214_v8 = vsel %vm1014_vm2, %v2171_v62, 0 }
 0x567   : > { %5054 = vmatpush3.bf16.xpose.msra.mxu0 %v2205_v9  ;;  %4973 = vmatprep.mubr.msk.bf16.mxu0 %vm1014_vm2, %v1446_v18  ;;  %v2211_v18 = vsel %vm1014_vm2, %v2169_v51, 0 }
 0x568   : > { %5336 = vmatprep.subr.msk.bf16.mxu0 %vm1014_vm2, %v2167_v61  ;;  %v2177_v21 = vpop.permute.xlu0 %2176 }
 0x569   : > { %v2175_v7 = vpop.permute.xlu1 %2174 }
 0x56a   : > { %v2220_v52 = vsel %vm1014_vm2, %v2175_v7, 0 }
 0x56c   : > { %v2149_v19 = vpop.permute.xlu0 %2148 }
 0x56d   : > { %v2179_v15 = vpop.permute.xlu1 %2178 }
 0x56e   : > { %4974 = vmatmul.mubr.msk.bf16.gmra.mrb[36].mxu0 %vm1014_vm2, %v1448_v37  ;;  %v2223_v37 = vsel %vm1014_vm2, %v2177_v21, 0  ;;  %v2226_v25 = vsel %vm1014_vm2, %v2179_v15, 0 }
 0x56f   : > { %5056 = vmatpush3.bf16.xpose.msra.mxu0 %v2208_v2  ;;  %4977 = vmatprep.mubr.msk.bf16.mxu0 %vm1014_vm2, %v1450_v54 }
 0x570   : > { %5337 = vmatprep.subr.msk.bf16.mxu0 %vm1014_vm2, %v2169_v51  ;;  %v2153_v4 = vpop.permute.xlu0 %2152 }
 0x571   : > { %v2151_v60 = vpop.permute.xlu1 %2150 }
 0x574   : > { %v2157_v34 = vpop.permute.xlu0 %2156 }
 0x575   : > { %v2155_v41 = vpop.permute.xlu1 %2154 }
 0x576   : > { %4978 = vmatmul.mubr.msk.bf16.gmra.mrb[40].mxu0 %vm1014_vm2, %v1452_v55 }
 0x577   : > { %5058 = vmatpush3.bf16.xpose.msra.mxu0 %v2211_v18  ;;  %4981 = vmatprep.mubr.msk.bf16.mxu0 %vm1014_vm2, %v1454_v43 }
 0x578   : > { %5338 = vmatprep.subr.msk.bf16.mxu0 %vm1014_vm2, %v2171_v62  ;;  %v2161_v11 = vpop.permute.xlu0 %2160 }
 0x579   : > { %v2159_v24 = vpop.permute.xlu1 %2158 }
 0x57c   : > { %v1775_v54 = vpop.permute.xlu0 %1774 }
 0x57d   : > { %v2163_v33 = vpop.permute.xlu1 %2162 }
 0x57e   : > { %4982 = vmatmul.mubr.msk.bf16.gmra.mrb[44].mxu0 %vm1014_vm2, %v1456_v40 }
 0x57f   : > { %5060 = vmatpush3.bf16.xpose.msra.mxu0 %v2214_v8  ;;  %5069 = vmatprep.mubr.msk.bf16.mxu0 %vm1014_vm2, %v2149_v19 }
 0x580   : > { %5339 = vmatprep.subr.msk.bf16.mxu0 %vm1014_vm2, %v2173_v35 }
 0x581   : > { %v1771_v6 = vpop.permute.xlu1 %1770 }
 0x582   : > { %4985 = vmatprep.subr.bf16.mxu1 %v1771_v6 }
 0x583   : > { %4986 = vmatpush3.bf16.msra.mxu1 %v1771_v6 }
 0x585   : > { %v1773_v49 = vpop.permute.xlu1 %1772 }
 0x586   : > { %4987 = vmatprep.subr.bf16.mxu1 %v1773_v49 }
 0x587   : > { %5062 = vmatpush3.bf16.xpose.msra.mxu0 %v2217_v13  ;;  %4988 = vmatpush3.bf16.msra.mxu1 %v1773_v49 }
 0x588   : > { %5340 = vmatprep.subr.msk.bf16.mxu0 %vm1014_vm2, %v2175_v7  ;;  %4989 = vmatprep.subr.bf16.mxu1 %v1775_v54 }
 0x589   : > { %v1777_v42 = vpop.permute.xlu1 %1776 }
 0x58b   : > { %4990 = vmatpush3.bf16.msra.mxu1 %v1775_v54 }
 0x58c   : > { %4991 = vmatprep.subr.bf16.mxu1 %v1777_v42 }
 0x58f   : > { %5064 = vmatpush3.bf16.xpose.msra.mxu0 %v2220_v52  ;;  %4992 = vmatpush3.bf16.msra.mxu1 %v1777_v42 }
 0x590   : > { %5341 = vmatprep.subr.msk.bf16.mxu0 %vm1014_vm2, %v2177_v21 }
 0x597   : > { %5066 = vmatpush3.bf16.xpose.msra.mxu0 %v2223_v37 }
 0x598   : > { %5342 = vmatprep.subr.msk.bf16.mxu0 %vm1014_vm2, %v2179_v15 }
 0x59f   : > { %5068 = vmatpush3.bf16.xpose.msra.mxu0 %v2226_v25 }
 0x5a6   : > { %5070 = vmatmul.mubr.msk.bf16.vlgmr.msra.gmra.mrb[48].mxu0 %vm1014_vm2, %v2151_v60 }
 0x5a7   : > { %5073 = vmatprep.mubr.msk.bf16.mxu0 %vm1014_vm2, %v2153_v4 }
 0x5ae   : > { %5074 = vmatmul.mubr.msk.bf16.gmra.mrb[52].mxu0 %vm1014_vm2, %v2155_v41 }
 0x5af   : > { %5077 = vmatprep.mubr.msk.bf16.mxu0 %vm1014_vm2, %v2157_v34 }
 0x5b6   : > { %5078 = vmatmul.mubr.msk.bf16.gmra.mrb[56].mxu0 %vm1014_vm2, %v2159_v24 }
 0x5b7   : > { %5081 = vmatprep.mubr.msk.bf16.mxu0 %vm1014_vm2, %v2161_v11 }
 0x5be   : > { %5082 = vmatmul.mubr.msk.bf16.gmra.mrb[60].mxu0 %vm1014_vm2, %v2163_v33 }
 0x5e3   : > { %v6678_v27 = vpop.f32.mrb[16].mxu0 }
 0x5e4   : > { %8154 = vst [vmem:[#allocation9_spill] sm:$0xff] %v6678_v27  ;;  %v6680_v14 = vpop.f32.mrb[17].mxu0 }
 0x5e5   : > { %8155 = vst [vmem:[#allocation10_spill] sm:$0xff] %v6680_v14  ;;  %v6682_v48 = vpop.f32.mrb[18].mxu0 }
 0x5e6   : > { %8156 = vst [vmem:[#allocation11_spill] sm:$0xff] %v6682_v48  ;;  %v6686_v29 = vpop.f32.mrb[19].mxu0 }
 0x5e7   : > { %8157 = vst [vmem:[#allocation12_spill] sm:$0xff] %v6686_v29 }
 0x61b   : > { %v6690_v38 = vpop.f32.mrb[20].mxu0 }
 0x61c   : > { %8158 = vst [vmem:[#allocation13_spill] sm:$0xff] %v6690_v38  ;;  %v6692_v32 = vpop.f32.mrb[21].mxu0 }
 0x61d   : > { %8159 = vst [vmem:[#allocation14_spill] sm:$0xff] %v6692_v32  ;;  %v6694_v1 = vpop.f32.mrb[22].mxu0 }
 0x61e   : > { %8160 = vst [vmem:[#allocation15_spill] sm:$0xff] %v6694_v1  ;;  %v6698_v51 = vpop.f32.mrb[23].mxu0 }
 0x61f   : > { %8161 = vst [vmem:[#allocation16_spill] sm:$0xff] %v6698_v51 }
 0x629   : > { %v6702_v35 = vpop.f32.mrb[24].mxu0 }
 0x62a   : > { %8162 = vst [vmem:[#allocation17_spill] sm:$0xff] %v6702_v35  ;;  %v6704_v62 = vpop.f32.mrb[25].mxu0 }
 0x62b   : > { %8163 = vst [vmem:[#allocation18_spill] sm:$0xff] %v6704_v62  ;;  %v6706_v9 = vpop.f32.mrb[26].mxu0 }
 0x62c   : > { %8164 = vst [vmem:[#allocation19_spill] sm:$0xff] %v6706_v9  ;;  %v6710_v7 = vpop.f32.mrb[27].mxu0 }
 0x62d   : > { %8165 = vst [vmem:[#allocation20_spill] sm:$0xff] %v6710_v7 }
 0x631   : > { %v6714_v2 = vpop.f32.mrb[28].mxu0 }
 0x632   : > { %8166 = vst [vmem:[#allocation21_spill] sm:$0xff] %v6714_v2  ;;  %v6716_v19 = vpop.f32.mrb[29].mxu0 }
 0x633   : > { %8167 = vst [vmem:[#allocation22_spill] sm:$0xff] %v6716_v19  ;;  %v6718_v60 = vpop.f32.mrb[30].mxu0 }
 0x634   : > { %8168 = vst [vmem:[#allocation23_spill] sm:$0xff] %v6718_v60  ;;  %v6722_v41 = vpop.f32.mrb[31].mxu0 }
 0x635   : > { %8169 = vst [vmem:[#allocation24_spill] sm:$0xff] %v6722_v41 }
 0x639   : > { %v4971_v24 = vpop.f32.mrb[32].mxu0 }
 0x63a   : > { %v6727_v34 = vadd.f32 %v4971_v24, %v6358_v36  ;;  %v1555_v33 = vpop.f32.mrb[33].mxu0 }
 0x63b   : > { %v4972_v8 = vpop.f32.mrb[34].mxu0  ;;  %v6734_v49 = vadd.f32 %v1555_v33, %v6372_v16 }
 0x63c   : > { %1622 = vmax.xlane.f32.xlu0 %v6727_v34  ;;  %v1558_v11 = vpop.f32.mrb[35].mxu0  ;;  %v6739_v54 = vadd.f32 %v4972_v8, %v6386_v17 }
 0x63d   : > { %v6731_v6 = vadd.f32 %v1558_v11, %v6368_v56 }
 0x63f   : > { %1620 = vmax.xlane.f32.xlu1 %v6731_v6 }
 0x640   : > { %1618 = vmax.xlane.f32.xlu0 %v6734_v49 }
 0x641   : > { %v4975_v13 = vpop.f32.mrb[36].mxu0 }
 0x642   : > { %v1571_v42 = vpop.f32.mrb[37].mxu0  ;;  %v6747_v24 = vadd.f32 %v4975_v13, %v6401_v10 }
 0x643   : > { %v6742_v52 = vadd.f32 %v1571_v42, %v6419_v20  ;;  %v4976_v37 = vpop.f32.mrb[38].mxu0 }
 0x644   : > { %1624 = vmax.xlane.f32.xlu0 %v6739_v54  ;;  %v1574_v25 = vpop.f32.mrb[39].mxu0  ;;  %v6750_v33 = vadd.f32 %v4976_v37, %v6393_v5 }
 0x645   : > { %1626 = vmax.xlane.f32.xlu1 %v6742_v52  ;;  %v6755_v11 = vadd.f32 %v1574_v25, %v6410_v53 }
 0x648   : > { %1630 = vmax.xlane.f32.xlu0 %v6747_v24 }
 0x649   : > { %1632 = vmax.xlane.f32.xlu1 %v6750_v33  ;;  %v4979_v8 = vpop.f32.mrb[40].mxu0 }
 0x64a   : > { %v1587_v42 = vpop.f32.mrb[41].mxu0  ;;  %v6763_v37 = vadd.f32 %v4979_v8, %v6436_v28 }
 0x64b   : > { %v6758_v50 = vadd.f32 %v1587_v42, %v6452_v63  ;;  %v4980_v31 = vpop.f32.mrb[42].mxu0 }
 0x64c   : > { %1628 = vmax.xlane.f32.xlu0 %v6755_v11  ;;  %v1590_v13 = vpop.f32.mrb[43].mxu0  ;;  %v6766_v4 = vadd.f32 %v4980_v31, %v6428_v23 }
 0x64d   : > { %1634 = vmax.xlane.f32.xlu1 %v6758_v50  ;;  %v6771_v42 = vadd.f32 %v1590_v13, %v6445_v30 }
 0x650   : > { %1638 = vmax.xlane.f32.xlu0 %v6763_v37 }
 0x651   : > { %1640 = vmax.xlane.f32.xlu1 %v6766_v4  ;;  %v4983_v25 = vpop.f32.mrb[44].mxu0 }
 0x652   : > { %v1603_v18 = vpop.f32.mrb[45].mxu0  ;;  %v6779_v31 = vadd.f32 %v4983_v25, %v6465_v46 }
 0x653   : > { %v6774_v21 = vadd.f32 %v1603_v18, %v6473_v57  ;;  %v4984_v15 = vpop.f32.mrb[46].mxu0 }
 0x654   : > { %1636 = vmax.xlane.f32.xlu0 %v6771_v42  ;;  %v1606_v8 = vpop.f32.mrb[47].mxu0  ;;  %v6782_v40 = vadd.f32 %v4984_v15, %v6488_v3 }
 0x655   : > { %1642 = vmax.xlane.f32.xlu1 %v6774_v21  ;;  %v6787_v13 = vadd.f32 %v1606_v8, %v6495_v45 }
 0x658   : > { %1646 = vmax.xlane.f32.xlu0 %v6779_v31 }
 0x659   : > { %1648 = vmax.xlane.f32.xlu1 %v6782_v40 }
 0x65c   : > { %1644 = vmax.xlane.f32.xlu0 %v6787_v13 }
 0x66a   : > { %1780 = vrot.lane.b32.xlu1 %v6289_v26, %s5866_s23 }
 0x672   : > { %1778 = vrot.lane.b32.xlu0 %v6291_v44, %s5866_s23 }
 0x679   : > { %v6794_v18 = vpop.f32.mrb[48].mxu0 }
 0x67a   : > { %v6796_v25 = vpop.f32.mrb[49].mxu0 }
 0x67b   : > { %v6798_v15 = vpop.f32.mrb[50].mxu0 }
 0x67c   : > { %v6800_v61 = vpop.f32.mrb[51].mxu0 }
 0x681   : > { %v6802_v43 = vpop.f32.mrb[52].mxu0 }
 0x682   : > { %v6804_v8 = vpop.f32.mrb[53].mxu0 }
 0x683   : > { %v6806_v55 = vpop.f32.mrb[54].mxu0 }
 0x684   : > { %v6808_v22 = vpop.f32.mrb[55].mxu0 }
 0x689   : > { %v6810_v2 = vpop.f32.mrb[56].mxu0 }
 0x68a   : > { %8170 = vst [vmem:[#allocation25_spill] sm:$0xff] %v6810_v2  ;;  %v6812_v60 = vpop.f32.mrb[57].mxu0 }
 0x68b   : > { %8171 = vst [vmem:[#allocation26_spill] sm:$0xff] %v6812_v60  ;;  %v6814_v19 = vpop.f32.mrb[58].mxu0 }
 0x68c   : > { %v6816_v41 = vpop.f32.mrb[59].mxu0 }
 0x691   : > { %v6818_v35 = vpop.f32.mrb[60].mxu0 }
 0x692   : > { %8172 = vst [vmem:[#allocation27_spill] sm:$0xff] %v6818_v35  ;;  %v6820_v9 = vpop.f32.mrb[61].mxu0 }
 0x693   : > { %8173 = vst [vmem:[#allocation28_spill] sm:$0xff] %v6820_v9  ;;  %v6822_v62 = vpop.f32.mrb[62].mxu0 }
 0x694   : > { %v6824_v7 = vpop.f32.mrb[63].mxu0 }
 0x6c9   : > { %v1623_v38 = vpop.xlane.xlu0 %1622 }
 0x6ca   : > { %v1652_v1 = vsub.f32 %v6727_v34, %v1623_v38 }
 0x6cc   : > { %v1670_v32 = vmul.f32 1.442695, %v1652_v1  ;;  %v1621_v27 = vpop.xlane.xlu1 %1620 }
 0x6cd   : > { %v1619_v51 = vpop.xlane.xlu0 %1618  ;;  %v1651_v29 = vsub.f32 %v6731_v6, %v1621_v27 }
 0x6ce   : > { %5513 = vpow2.f32 %v1670_v32  ;;  %v1650_v48 = vsub.f32 %v6734_v49, %v1619_v51 }
 0x6cf   : > { %v1668_v2 = vmul.f32 1.442695, %v1651_v29 }
 0x6d0   : > { %v1666_v14 = vmul.f32 1.442695, %v1650_v48 }
 0x6d1   : > { %v1625_v46 = vpop.xlane.xlu0 %1624 }
 0x6d2   : > { %5515 = vpow2.f32 %v1666_v14  ;;  %v1653_v35 = vsub.f32 %v6739_v54, %v1625_v46  ;;  %v1627_v9 = vpop.xlane.xlu1 %1626 }
 0x6d3   : > { %v1654_v28 = vsub.f32 %v6742_v52, %v1627_v9 }
 0x6d4   : > { %v1672_v57 = vmul.f32 1.442695, %v1653_v35 }
 0x6d5   : > { %v1631_v60 = vpop.xlane.xlu0 %1630  ;;  %v1674_v27 = vmul.f32 1.442695, %v1654_v28 }
 0x6d6   : > { %5517 = vpow2.f32 %v1672_v57  ;;  %v1656_v38 = vsub.f32 %v6747_v24, %v1631_v60  ;;  %v1633_v32 = vpop.xlane.xlu1 %1632 }
 0x6d7   : > { %v1657_v1 = vsub.f32 %v6750_v33, %v1633_v32  ;;  %5519 = vpow2.f32 %v1668_v2 }
 0x6d8   : > { %v6833_v51 = vpop.eup %5513  ;;  %v1678_v48 = vmul.f32 1.442695, %v1656_v38 }
 0x6d9   : > { %1702 = vadd.xlane.f32.xlu0 %v6833_v51  ;;  %v1629_v46 = vpop.xlane.xlu0 %1628  ;;  %v1680_v14 = vmul.f32 1.442695, %v1657_v1 }
 0x6da   : > { %5521 = vpow2.f32 %v1678_v48  ;;  %v1655_v29 = vsub.f32 %v6755_v11, %v1629_v46  ;;  %v1635_v35 = vpop.xlane.xlu1 %1634 }
 0x6db   : > { %5523 = vpow2.f32 %v1674_v27  ;;  %v1658_v60 = vsub.f32 %v6758_v50, %v1635_v35 }
 0x6dc   : > { %v6837_v9 = vpop.eup %5515  ;;  %v1676_v57 = vmul.f32 1.442695, %v1655_v29  ;;  %5525 = vpow2.f32 %v1680_v14 }
 0x6dd   : > { %1698 = vadd.xlane.f32.xlu1 %v6837_v9  ;;  %v1639_v34 = vpop.xlane.xlu0 %1638  ;;  %v1682_v52 = vmul.f32 1.442695, %v1658_v60 }
 0x6de   : > { %v1660_v28 = vsub.f32 %v6763_v37, %v1639_v34  ;;  %v1641_v2 = vpop.xlane.xlu1 %1640  ;;  %5527 = vpow2.f32 %v1676_v57 }
 0x6df   : > { %v1661_v6 = vsub.f32 %v6766_v4, %v1641_v2 }
 0x6e0   : > { %v6843_v49 = vpop.eup %5517  ;;  %v1686_v54 = vmul.f32 1.442695, %v1660_v28 }
 0x6e1   : > { %1704 = vadd.xlane.f32.xlu0 %v6843_v49  ;;  %v1637_v24 = vpop.xlane.xlu0 %1636  ;;  %v1688_v33 = vmul.f32 1.442695, %v1661_v6  ;;  %v6847_v11 = vpop.eup %5519 }
 0x6e2   : > { %5529 = vpow2.f32 %v1686_v54  ;;  %v1659_v50 = vsub.f32 %v6771_v42, %v1637_v24  ;;  %v1643_v38 = vpop.xlane.xlu1 %1642 }
 0x6e3   : > { %5531 = vpow2.f32 %v1682_v52  ;;  %v1662_v1 = vsub.f32 %v6774_v21, %v1643_v38 }
 0x6e4   : > { %v6849_v32 = vpop.eup %5521  ;;  %v1684_v37 = vmul.f32 1.442695, %v1659_v50  ;;  %5533 = vpow2.f32 %v1688_v33 }
 0x6e5   : > { %1700 = vadd.xlane.f32.xlu0 %v6847_v11  ;;  %1710 = vadd.xlane.f32.xlu1 %v6849_v32  ;;  %v1647_v4 = vpop.xlane.xlu0 %1646  ;;  %v6855_v27 = vpop.eup %5523  ;;  %v1690_v35 = vmul.f32 1.442695, %v1662_v1 }
 0x6e6   : > { %v1664_v48 = vsub.f32 %v6779_v31, %v1647_v4  ;;  %v6857_v42 = vpop.eup %5525  ;;  %5535 = vpow2.f32 %v1684_v37  ;;  %v1649_v14 = vpop.xlane.xlu1 %1648  ;;  %v6914_v37 = vadd.f32 %v6808_v22, %v6410_v53  ;;  %v6920_v4 = vadd.f32 %v6806_v55, %v6393_v5 }
 0x6e7   : > { %v1665_v24 = vsub.f32 %v6782_v40, %v1649_v14  ;;  %v6908_v40 = vadd.f32 %v6800_v61, %v6368_v56  ;;  %v6926_v61 = vadd.f32 %v6816_v41, %v6445_v30  ;;  %v6932_v22 = vadd.f32 %v6814_v19, %v6428_v23 }
 0x6e8   : > { %v1694_v46 = vmul.f32 1.442695, %v1664_v48  ;;  %v6861_v57 = vpop.eup %5527  ;;  %v6937_v55 = vadd.f32 %v6824_v7, %v6495_v45  ;;  %v6942_v41 = vadd.f32 %v6822_v62, %v6488_v3  ;;  %v6947_v7 = vadd.f32 %v6796_v25, %v6372_v16 }
 0x6e9   : > { %1712 = vadd.xlane.f32.xlu0 %v6857_v42  ;;  %1706 = vadd.xlane.f32.xlu1 %v6855_v27  ;;  %v1645_v29 = vpop.xlane.xlu0 %1644  ;;  %v1696_v50 = vmul.f32 1.442695, %v1665_v24 }
 0x6ea   : > { %5537 = vpow2.f32 %v1694_v46  ;;  %v1781_v34 = vpop.permute.xlu1 %1780  ;;  %v1663_v52 = vsub.f32 %v6787_v13, %v1645_v29 }
 0x6eb   : > { %5539 = vpow2.f32 %v1690_v35 }
 0x6ec   : > { %v6863_v60 = vpop.eup %5529  ;;  %v1692_v33 = vmul.f32 1.442695, %v1663_v52  ;;  %v6954_v52 = vadd.f32 %v6794_v18, %v6358_v36  ;;  %v6963_v18 = vadd.f32 %v6798_v15, %v6386_v17 }
 0x6ed   : > { %1708 = vadd.xlane.f32.xlu0 %v6861_v57  ;;  %1718 = vadd.xlane.f32.xlu1 %v6863_v60  ;;  %v1779_v21 = vpop.permute.xlu0 %1778  ;;  %v6867_v31 = vpop.eup %5531 }
 0x6ee   : > { %4993 = vmatprep.subr.bf16.mxu1 %v1779_v21  ;;  %v6869_v28 = vpop.eup %5533  ;;  %5541 = vpow2.f32 %v1692_v33 }
 0x6ef   : > { %4994 = vmatpush3.bf16.msra.mxu1 %v1779_v21  ;;  %5543 = vpow2.f32 %v1696_v50 }
 0x6f0   : > { %4995 = vmatprep.subr.bf16.mxu1 %v1781_v34  ;;  %v6873_v2 = vpop.eup %5535 }
 0x6f1   : > { %1720 = vadd.xlane.f32.xlu0 %v6869_v28  ;;  %1714 = vadd.xlane.f32.xlu1 %v6867_v31 }
 0x6f3   : > { %4996 = vmatpush3.bf16.msra.mxu1 %v1781_v34 }
 0x6f4   : > { %v6875_v6 = vpop.eup %5537 }
 0x6f5   : > { %1716 = vadd.xlane.f32.xlu0 %v6873_v2  ;;  %1726 = vadd.xlane.f32.xlu1 %v6875_v6  ;;  %v6879_v54 = vpop.eup %5539 }
 0x6f8   : > { %v6895_v38 = vpop.eup %5541 }
 0x6f9   : > { %1722 = vadd.xlane.f32.xlu1 %v6879_v54  ;;  %v6899_v13 = vpop.eup %5543 }
 0x70a   : > { %1784 = vrot.lane.b32.xlu1 %v6297_v12, %s5866_s23 }
 0x70b   : > { %1782 = vrot.lane.b32.xlu0 %v6299_v39, %s5866_s23 }
 0x70e   : > { %2764 = vrot.lane.b32.xlu1 %v6271_v47, %s5867_s26 }
 0x712   : > { %2766 = vrot.lane.b32.xlu1 %v6283_v59, %s5867_s26 }
 0x716   : > { %2768 = vrot.lane.b32.xlu1 %v6281_v58, %s5867_s26 }
 0x71a   : > { %2772 = vrot.lane.b32.xlu1 %v6289_v26, %s5867_s26 }
 0x71e   : > { %2776 = vrot.lane.b32.xlu1 %v6297_v12, %s5867_s26 }
 0x722   : > { %2748 = vrot.lane.b32.xlu1 %v6271_v47, %s5868_s28 }
 0x726   : > { %2752 = vrot.lane.b32.xlu1 %v6281_v58, %s5868_s28 }
 0x72a   : > { %2756 = vrot.lane.b32.xlu1 %v6289_v26, %s5868_s28  ;;  %1724 = vadd.xlane.f32.xlu0 %v6895_v38 }
 0x72e   : > { %2760 = vrot.lane.b32.xlu1 %v6297_v12, %s5868_s28  ;;  %1728 = vadd.xlane.f32.xlu0 %v6899_v13 }
 0x744   : > { %2762 = vrot.lane.b32.xlu0 %v6273_v0, %s5867_s26 }
 0x748   : > { %2770 = vrot.lane.b32.xlu0 %v6291_v44, %s5867_s26 }
 0x74c   : > { %2774 = vrot.lane.b32.xlu0 %v6299_v39, %s5867_s26 }
 0x750   : > { %2746 = vrot.lane.b32.xlu0 %v6273_v0, %s5868_s28 }
 0x752   : > { %2327 = vmax.xlane.f32.xlu1 %v6908_v40 }
 0x754   : > { %2750 = vrot.lane.b32.xlu0 %v6283_v59, %s5868_s28 }
 0x756   : > { %2335 = vmax.xlane.f32.xlu1 %v6914_v37 }
 0x758   : > { %2754 = vrot.lane.b32.xlu0 %v6291_v44, %s5868_s28 }
 0x75a   : > { %2339 = vmax.xlane.f32.xlu1 %v6920_v4 }
 0x75c   : > { %2758 = vrot.lane.b32.xlu0 %v6299_v39, %s5868_s28 }
 0x75e   : > { %2343 = vmax.xlane.f32.xlu1 %v6926_v61 }
 0x762   : > { %2347 = vmax.xlane.f32.xlu1 %v6932_v22 }
 0x766   : > { %2351 = vmax.xlane.f32.xlu1 %v6937_v55  ;;  %v1703_v1 = vpop.xlane.xlu0 %1702 }
 0x76a   : > { %2355 = vmax.xlane.f32.xlu1 %v6942_v41  ;;  %v1699_v48 = vpop.xlane.xlu1 %1698 }
 0x76b   : > { %5545 = vrcp.f32 %v1699_v48 }
 0x76e   : > { %v1705_v46 = vpop.xlane.xlu0 %1704 }
 0x772   : > { %v1711_v19 = vpop.xlane.xlu1 %1710  ;;  %v1701_v14 = vpop.xlane.xlu0 %1700 }
 0x773   : > { %5547 = vrcp.f32 %v1701_v14 }
 0x774   : > { %5549 = vrcp.f32 %v1705_v46 }
 0x775   : > { %v5546_v62 = vpop.eup %5545 }
 0x776   : > { %v1707_v29 = vpop.xlane.xlu1 %1706  ;;  %v1713_v35 = vpop.xlane.xlu0 %1712  ;;  %v1746_v50 = vmul.f32 %v5546_v62, %v6837_v9  ;;  %v6972_v9 = vadd.f32 %v6804_v8, %v6419_v20 }
 0x77a   : > { %v1719_v21 = vpop.xlane.xlu1 %1718  ;;  %v1709_v34 = vpop.xlane.xlu0 %1708 }
 0x77b   : > { %2479 = vrot.lane.b32.xlu1 %v6271_v47, %s5869_s12  ;;  %2325 = vmax.xlane.f32.xlu0 %v6947_v7  ;;  %5551 = vrcp.f32 %v1709_v34 }
 0x77c   : > { %5553 = vrcp.f32 %v1703_v1 }
 0x77d   : > { %v5548_v24 = vpop.eup %5547  ;;  %5555 = vrcp.f32 %v1707_v29 }
 0x77e   : > { %v1715_v33 = vpop.xlane.xlu1 %1714  ;;  %v1721_v25 = vpop.xlane.xlu0 %1720  ;;  %v1747_v48 = vmul.f32 %v5548_v24, %v6847_v11  ;;  %5557 = vrcp.f32 %v1713_v35 }
 0x77f   : > { %2485 = vrot.lane.b32.xlu1 %v6291_v44, %s5869_s12  ;;  %2329 = vmax.xlane.f32.xlu0 %v6954_v52  ;;  %v5550_v29 = vpop.eup %5549 }
 0x780   : > { %v1762_v46 = vpack.c.bf16 %v1747_v48, %v1746_v50  ;;  %v1749_v35 = vmul.f32 %v5550_v29, %v6843_v49  ;;  %v6978_v50 = vadd.f32 %v6802_v43, %v6401_v10  ;;  %v8174_v49 = vld [vmem:[#allocation26_spill] sm:$0xff] }
 0x781   : > { %v6986_v29 = vadd.f32 %v8174_v49, %v6452_v63 }
 0x782   : > { %v6965_v14 = vpop.xlane.xlu1 %1726  ;;  %v1717_v1 = vpop.xlane.xlu0 %1716  ;;  %5001 = vmatprep.mubr.bf16.mxu1 %v1762_v46 }
 0x783   : > { %2487 = vrot.lane.b32.xlu1 %v6289_v26, %s5869_s12  ;;  %2331 = vmax.xlane.f32.xlu0 %v6963_v18  ;;  %5559 = vrcp.f32 %v1717_v1 }
 0x784   : > { %5561 = vrcp.f32 %v1711_v19 }
 0x785   : > { %v5552_v34 = vpop.eup %5551  ;;  %5563 = vrcp.f32 %v1715_v33 }
 0x786   : > { %v1723_v11 = vpop.xlane.xlu1 %1722  ;;  %v1783_v15 = vpop.permute.xlu0 %1782  ;;  %v1751_v8 = vmul.f32 %v5552_v34, %v6861_v57  ;;  %5565 = vrcp.f32 %v1721_v25  ;;  %v8175_v34 = vld [vmem:[#allocation6_spill] sm:$0xff] }
 0x787   : > { %4997 = vmatprep.subr.bf16.mxu1 %v1783_v15  ;;  %v5554_v62 = vpop.eup %5553  ;;  %2333 = vmax.xlane.f32.xlu0 %v6972_v9  ;;  %5567 = vrcp.f32 %v1719_v21 }
 0x788   : > { %4998 = vmatpush3.bf16.msra.mxu1 %v1783_v15  ;;  %v5556_v24 = vpop.eup %5555  ;;  %v1748_v19 = vmul.f32 %v5554_v62, %v6833_v51  ;;  %v8176_v62 = vld [vmem:[#allocation25_spill] sm:$0xff]  ;;  %5569 = vrcp.f32 %v1723_v11 }
 0x789   : > { %v1750_v33 = vmul.f32 %v5556_v24, %v6855_v27  ;;  %v5558_v1 = vpop.eup %5557  ;;  %v6992_v27 = vadd.f32 %v8176_v62, %v8175_v34 }
 0x78a   : > { %v1785_v48 = vpop.permute.xlu1 %1784  ;;  %v1763_v46 = vpack.c.bf16 %v1749_v35, %v1748_v19  ;;  %v1753_v25 = vmul.f32 %v5558_v1, %v6857_v42  ;;  %v8177_v19 = vld [vmem:[#allocation8_spill] sm:$0xff]  ;;  %v8179_v1 = vld [vmem:[#allocation7_spill] sm:$0xff] }
 0x78b   : > { %4999 = vmatprep.subr.bf16.mxu1 %v1785_v48  ;;  %2337 = vmax.xlane.f32.xlu0 %v6978_v50  ;;  %v1764_v43 = vpack.c.bf16 %v1751_v8, %v1750_v33  ;;  %v8178_v33 = vld [vmem:[#allocation28_spill] sm:$0xff] }
 0x78c   : > { %5000 = vmatpush3.bf16.msra.mxu1 %v1785_v48 }
 0x78d   : > { %v5560_v15 = vpop.eup %5559 }
 0x78e   : > { %v5562_v57 = vpop.eup %5561  ;;  %v1755_v24 = vmul.f32 %v5560_v15, %v6873_v2  ;;  %v2765_v62 = vpop.permute.xlu1 %2764 }
 0x78f   : > { %5002 = vmatmul.mubr.bf16.vlgmr.msra.gmra.mrb[16].mxu1 %v1763_v46  ;;  %2341 = vmax.xlane.f32.xlu0 %v6986_v29  ;;  %v5564_v51 = vpop.eup %5563  ;;  %v1752_v35 = vmul.f32 %v5562_v57, %v6849_v32  ;;  %v7000_v46 = vadd.f32 %v8178_v33, %v8177_v19  ;;  %v8180_v32 = vld [vmem:[#allocation27_spill] sm:$0xff] }
 0x790   : > { %5005 = vmatprep.mubr.bf16.mxu1 %v1764_v43  ;;  %v1754_v21 = vmul.f32 %v5564_v51, %v6867_v31  ;;  %v5566_v8 = vpop.eup %5565  ;;  %v7006_v43 = vadd.f32 %v8180_v32, %v8179_v1 }
 0x791   : > { %v1765_v48 = vpack.c.bf16 %v1753_v25, %v1752_v35  ;;  %v5568_v42 = vpop.eup %5567  ;;  %v1757_v2 = vmul.f32 %v5566_v8, %v6869_v28 }
 0x792   : > { %v1766_v49 = vpack.c.bf16 %v1755_v24, %v1754_v21  ;;  %v1756_v31 = vmul.f32 %v5568_v42, %v6863_v60  ;;  %v5570_v51 = vpop.eup %5569  ;;  %v2767_v32 = vpop.permute.xlu1 %2766 }
 0x793   : > { %2345 = vmax.xlane.f32.xlu0 %v6992_v27  ;;  %v1758_v35 = vmul.f32 %v5570_v51, %v6879_v54 }
 0x794   : > { %v1767_v15 = vpack.c.bf16 %v1757_v2, %v1756_v31  ;;  %v2806_v2 = vsel %vm1014_vm2, %v2765_v62, 0 }
 0x797   : > { %5006 = vmatmul.mubr.bf16.gmra.mrb[20].mxu1 %v1765_v48  ;;  %2349 = vmax.xlane.f32.xlu0 %v7000_v46 }
 0x798   : > { %5009 = vmatprep.mubr.bf16.mxu1 %v1766_v49 }
 0x79b   : > { %2353 = vmax.xlane.f32.xlu0 %v7006_v43 }
 0x79f   : > { %5010 = vmatmul.mubr.bf16.gmra.mrb[24].mxu1 %v1767_v15  ;;  %v2769_v15 = vpop.permute.xlu1 %2768 }
 0x7b1   : > { %2477 = vrot.lane.b32.xlu0 %v6273_v0, %s5869_s12 }
 0x7b5   : > { %2481 = vrot.lane.b32.xlu0 %v6283_v59, %s5869_s12 }
 0x7b7   : > { %v1725_v57 = vpop.xlane.xlu0 %1724 }
 0x7b8   : > { %5571 = vrcp.f32 %v1725_v57  ;;  %v2773_v57 = vpop.permute.xlu1 %2772 }
 0x7b9   : > { %5573 = vrcp.f32 %v6965_v14  ;;  %2483 = vrot.lane.b32.xlu0 %v6281_v58, %s5869_s12  ;;  %v2818_v51 = vsel %vm1014_vm2, %v2773_v57, 0 }
 0x7bb   : > { %v1729_v28 = vpop.xlane.xlu0 %1728 }
 0x7bc   : > { %5575 = vrcp.f32 %v1729_v28  ;;  %v979_v28 = vld [vmem:[%s5983_s22 + $0x4] sm:$0xf] }
 0x7bd   : > { %5333 = vmatprep.subr.msk.bf16.mxu1 %vm1923_vm5, %v979_v28 }
 0x7bf   : > { %v2763_v60 = vpop.permute.xlu0 %2762 }
 0x7c0   : > { %5344 = vmatprep.subr.msk.bf16.mxu0 %vm1014_vm2, %v2763_v60  ;;  %v2803_v25 = vsel %vm1014_vm2, %v2763_v60, 0  ;;  %v1925_v60 = vsel %vm1923_vm5, %v979_v28, 0 }
 0x7c1   : > { %5136 = vmatpush3.bf16.xpose.msra.mxu0 %v2803_v25  ;;  %5018 = vmatpush3.bf16.msra.mxu1 %v1925_v60  ;;  %v7038_v25 = vld [vmem:[%s5983_s22] sm:$0xf] }
 0x7c2   : > { %v5572_v11 = vpop.eup %5571  ;;  %5345 = vmatprep.subr.msk.bf16.mxu0 %vm1014_vm2, %v2765_v62  ;;  %5334 = vmatprep.subr.msk.bf16.mxu1 %vm1923_vm5, %v7038_v25  ;;  %v2777_v62 = vpop.permute.xlu1 %2776 }
 0x7c3   : > { %v2771_v24 = vpop.permute.xlu0 %2770  ;;  %v1759_v14 = vmul.f32 %v5572_v11, %v6895_v38  ;;  %v5574_v21 = vpop.eup %5573  ;;  %v2809_v38 = vsel %vm1014_vm2, %v2767_v32, 0 }
 0x7c4   : > { %v1760_v49 = vmul.f32 %v5574_v21, %v6875_v6  ;;  %v2812_v6 = vsel %vm1014_vm2, %v2769_v15, 0 }
 0x7c5   : > { %v1768_v48 = vpack.c.bf16 %v1759_v14, %v1758_v35  ;;  %v2824_v14 = vsel %vm1014_vm2, %v2777_v62, 0 }
 0x7c6   : > { %v5576_v8 = vpop.eup %5575 }
 0x7c7   : > { %5013 = vmatprep.mubr.bf16.mxu1 %v1768_v48  ;;  %v2775_v33 = vpop.permute.xlu0 %2774  ;;  %v1761_v42 = vmul.f32 %v5576_v8, %v6899_v13  ;;  %v2815_v13 = vsel %vm1014_vm2, %v2771_v24, 0 }
 0x7c8   : > { %v2821_v11 = vsel %vm1014_vm2, %v2775_v33, 0 }
 0x7c9   : > { %5138 = vmatpush3.bf16.xpose.msra.mxu0 %v2806_v2  ;;  %v1769_v31 = vpack.c.bf16 %v1761_v42, %v1760_v49 }
 0x7ca   : > { %5346 = vmatprep.subr.msk.bf16.mxu0 %vm1014_vm2, %v2767_v32 }
 0x7cb   : > { %5014 = vmatmul.mubr.bf16.gmra.mrb[28].mxu1 %v1769_v31  ;;  %v2747_v54 = vpop.permute.xlu0 %2746 }
 0x7cc   : > { %5151 = vmatprep.mubr.msk.bf16.mxu0 %vm1014_vm2, %v2747_v54 }
 0x7cf   : > { %v2751_v35 = vpop.permute.xlu0 %2750 }
 0x7d1   : > { %5140 = vmatpush3.bf16.xpose.msra.mxu0 %v2809_v38 }
 0x7d2   : > { %5347 = vmatprep.subr.msk.bf16.mxu0 %vm1014_vm2, %v2769_v15 }
 0x7d3   : > { %v2755_v48 = vpop.permute.xlu0 %2754 }
 0x7d7   : > { %v2759_v49 = vpop.permute.xlu0 %2758 }
 0x7d9   : > { %5142 = vmatpush3.bf16.xpose.msra.mxu0 %v2812_v6 }
 0x7da   : > { %5348 = vmatprep.subr.msk.bf16.mxu0 %vm1014_vm2, %v2771_v24  ;;  %v2749_v24 = vpop.permute.xlu1 %2748 }
 0x7de   : > { %v2753_v21 = vpop.permute.xlu1 %2752 }
 0x7e1   : > { %5144 = vmatpush3.bf16.xpose.msra.mxu0 %v2815_v13 }
 0x7e2   : > { %5349 = vmatprep.subr.msk.bf16.mxu0 %vm1014_vm2, %v2773_v57  ;;  %v2757_v8 = vpop.permute.xlu1 %2756 }
 0x7e6   : > { %v2761_v42 = vpop.permute.xlu1 %2760 }
 0x7e9   : > { %5146 = vmatpush3.bf16.xpose.msra.mxu0 %v2818_v51 }
 0x7ea   : > { %5350 = vmatprep.subr.msk.bf16.mxu0 %vm1014_vm2, %v2775_v33  ;;  %v2328_v2 = vpop.xlane.xlu1 %2327 }
 0x7eb   : > { %v2358_v28 = vsub.f32 %v6908_v40, %v2328_v2 }
 0x7ee   : > { %v2336_v15 = vpop.xlane.xlu1 %2335 }
 0x7f1   : > { %5148 = vmatpush3.bf16.xpose.msra.mxu0 %v2821_v11 }
 0x7f2   : > { %5351 = vmatprep.subr.msk.bf16.mxu0 %vm1014_vm2, %v2777_v62  ;;  %v2340_v62 = vpop.xlane.xlu1 %2339 }
 0x7f9   : > { %5150 = vmatpush3.bf16.xpose.msra.mxu0 %v2824_v14 }
 0x800   : > { %5152 = vmatmul.mubr.msk.bf16.vlgmr.msra.gmra.mrb[64].mxu0 %vm1014_vm2, %v2749_v24 }
 0x801   : > { %5155 = vmatprep.mubr.msk.bf16.mxu0 %vm1014_vm2, %v2751_v35 }
 0x808   : > { %5156 = vmatmul.mubr.msk.bf16.gmra.mrb[68].mxu0 %vm1014_vm2, %v2753_v21  ;;  %v2326_v33 = vpop.xlane.xlu0 %2325 }
 0x809   : > { %5159 = vmatprep.mubr.msk.bf16.mxu0 %vm1014_vm2, %v2755_v48  ;;  %v2357_v31 = vsub.f32 %v6947_v7, %v2326_v33  ;;  %v2375_v7 = vmul.f32 1.442695, %v2358_v28 }
 0x80b   : > { %v2373_v6 = vmul.f32 1.442695, %v2357_v31 }
 0x80c   : > { %v2330_v32 = vpop.xlane.xlu0 %2329 }
 0x80d   : > { %v2359_v54 = vsub.f32 %v6954_v52, %v2330_v32  ;;  %v2362_v52 = vsub.f32 %v6914_v37, %v2336_v15 }
 0x80f   : > { %v2377_v38 = vmul.f32 1.442695, %v2359_v54  ;;  %v2383_v40 = vmul.f32 1.442695, %v2362_v52 }
 0x810   : > { %5160 = vmatmul.mubr.msk.bf16.gmra.mrb[72].mxu0 %vm1014_vm2, %v2757_v8  ;;  %v2332_v13 = vpop.xlane.xlu0 %2331  ;;  %v2364_v8 = vsub.f32 %v6920_v4, %v2340_v62 }
 0x811   : > { %5577 = vpow2.f32 %v2377_v38  ;;  %5163 = vmatprep.mubr.msk.bf16.mxu0 %vm1014_vm2, %v2759_v49  ;;  %v2360_v57 = vsub.f32 %v6963_v18, %v2332_v13  ;;  %v2344_v18 = vpop.xlane.xlu1 %2343 }
 0x812   : > { %5579 = vpow2.f32 %v2373_v6  ;;  %v2387_v33 = vmul.f32 1.442695, %v2364_v8  ;;  %v2366_v6 = vsub.f32 %v6926_v61, %v2344_v18 }
 0x813   : > { %v2379_v60 = vmul.f32 1.442695, %v2360_v57 }
 0x814   : > { %v2334_v51 = vpop.xlane.xlu0 %2333  ;;  %v2391_v62 = vmul.f32 1.442695, %v2366_v6 }
 0x815   : > { %5581 = vpow2.f32 %v2379_v60  ;;  %v2361_v24 = vsub.f32 %v6972_v9, %v2334_v51  ;;  %v2348_v2 = vpop.xlane.xlu1 %2347 }
 0x816   : > { %5583 = vpow2.f32 %v2375_v7  ;;  %v2368_v4 = vsub.f32 %v6932_v22, %v2348_v2 }
 0x817   : > { %v2381_v49 = vmul.f32 1.442695, %v2361_v24 }
 0x818   : > { %5164 = vmatmul.mubr.msk.bf16.gmra.mrb[76].mxu0 %vm1014_vm2, %v2761_v42  ;;  %v2338_v11 = vpop.xlane.xlu0 %2337  ;;  %v2395_v13 = vmul.f32 1.442695, %v2368_v4  ;;  %v2049_v4 = vsel %vm1923_vm5, %v7038_v25, 0 }
 0x819   : > { %v2363_v35 = vsub.f32 %v6978_v50, %v2338_v11  ;;  %v2352_v18 = vpop.xlane.xlu1 %2351 }
 0x81b   : > { %v7060_v14 = vpop.eup %5577  ;;  %v2385_v21 = vmul.f32 1.442695, %v2363_v35 }
 0x81c   : > { %2409 = vadd.xlane.f32.xlu1 %v7060_v14  ;;  %v2342_v48 = vpop.xlane.xlu0 %2341  ;;  %v7065_v42 = vpop.eup %5579 }
 0x81d   : > { %5585 = vpow2.f32 %v2385_v21  ;;  %v2365_v37 = vsub.f32 %v6986_v29, %v2342_v48  ;;  %v2370_v21 = vsub.f32 %v6937_v55, %v2352_v18 }
 0x81e   : > { %5587 = vpow2.f32 %v2383_v40  ;;  %v2356_v40 = vpop.xlane.xlu1 %2355 }
 0x81f   : > { %v2389_v9 = vmul.f32 1.442695, %v2365_v37  ;;  %5589 = vpow2.f32 %v2381_v49  ;;  %v7069_v31 = vpop.eup %5581  ;;  %v2399_v8 = vmul.f32 1.442695, %v2370_v21  ;;  %v2372_v49 = vsub.f32 %v6942_v41, %v2356_v40 }
 0x820   : > { %2405 = vadd.xlane.f32.xlu1 %v7065_v42  ;;  %v2346_v50 = vpop.xlane.xlu0 %2345  ;;  %v7073_v38 = vpop.eup %5583 }
 0x821   : > { %v2367_v32 = vsub.f32 %v6992_v27, %v2346_v50  ;;  %5591 = vpow2.f32 %v2389_v9 }
 0x822   : > { %5593 = vpow2.f32 %v2387_v33  ;;  %v2480_v40 = vpop.permute.xlu1 %2479 }
 0x823   : > { %v2393_v54 = vmul.f32 1.442695, %v2367_v32  ;;  %v2403_v32 = vmul.f32 1.442695, %v2372_v49 }
 0x824   : > { %2411 = vadd.xlane.f32.xlu1 %v7069_v31  ;;  %v2350_v29 = vpop.xlane.xlu0 %2349 }
 0x825   : > { %5595 = vpow2.f32 %v2393_v54  ;;  %v2369_v57 = vsub.f32 %v7000_v46, %v2350_v29 }
 0x826   : > { %5597 = vpow2.f32 %v2395_v13 }
 0x827   : > { %v7075_v15 = vpop.eup %5585  ;;  %v2397_v61 = vmul.f32 1.442695, %v2369_v57 }
 0x828   : > { %2407 = vadd.xlane.f32.xlu1 %v7073_v38  ;;  %2417 = vadd.xlane.f32.xlu0 %v7075_v15  ;;  %v2354_v27 = vpop.xlane.xlu0 %2353  ;;  %v7082_v28 = vpop.eup %5587 }
 0x829   : > { %v2371_v22 = vsub.f32 %v7006_v43, %v2354_v27  ;;  %v7084_v60 = vpop.eup %5589 }
 0x82b   : > { %v2401_v51 = vmul.f32 1.442695, %v2371_v22  ;;  %v7088_v7 = vpop.eup %5591 }
 0x82c   : > { %2415 = vadd.xlane.f32.xlu1 %v7082_v28  ;;  %2413 = vadd.xlane.f32.xlu0 %v7084_v60  ;;  %v7090_v52 = vpop.eup %5593  ;;  %v2478_v55 = vpop.permute.xlu0 %2477 }
 0x82d   : > { %5599 = vpow2.f32 %v2401_v51 }
 0x82e   : > { %5601 = vpow2.f32 %v2391_v62 }
 0x82f   : > { %5603 = vpow2.f32 %v2397_v61  ;;  %v7094_v46 = vpop.eup %5595 }
 0x830   : > { %2421 = vadd.xlane.f32.xlu1 %v7088_v7  ;;  %2419 = vadd.xlane.f32.xlu0 %v7090_v52  ;;  %v7097_v43 = vpop.eup %5597  ;;  %5605 = vpow2.f32 %v2399_v8  ;;  %v2486_v8 = vpop.permute.xlu1 %2485 }
 0x831   : > { %5607 = vpow2.f32 %v2403_v32  ;;  %v8181_v32 = vld [vmem:[#allocation12_spill] sm:$0xff] }
 0x834   : > { %2425 = vadd.xlane.f32.xlu0 %v7094_v46 }
 0x837   : > { %v7099_v11 = vpop.eup %5599 }
 0x838   : > { %2427 = vadd.xlane.f32.xlu0 %v7097_v43  ;;  %2433 = vadd.xlane.f32.xlu1 %v7099_v11  ;;  %v7103_v24 = vpop.eup %5601 }
 0x839   : > { %v7105_v35 = vpop.eup %5603 }
 0x83a   : > { %v7120_v57 = vpop.eup %5605 }
 0x83b   : > { %v7124_v62 = vpop.eup %5607 }
 0x83c   : > { %2423 = vadd.xlane.f32.xlu0 %v7103_v24  ;;  %2429 = vadd.xlane.f32.xlu1 %v7105_v35 }
 0x84d   : > { %2491 = vrot.lane.b32.xlu1 %v6297_v12, %s5869_s12 }
 0x852   : > { %2489 = vrot.lane.b32.xlu0 %v6299_v39, %s5869_s12 }
 0x862   : > { %v5003_v48 = vpop.f32.mrb[16].mxu1 }
 0x863   : > { %v1828_v37 = vpop.f32.mrb[17].mxu1 }
 0x864   : > { %v5004_v9 = vpop.f32.mrb[18].mxu1 }
 0x865   : > { %v1892_v50 = vpack.c.bf16 %v5004_v9, %v5003_v48  ;;  %v1831_v33 = vpop.f32.mrb[19].mxu1 }
 0x866   : > { %v1891_v2 = vpack.c.bf16 %v1831_v33, %v1828_v37 }
 0x868   : > { %5019 = vmatprep.mubr.msk.bf16.mxu1 %vm1014_vm2, %v1891_v2  ;;  %v2488_v2 = vpop.permute.xlu1 %2487 }
 0x869   : > { %5020 = vmatmul.mubr.msk.bf16.vlgmr.msra.gmra.mrb[32].mxu1 %vm1014_vm2, %v1892_v50 }
 0x86a   : > { %5036 = vmatpush3.bf16.msra.mxu1 %v2049_v4  ;;  %v5007_v29 = vpop.f32.mrb[20].mxu1  ;;  %v8182_v4 = vld [vmem:[#allocation10_spill] sm:$0xff] }
 0x86b   : > { %5085 = vmatprep.subr.bf16.mxu1 %v2478_v55  ;;  %v1844_v41 = vpop.f32.mrb[21].mxu1 }
 0x86c   : > { %v5008_v54 = vpop.f32.mrb[22].mxu1 }
 0x86d   : > { %v1894_v6 = vpack.c.bf16 %v5008_v54, %v5007_v29  ;;  %v1847_v13 = vpop.f32.mrb[23].mxu1  ;;  %v8183_v29 = vpack.c.bf16 %v8181_v32, %v8182_v4  ;;  %v2482_v54 = vpop.permute.xlu0 %2481 }
 0x86e   : > { %v1893_v27 = vpack.c.bf16 %v1847_v13, %v1844_v41  ;;  %v8185_v13 = vld [vmem:[#allocation9_spill] sm:$0xff] }
 0x870   : > { %5023 = vmatprep.mubr.msk.bf16.mxu1 %vm1014_vm2, %v1893_v27 }
 0x871   : > { %5024 = vmatmul.mubr.msk.bf16.gmra.mrb[36].mxu1 %vm1014_vm2, %v1894_v6  ;;  %2431 = vadd.xlane.f32.xlu0 %v7120_v57  ;;  %v8184_v6 = vld [vmem:[#allocation11_spill] sm:$0xff] }
 0x872   : > { %v5011_v25 = vpop.f32.mrb[24].mxu1  ;;  %v8186_v27 = vpack.c.bf16 %v8184_v6, %v8185_v13  ;;  %v8197_v6 = vld [vmem:[#allocation17_spill] sm:$0xff] }
 0x873   : > { %v1860_v22 = vpop.f32.mrb[25].mxu1 }
 0x874   : > { %v5012_v51 = vpop.f32.mrb[26].mxu1 }
 0x875   : > { %v1896_v61 = vpack.c.bf16 %v5012_v51, %v5011_v25  ;;  %v1863_v18 = vpop.f32.mrb[27].mxu1  ;;  %2435 = vadd.xlane.f32.xlu0 %v7124_v62  ;;  %v8188_v51 = vld [vmem:[#allocation14_spill] sm:$0xff] }
 0x876   : > { %v1895_v21 = vpack.c.bf16 %v1863_v18, %v1860_v22  ;;  %v8187_v22 = vld [vmem:[#allocation16_spill] sm:$0xff] }
 0x878   : > { %5027 = vmatprep.mubr.msk.bf16.mxu1 %vm1014_vm2, %v1895_v21  ;;  %v2484_v21 = vpop.permute.xlu0 %2483 }
 0x879   : > { %5028 = vmatmul.mubr.msk.bf16.gmra.mrb[40].mxu1 %vm1014_vm2, %v1896_v61  ;;  %v8189_v61 = vpack.c.bf16 %v8187_v22, %v8188_v51  ;;  %v8200_v22 = vld [vmem:[#allocation22_spill] sm:$0xff] }
 0x89e   : > { %v5015_v48 = vpop.f32.mrb[28].mxu1 }
 0x89f   : > { %v1876_v49 = vpop.f32.mrb[29].mxu1 }
 0x8a0   : > { %v5016_v37 = vpop.f32.mrb[30].mxu1 }
 0x8a1   : > { %v1898_v9 = vpack.c.bf16 %v5016_v37, %v5015_v48  ;;  %v1879_v50 = vpop.f32.mrb[31].mxu1  ;;  %v8190_v48 = vld [vmem:[#allocation15_spill] sm:$0xff] }
 0x8a2   : > { %v1897_v33 = vpack.c.bf16 %v1879_v50, %v1876_v49  ;;  %v8191_v49 = vld [vmem:[#allocation13_spill] sm:$0xff]  ;;  %v8193_v50 = vld [vmem:[#allocation20_spill] sm:$0xff] }
 0x8a3   : > { %v8192_v37 = vpack.c.bf16 %v8190_v48, %v8191_v49 }
 0x8a4   : > { %5031 = vmatprep.mubr.msk.bf16.mxu1 %vm1014_vm2, %v1897_v33  ;;  %v8194_v33 = vld [vmem:[#allocation18_spill] sm:$0xff] }
 0x8a5   : > { %5032 = vmatmul.mubr.msk.bf16.gmra.mrb[44].mxu1 %vm1014_vm2, %v1898_v9  ;;  %v8195_v32 = vpack.c.bf16 %v8193_v50, %v8194_v33  ;;  %v8203_v50 = vld [vmem:[#allocation21_spill] sm:$0xff] }
 0x8a6   : > { %5037 = vmatprep.mubr.msk.bf16.mxu1 %vm1014_vm2, %v8183_v29  ;;  %v8196_v29 = vld [vmem:[#allocation19_spill] sm:$0xff] }
 0x8a7   : > { %v8198_v13 = vpack.c.bf16 %v8196_v29, %v8197_v6 }
 0x8a9   : > { %v2410_v41 = vpop.xlane.xlu1 %2409 }
 0x8ad   : > { %5038 = vmatmul.mubr.msk.bf16.vlgmr.msra.gmra.mrb[32].mxu1 %vm1014_vm2, %v8186_v27  ;;  %v2406_v25 = vpop.xlane.xlu1 %2405 }
 0x8ae   : > { %5086 = vmatpush3.bf16.msra.mxu1 %v2478_v55  ;;  %5041 = vmatprep.mubr.msk.bf16.mxu1 %vm1014_vm2, %v8189_v61  ;;  %5609 = vrcp.f32 %v2406_v25 }
 0x8af   : > { %5087 = vmatprep.subr.bf16.mxu1 %v2480_v40 }
 0x8b1   : > { %v2412_v18 = vpop.xlane.xlu1 %2411 }
 0x8b2   : > { %5088 = vmatpush3.bf16.msra.mxu1 %v2480_v40 }
 0x8b3   : > { %5089 = vmatprep.subr.bf16.mxu1 %v2482_v54 }
 0x8b5   : > { %5042 = vmatmul.mubr.msk.bf16.gmra.mrb[36].mxu1 %vm1014_vm2, %v8192_v37  ;;  %v2408_v9 = vpop.xlane.xlu1 %2407  ;;  %v2418_v55 = vpop.xlane.xlu0 %2417 }
 0x8b6   : > { %5611 = vrcp.f32 %v2408_v9  ;;  %5090 = vmatpush3.bf16.msra.mxu1 %v2482_v54  ;;  %5045 = vmatprep.mubr.msk.bf16.mxu1 %vm1014_vm2, %v8195_v32  ;;  %v8199_v54 = vld [vmem:[#allocation24_spill] sm:$0xff] }
 0x8b7   : > { %5091 = vmatprep.subr.bf16.mxu1 %v2484_v21  ;;  %v8201_v51 = vpack.c.bf16 %v8199_v54, %v8200_v22  ;;  %5613 = vrcp.f32 %v2412_v18 }
 0x8b8   : > { %v5610_v27 = vpop.eup %5609 }
 0x8b9   : > { %v2414_v4 = vpop.xlane.xlu0 %2413  ;;  %v2416_v40 = vpop.xlane.xlu1 %2415 }
 0x8ba   : > { %5092 = vmatpush3.bf16.msra.mxu1 %v2484_v21  ;;  %v2453_v21 = vmul.f32 %v5610_v27, %v7065_v42  ;;  %5615 = vrcp.f32 %v2416_v40 }
 0x8bb   : > { %5093 = vmatprep.subr.bf16.mxu1 %v2486_v8  ;;  %5617 = vrcp.f32 %v2414_v4 }
 0x8bc   : > { %5619 = vrcp.f32 %v2410_v41 }
 0x8bd   : > { %5046 = vmatmul.mubr.msk.bf16.gmra.mrb[40].mxu1 %vm1014_vm2, %v8198_v13  ;;  %v2420_v25 = vpop.xlane.xlu0 %2419  ;;  %v2422_v49 = vpop.xlane.xlu1 %2421 }
 0x8be   : > { %5094 = vmatpush3.bf16.msra.mxu1 %v2486_v8  ;;  %5049 = vmatprep.mubr.msk.bf16.mxu1 %vm1014_vm2, %v8201_v51  ;;  %v8202_v8 = vld [vmem:[#allocation23_spill] sm:$0xff]  ;;  %5621 = vrcp.f32 %v2420_v25 }
 0x8bf   : > { %5095 = vmatprep.subr.bf16.mxu1 %v2488_v2  ;;  %v8204_v33 = vpack.c.bf16 %v8202_v8, %v8203_v50 }
 0x8c0   : > { %v5612_v61 = vpop.eup %5611 }
 0x8c1   : > { %v2454_v48 = vmul.f32 %v5612_v61, %v7073_v38  ;;  %v2426_v37 = vpop.xlane.xlu0 %2425 }
 0x8c2   : > { %5096 = vmatpush3.bf16.msra.mxu1 %v2488_v2  ;;  %v5614_v2 = vpop.eup %5613 }
 0x8c3   : > { %v2469_v9 = vpack.c.bf16 %v2454_v48, %v2453_v21  ;;  %v2456_v41 = vmul.f32 %v5614_v2, %v7069_v31 }
 0x8c4   : > { %v5616_v18 = vpop.eup %5615 }
 0x8c5   : > { %5050 = vmatmul.mubr.msk.bf16.gmra.mrb[44].mxu1 %vm1014_vm2, %v8204_v33  ;;  %v7165_v32 = vpop.xlane.xlu1 %2433  ;;  %v2428_v29 = vpop.xlane.xlu0 %2427  ;;  %v2458_v54 = vmul.f32 %v5616_v18, %v7082_v28 }
 0x8c6   : > { %5101 = vmatprep.mubr.bf16.mxu1 %v2469_v9  ;;  %v5618_v4 = vpop.eup %5617 }
 0x8c7   : > { %v5620_v6 = vpop.eup %5619  ;;  %v2457_v27 = vmul.f32 %v5618_v4, %v7084_v60 }
 0x8c8   : > { %v2455_v25 = vmul.f32 %v5620_v6, %v7060_v14  ;;  %v5622_v48 = vpop.eup %5621 }
 0x8c9   : > { %v7167_v42 = vpop.xlane.xlu1 %2429  ;;  %v2424_v38 = vpop.xlane.xlu0 %2423  ;;  %v2471_v31 = vpack.c.bf16 %v2458_v54, %v2457_v27  ;;  %v2460_v8 = vmul.f32 %v5622_v48, %v7090_v52 }
 0x8ca   : > { %5623 = vrcp.f32 %v2424_v38  ;;  %v2470_v21 = vpack.c.bf16 %v2456_v41, %v2455_v25 }
 0x8cb   : > { %5625 = vrcp.f32 %v2418_v55 }
 0x8cc   : > { %5627 = vrcp.f32 %v2422_v49 }
 0x8cd   : > { %v2490_v40 = vpop.permute.xlu0 %2489  ;;  %v2492_v13 = vpop.permute.xlu1 %2491  ;;  %5629 = vrcp.f32 %v2428_v29 }
 0x8ce   : > { %5097 = vmatprep.subr.bf16.mxu1 %v2490_v40  ;;  %5631 = vrcp.f32 %v2426_v37 }
 0x8cf   : > { %5098 = vmatpush3.bf16.msra.mxu1 %v2490_v40  ;;  %5633 = vrcp.f32 %v7167_v42 }
 0x8d0   : > { %5099 = vmatprep.subr.bf16.mxu1 %v2492_v13 }
 0x8d3   : > { %v5153_v22 = vpop.f32.mrb[64].mxu0  ;;  %5100 = vmatpush3.bf16.msra.mxu1 %v2492_v13 }
 0x8d4   : > { %v2860_v55 = vpop.f32.mrb[65].mxu0  ;;  %v5624_v9 = vpop.eup %5623  ;;  %v7186_v38 = vadd.f32 %v5153_v22, %v6358_v36 }
 0x8d5   : > { %v7174_v51 = vadd.f32 %v2860_v55, %v6372_v16  ;;  %v5154_v61 = vpop.f32.mrb[66].mxu0  ;;  %v5626_v28 = vpop.eup %5625  ;;  %v2462_v16 = vmul.f32 %v5624_v9, %v7103_v24 }
 0x8d6   : > { %v2863_v49 = vpop.f32.mrb[67].mxu0  ;;  %5102 = vmatmul.mubr.bf16.vlgmr.msra.gmra.mrb[48].mxu1 %v2470_v21  ;;  %v5628_v14 = vpop.eup %5627  ;;  %v2459_v37 = vmul.f32 %v5626_v28, %v7075_v15  ;;  %v7194_v15 = vadd.f32 %v5154_v61, %v6386_v17 }
 0x8d7   : > { %2923 = vmax.xlane.f32.xlu0 %v7174_v51  ;;  %5105 = vmatprep.mubr.bf16.mxu1 %v2471_v31  ;;  %v7178_v60 = vadd.f32 %v2863_v49, %v6368_v56  ;;  %v2461_v29 = vmul.f32 %v5628_v14, %v7088_v7  ;;  %v5630_v40 = vpop.eup %5629 }
 0x8d8   : > { %v2472_v18 = vpack.c.bf16 %v2460_v8, %v2459_v37  ;;  %v5632_v24 = vpop.eup %5631  ;;  %v2464_v36 = vmul.f32 %v5630_v40, %v7097_v43 }
 0x8d9   : > { %v2473_v4 = vpack.c.bf16 %v2462_v16, %v2461_v29 }
 0x8db   : > { %v5157_v50 = vpop.f32.mrb[68].mxu0  ;;  %2925 = vmax.xlane.f32.xlu0 %v7178_v60 }
 0x8dc   : > { %v2876_v33 = vpop.f32.mrb[69].mxu0  ;;  %v7204_v17 = vadd.f32 %v5157_v50, %v6401_v10 }
 0x8dd   : > { %v7189_v2 = vadd.f32 %v2876_v33, %v6419_v20  ;;  %v5158_v56 = vpop.f32.mrb[70].mxu0  ;;  %v2463_v20 = vmul.f32 %v5632_v24, %v7094_v46 }
 0x8de   : > { %v2879_v52 = vpop.f32.mrb[71].mxu0  ;;  %5106 = vmatmul.mubr.bf16.gmra.mrb[52].mxu1 %v2472_v18  ;;  %v7211_v22 = vadd.f32 %v5158_v56, %v6393_v5 }
 0x8df   : > { %2927 = vmax.xlane.f32.xlu0 %v7186_v38  ;;  %2931 = vmax.xlane.f32.xlu1 %v7189_v2  ;;  %v7200_v13 = vadd.f32 %v2879_v52, %v6410_v53  ;;  %v2474_v27 = vpack.c.bf16 %v2464_v36, %v2463_v20 }
 0x8e0   : > { %5109 = vmatprep.mubr.bf16.mxu1 %v2473_v4 }
 0x8e3   : > { %v5161_v7 = vpop.f32.mrb[72].mxu0  ;;  %2929 = vmax.xlane.f32.xlu0 %v7194_v15 }
 0x8e4   : > { %v2892_v6 = vpop.f32.mrb[73].mxu0  ;;  %v7224_v5 = vadd.f32 %v5161_v7, %v8175_v34 }
 0x8e5   : > { %v5162_v41 = vpop.f32.mrb[74].mxu0  ;;  %v7216_v10 = vadd.f32 %v2892_v6, %v6452_v63 }
 0x8e6   : > { %v2895_v54 = vpop.f32.mrb[75].mxu0  ;;  %5110 = vmatmul.mubr.bf16.gmra.mrb[56].mxu1 %v2474_v27 }
 0x8e7   : > { %2933 = vmax.xlane.f32.xlu0 %v7200_v13  ;;  %v7220_v61 = vadd.f32 %v2895_v54, %v6445_v30  ;;  %v980_v30 = vld [vmem:[%s5983_s22 + $0x8] sm:$0xf] }
 0x8e8   : > { %5343 = vmatprep.subr.msk.bf16.mxu1 %vm1923_vm5, %v980_v30  ;;  %v2631_v63 = vsel %vm1923_vm5, %v980_v30, 0 }
 0x8e9   : > { %5118 = vmatpush3.bf16.msra.mxu1 %v2631_v63 }
 0x8eb   : > { %v5165_v25 = vpop.f32.mrb[76].mxu0  ;;  %2935 = vmax.xlane.f32.xlu0 %v7204_v17 }
 0x8ec   : > { %v7208_v43 = vadd.f32 %v5165_v25, %v8179_v1  ;;  %v2908_v46 = vpop.f32.mrb[77].mxu0  ;;  %v7228_v1 = vadd.f32 %v5162_v41, %v6428_v23 }
 0x8ed   : > { %v5166_v53 = vpop.f32.mrb[78].mxu0  ;;  %v7238_v34 = vadd.f32 %v2908_v46, %v8177_v19  ;;  %v5634_v19 = vpop.eup %5633 }
 0x8ee   : > { %v2911_v55 = vpop.f32.mrb[79].mxu0  ;;  %2951 = vmax.xlane.f32.xlu1 %v7208_v43  ;;  %v7251_v42 = vadd.f32 %v5166_v53, %v6488_v3 }
 0x8ef   : > { %2937 = vmax.xlane.f32.xlu0 %v7211_v22 }
 0x8f3   : > { %2939 = vmax.xlane.f32.xlu0 %v7216_v10 }
 0x8f7   : > { %2941 = vmax.xlane.f32.xlu0 %v7220_v61 }
 0x8fb   : > { %2943 = vmax.xlane.f32.xlu0 %v7224_v5 }
 0x8fe   : > { %v2432_v21 = vpop.xlane.xlu0 %2431 }
 0x8ff   : > { %2945 = vmax.xlane.f32.xlu0 %v7228_v1  ;;  %3075 = vrot.lane.b32.xlu1 %v6273_v0, %s5870_s0  ;;  %5635 = vrcp.f32 %v2432_v21  ;;  %v7245_v0 = vadd.f32 %v2911_v55, %v6495_v45 }
 0x900   : > { %5637 = vrcp.f32 %v7165_v32 }
 0x902   : > { %v2436_v23 = vpop.xlane.xlu0 %2435 }
 0x903   : > { %2947 = vmax.xlane.f32.xlu0 %v7238_v34  ;;  %3077 = vrot.lane.b32.xlu1 %v6271_v47, %s5870_s0  ;;  %5639 = vrcp.f32 %v2436_v23  ;;  %v2465_v47 = vmul.f32 %v5634_v19, %v7105_v35 }
 0x907   : > { %2949 = vmax.xlane.f32.xlu0 %v7245_v0  ;;  %3081 = vrot.lane.b32.xlu1 %v6281_v58, %s5870_s0 }
 0x909   : > { %v5636_v32 = vpop.eup %5635 }
 0x90a   : > { %v2466_v45 = vmul.f32 %v5636_v32, %v7120_v57  ;;  %v5638_v48 = vpop.eup %5637 }
 0x90b   : > { %2953 = vmax.xlane.f32.xlu0 %v7251_v42  ;;  %3087 = vrot.lane.b32.xlu1 %v6299_v39, %s5870_s0  ;;  %v2467_v58 = vmul.f32 %v5638_v48, %v7099_v11 }
 0x90c   : > { %v2475_v49 = vpack.c.bf16 %v2466_v45, %v2465_v47 }
 0x90d   : > { %v5640_v31 = vpop.eup %5639 }
 0x90e   : > { %5113 = vmatprep.mubr.bf16.mxu1 %v2475_v49  ;;  %v2468_v9 = vmul.f32 %v5640_v31, %v7124_v62 }
 0x910   : > { %v2476_v3 = vpack.c.bf16 %v2468_v9, %v2467_v58 }
 0x912   : > { %5114 = vmatmul.mubr.bf16.gmra.mrb[60].mxu1 %v2476_v3 }
 0x921   : > { %3079 = vrot.lane.b32.xlu0 %v6283_v59, %s5870_s0 }
 0x925   : > { %3083 = vrot.lane.b32.xlu0 %v6291_v44, %s5870_s0 }
 0x929   : > { %3085 = vrot.lane.b32.xlu0 %v6289_v26, %s5870_s0 }
 0x964   : > { %v2924_v39 = vpop.xlane.xlu0 %2923 }
 0x965   : > { %v2955_v28 = vsub.f32 %v7174_v51, %v2924_v39 }
 0x967   : > { %v2971_v8 = vmul.f32 1.442695, %v2955_v28 }
 0x968   : > { %v2926_v35 = vpop.xlane.xlu0 %2925 }
 0x969   : > { %v2956_v59 = vsub.f32 %v7178_v60, %v2926_v35 }
 0x96b   : > { %v2973_v26 = vmul.f32 1.442695, %v2956_v59 }
 0x96c   : > { %v2928_v57 = vpop.xlane.xlu0 %2927  ;;  %v2932_v44 = vpop.xlane.xlu1 %2931 }
 0x96d   : > { %v2957_v11 = vsub.f32 %v7186_v38, %v2928_v57  ;;  %v2959_v33 = vsub.f32 %v7189_v2, %v2932_v44 }
 0x96f   : > { %v2975_v14 = vmul.f32 1.442695, %v2957_v11  ;;  %v2979_v52 = vmul.f32 1.442695, %v2959_v33 }
 0x970   : > { %v2930_v62 = vpop.xlane.xlu0 %2929 }
 0x971   : > { %5641 = vpow2.f32 %v2975_v14  ;;  %v2958_v16 = vsub.f32 %v7194_v15, %v2930_v62 }
 0x972   : > { %5643 = vpow2.f32 %v2971_v8 }
 0x973   : > { %v2977_v37 = vmul.f32 1.442695, %v2958_v16 }
 0x974   : > { %v2934_v50 = vpop.xlane.xlu0 %2933 }
 0x975   : > { %5645 = vpow2.f32 %v2977_v37  ;;  %v2960_v51 = vsub.f32 %v7200_v13, %v2934_v50 }
 0x976   : > { %5647 = vpow2.f32 %v2973_v26 }
 0x977   : > { %v2981_v4 = vmul.f32 1.442695, %v2960_v51 }
 0x978   : > { %v2936_v29 = vpop.xlane.xlu0 %2935 }
 0x979   : > { %v2961_v38 = vsub.f32 %v7204_v17, %v2936_v29 }
 0x97b   : > { %v7273_v56 = vpop.eup %5641  ;;  %v2983_v18 = vmul.f32 1.442695, %v2961_v38  ;;  %v2952_v40 = vpop.xlane.xlu1 %2951 }
 0x97c   : > { %3007 = vadd.xlane.f32.xlu0 %v7273_v56  ;;  %v2938_v60 = vpop.xlane.xlu0 %2937  ;;  %v7277_v2 = vpop.eup %5643  ;;  %v2969_v6 = vsub.f32 %v7208_v43, %v2952_v40 }
 0x97d   : > { %5649 = vpow2.f32 %v2983_v18  ;;  %v2962_v24 = vsub.f32 %v7211_v22, %v2938_v60 }
 0x97e   : > { %5651 = vpow2.f32 %v2979_v52  ;;  %v2999_v25 = vmul.f32 1.442695, %v2969_v6 }
 0x97f   : > { %v7279_v15 = vpop.permute.xlu1 %3075  ;;  %5653 = vpow2.f32 %v2981_v4  ;;  %v2985_v7 = vmul.f32 1.442695, %v2962_v24  ;;  %v7283_v20 = vpop.eup %5645 }
 0x980   : > { %5167 = vmatprep.subr.bf16.mxu1 %v7279_v15  ;;  %3003 = vadd.xlane.f32.xlu0 %v7277_v2  ;;  %v2940_v36 = vpop.xlane.xlu0 %2939  ;;  %v7288_v27 = vpop.eup %5647 }
 0x981   : > { %5655 = vpow2.f32 %v2985_v7  ;;  %v2963_v22 = vsub.f32 %v7216_v10, %v2940_v36 }
 0x983   : > { %v2987_v30 = vmul.f32 1.442695, %v2963_v22  ;;  %v3078_v16 = vpop.permute.xlu1 %3077 }
 0x984   : > { %3009 = vadd.xlane.f32.xlu0 %v7283_v20  ;;  %v2942_v13 = vpop.xlane.xlu0 %2941 }
 0x985   : > { %v2964_v41 = vsub.f32 %v7220_v61, %v2942_v13 }
 0x987   : > { %v7290_v54 = vpop.eup %5649  ;;  %v2989_v17 = vmul.f32 1.442695, %v2964_v41  ;;  %v3082_v51 = vpop.permute.xlu1 %3081 }
 0x988   : > { %3005 = vadd.xlane.f32.xlu0 %v7288_v27  ;;  %3015 = vadd.xlane.f32.xlu1 %v7290_v54  ;;  %v2944_v46 = vpop.xlane.xlu0 %2943  ;;  %v7296_v53 = vpop.eup %5651 }
 0x989   : > { %5657 = vpow2.f32 %v2989_v17  ;;  %v2965_v43 = vsub.f32 %v7224_v5, %v2944_v46  ;;  %v7298_v55 = vpop.eup %5653 }
 0x98a   : > { %5659 = vpow2.f32 %v2999_v25 }
 0x98b   : > { %v2991_v61 = vmul.f32 1.442695, %v2965_v43  ;;  %v7303_v23 = vpop.eup %5655  ;;  %v3088_v36 = vpop.permute.xlu1 %3087 }
 0x98c   : > { %3013 = vadd.xlane.f32.xlu0 %v7298_v55  ;;  %3011 = vadd.xlane.f32.xlu1 %v7296_v53  ;;  %v2946_v21 = vpop.xlane.xlu0 %2945 }
 0x98d   : > { %5661 = vpow2.f32 %v2991_v61  ;;  %v2966_v63 = vsub.f32 %v7228_v1, %v2946_v21 }
 0x98e   : > { %5663 = vpow2.f32 %v2987_v30 }
 0x98f   : > { %v2993_v5 = vmul.f32 1.442695, %v2966_v63 }
 0x990   : > { %3017 = vadd.xlane.f32.xlu1 %v7303_v23  ;;  %v2948_v10 = vpop.xlane.xlu0 %2947 }
 0x991   : > { %v2967_v19 = vsub.f32 %v7238_v34, %v2948_v10  ;;  %5665 = vpow2.f32 %v2993_v5 }
 0x993   : > { %v7307_v32 = vpop.eup %5657  ;;  %v2995_v47 = vmul.f32 1.442695, %v2967_v19 }
 0x994   : > { %3021 = vadd.xlane.f32.xlu0 %v7307_v32  ;;  %v2950_v45 = vpop.xlane.xlu0 %2949  ;;  %v7311_v49 = vpop.eup %5659 }
 0x995   : > { %v2968_v48 = vsub.f32 %v7245_v0, %v2950_v45  ;;  %5667 = vpow2.f32 %v2995_v47 }
 0x997   : > { %v7313_v1 = vpop.eup %5661  ;;  %v2997_v31 = vmul.f32 1.442695, %v2968_v48 }
 0x998   : > { %3031 = vadd.xlane.f32.xlu0 %v7311_v49  ;;  %3023 = vadd.xlane.f32.xlu1 %v7313_v1  ;;  %v2954_v34 = vpop.xlane.xlu0 %2953  ;;  %v7318_v9 = vpop.eup %5663 }
 0x999   : > { %5669 = vpow2.f32 %v2997_v31  ;;  %v2970_v58 = vsub.f32 %v7251_v42, %v2954_v34 }
 0x99b   : > { %v3001_v3 = vmul.f32 1.442695, %v2970_v58  ;;  %v7321_v0 = vpop.eup %5665 }
 0x99c   : > { %3019 = vadd.xlane.f32.xlu1 %v7318_v9  ;;  %v3080_v33 = vpop.permute.xlu0 %3079 }
 0x99d   : > { %5671 = vpow2.f32 %v3001_v3 }
 0x99f   : > { %v7324_v39 = vpop.eup %5667 }
 0x9a0   : > { %3025 = vadd.xlane.f32.xlu1 %v7321_v0  ;;  %v3084_v40 = vpop.permute.xlu0 %3083 }
 0x9a3   : > { %v7326_v35 = vpop.eup %5669 }
 0x9a4   : > { %3027 = vadd.xlane.f32.xlu1 %v7324_v39  ;;  %3029 = vadd.xlane.f32.xlu0 %v7326_v35 }
 0x9a7   : > { %v7330_v57 = vpop.eup %5671 }
 0x9a8   : > { %3033 = vadd.xlane.f32.xlu1 %v7330_v57 }
 0x9a9   : > { %v5103_v42 = vpop.f32.mrb[48].mxu1 }
 0x9aa   : > { %v2535_v28 = vpop.f32.mrb[49].mxu1 }
 0x9ab   : > { %v5104_v11 = vpop.f32.mrb[50].mxu1 }
 0x9ac   : > { %v2599_v14 = vpack.c.bf16 %v5104_v11, %v5103_v42  ;;  %v2538_v62 = vpop.f32.mrb[51].mxu1 }
 0x9ad   : > { %v2598_v8 = vpack.c.bf16 %v2538_v62, %v2535_v28 }
 0x9af   : > { %5119 = vmatprep.mubr.msk.bf16.mxu1 %vm1014_vm2, %v2598_v8 }
 0x9b0   : > { %5120 = vmatmul.mubr.msk.bf16.vlgmr.msra.gmra.mrb[32].mxu1 %vm1014_vm2, %v2599_v14 }
 0x9b1   : > { %5168 = vmatpush3.bf16.msra.mxu1 %v7279_v15  ;;  %v5107_v59 = vpop.f32.mrb[52].mxu1  ;;  %v3086_v15 = vpop.permute.xlu0 %3085 }
 0x9b2   : > { %5169 = vmatprep.subr.bf16.mxu1 %v3078_v16  ;;  %v2551_v50 = vpop.f32.mrb[53].mxu1 }
 0x9b3   : > { %v5108_v44 = vpop.f32.mrb[54].mxu1 }
 0x9b4   : > { %v2601_v37 = vpack.c.bf16 %v5108_v44, %v5107_v59  ;;  %v2554_v26 = vpop.f32.mrb[55].mxu1 }
 0x9b5   : > { %v2600_v29 = vpack.c.bf16 %v2554_v26, %v2551_v50  ;;  %5170 = vmatpush3.bf16.msra.mxu1 %v3078_v16  ;;  %v981_v50 = vld [vmem:[%s5983_s22 + $0xc] sm:$0xf] }
 0x9b6   : > { %5171 = vmatprep.subr.bf16.mxu1 %v3080_v33  ;;  %v3229_v26 = vsel %vm1923_vm5, %v981_v50, 0 }
 0x9b7   : > { %5123 = vmatprep.mubr.msk.bf16.mxu1 %vm1014_vm2, %v2600_v29 }
 0x9b8   : > { %5124 = vmatmul.mubr.msk.bf16.gmra.mrb[36].mxu1 %vm1014_vm2, %v2601_v37 }
 0x9b9   : > { %5172 = vmatpush3.bf16.msra.mxu1 %v3080_v33  ;;  %v5111_v38 = vpop.f32.mrb[56].mxu1 }
 0x9ba   : > { %3089 = vrot.lane.b32.xlu0 %v6297_v12, %s5870_s0  ;;  %5173 = vmatprep.subr.bf16.mxu1 %v3082_v51  ;;  %v2567_v18 = vpop.f32.mrb[57].mxu1 }
 0x9bb   : > { %v5112_v52 = vpop.f32.mrb[58].mxu1 }
 0x9bc   : > { %v2603_v60 = vpack.c.bf16 %v5112_v52, %v5111_v38  ;;  %v2570_v4 = vpop.f32.mrb[59].mxu1 }
 0x9bd   : > { %v2602_v24 = vpack.c.bf16 %v2570_v4, %v2567_v18  ;;  %5174 = vmatpush3.bf16.msra.mxu1 %v3082_v51 }
 0x9be   : > { %5175 = vmatprep.subr.bf16.mxu1 %v3084_v40 }
 0x9bf   : > { %5127 = vmatprep.mubr.msk.bf16.mxu1 %vm1014_vm2, %v2602_v24 }
 0x9c0   : > { %5128 = vmatmul.mubr.msk.bf16.gmra.mrb[40].mxu1 %vm1014_vm2, %v2603_v60 }
 0x9c1   : > { %5176 = vmatpush3.bf16.msra.mxu1 %v3084_v40 }
 0x9c2   : > { %5177 = vmatprep.subr.bf16.mxu1 %v3086_v15 }
 0x9c5   : > { %5178 = vmatpush3.bf16.msra.mxu1 %v3086_v15 }
 0x9c6   : > { %5179 = vmatprep.subr.bf16.mxu1 %v3088_v36 }
 0x9c9   : > { %5180 = vmatpush3.bf16.msra.mxu1 %v3088_v36 }
 0x9e5   : > { %v5115_v12 = vpop.f32.mrb[60].mxu1 }
 0x9e6   : > { %v2583_v7 = vpop.f32.mrb[61].mxu1 }
 0x9e7   : > { %v5116_v6 = vpop.f32.mrb[62].mxu1 }
 0x9e8   : > { %v2605_v13 = vpack.c.bf16 %v5116_v6, %v5115_v12  ;;  %v2586_v41 = vpop.f32.mrb[63].mxu1 }
 0x9e9   : > { %v2604_v17 = vpack.c.bf16 %v2586_v41, %v2583_v7 }
 0x9eb   : > { %5131 = vmatprep.mubr.msk.bf16.mxu1 %vm1014_vm2, %v2604_v17 }
 0x9ec   : > { %5132 = vmatmul.mubr.msk.bf16.gmra.mrb[44].mxu1 %vm1014_vm2, %v2605_v13 }
 0xa09   : > { %v3008_v25 = vpop.xlane.xlu0 %3007 }
 0xa0d   : > { %v3004_v46 = vpop.xlane.xlu0 %3003 }
 0xa0e   : > { %5673 = vrcp.f32 %v3004_v46 }
 0xa11   : > { %v3010_v22 = vpop.xlane.xlu0 %3009 }
 0xa15   : > { %v3016_v43 = vpop.xlane.xlu1 %3015  ;;  %v3006_v61 = vpop.xlane.xlu0 %3005 }
 0xa16   : > { %5675 = vrcp.f32 %v3006_v61 }
 0xa17   : > { %5677 = vrcp.f32 %v3010_v22 }
 0xa18   : > { %v5674_v30 = vpop.eup %5673 }
 0xa19   : > { %v3012_v21 = vpop.xlane.xlu1 %3011  ;;  %v3051_v5 = vmul.f32 %v5674_v30, %v7277_v2  ;;  %v3014_v47 = vpop.xlane.xlu0 %3013 }
 0xa1a   : > { %5679 = vrcp.f32 %v3012_v21 }
 0xa1b   : > { %5681 = vrcp.f32 %v3014_v47 }
 0xa1c   : > { %5683 = vrcp.f32 %v3008_v25 }
 0xa1d   : > { %v3018_v10 = vpop.xlane.xlu1 %3017 }
 0xa1e   : > { %5685 = vrcp.f32 %v3018_v10 }
 0xa20   : > { %v5676_v63 = vpop.eup %5675 }
 0xa21   : > { %v3052_v19 = vmul.f32 %v5676_v63, %v7288_v27  ;;  %v3022_v31 = vpop.xlane.xlu0 %3021  ;;  %v5678_v42 = vpop.eup %5677 }
 0xa22   : > { %v3054_v14 = vmul.f32 %v5678_v42, %v7283_v20 }
 0xa23   : > { %v3067_v45 = vpack.c.bf16 %v3052_v19, %v3051_v5 }
 0xa24   : > { %v5680_v28 = vpop.eup %5679 }
 0xa25   : > { %v3024_v48 = vpop.xlane.xlu1 %3023  ;;  %5183 = vmatprep.mubr.bf16.mxu1 %v3067_v45  ;;  %v3032_v58 = vpop.xlane.xlu0 %3031  ;;  %v3055_v16 = vmul.f32 %v5680_v28, %v7296_v53  ;;  %v8205_v28 = vld [vmem:[#allocation5_spill] sm:$0xff] }
 0xa26   : > { %v5682_v27 = vpop.eup %5681 }
 0xa27   : > { %v5684_v11 = vpop.eup %5683  ;;  %v3056_v59 = vmul.f32 %v5682_v27, %v7298_v55  ;;  %v7373_v27 = vld [vmem:[%s5964_s24] sm:$0x3f] }
 0xa28   : > { %v3053_v44 = vmul.f32 %v5684_v11, %v7273_v56  ;;  %v5686_v20 = vpop.eup %5685 }
 0xa29   : > { %v3020_v34 = vpop.xlane.xlu1 %3019  ;;  %v3069_v33 = vpack.c.bf16 %v3056_v59, %v3055_v16  ;;  %v3058_v51 = vmul.f32 %v5686_v20, %v7303_v23  ;;  %v5771_v59 = vld [vmem:[%s5999_s10] sm:$0xff] }
 0xa2a   : > { %5687 = vrcp.f32 %v3020_v34  ;;  %v3068_v37 = vpack.c.bf16 %v3054_v14, %v3053_v44 }
 0xa2b   : > { %5689 = vrcp.f32 %v3016_v43 }
 0xa2c   : > { %5691 = vrcp.f32 %v3022_v31 }
 0xa2d   : > { %v3026_v3 = vpop.xlane.xlu1 %3025 }
 0xa2e   : > { %5693 = vrcp.f32 %v3026_v3 }
 0xa31   : > { %v3030_v2 = vpop.xlane.xlu0 %3029  ;;  %v3028_v62 = vpop.xlane.xlu1 %3027 }
 0xa32   : > { %5695 = vrcp.f32 %v3028_v62  ;;  %v5770_v62 = vld [vmem:[%s5999_s10 + $0x10] sm:$0xff] }
 0xa33   : > { %5697 = vrcp.f32 %v3030_v2  ;;  %v3362_v2 = vsub.s32 4, %v8205_v28 }
 0xa34   : > { %5699 = vrcp.f32 %v3024_v48  ;;  %v5688_v29 = vpop.eup %5687 }
 0xa35   : > { %v3090_v8 = vpop.permute.xlu0 %3089  ;;  %v5690_v53 = vpop.eup %5689  ;;  %v3059_v38 = vmul.f32 %v5688_v29, %v7318_v9  ;;  %v7376_v11 = vrot.slane %v7373_v27, %v3362_v2 }
 0xa36   : > { %5181 = vmatprep.subr.bf16.mxu1 %v3090_v8  ;;  %v5692_v55 = vpop.eup %5691  ;;  %v3034_v56 = vpop.xlane.xlu1 %3033  ;;  %v3057_v18 = vmul.f32 %v5690_v53, %v7290_v54 }
 0xa37   : > { %5182 = vmatpush3.bf16.msra.mxu1 %v3090_v8  ;;  %5701 = vrcp.f32 %v3034_v56  ;;  %v3060_v40 = vmul.f32 %v5692_v55, %v7307_v32 }
 0xa38   : > { %5352 = vmatprep.subr.msk.bf16.mxu1 %vm1923_vm5, %v981_v50  ;;  %v5694_v52 = vpop.eup %5693  ;;  %v3070_v60 = vpack.c.bf16 %v3058_v51, %v3057_v18  ;;  %5703 = vrcp.f32 %v3032_v58  ;;  %v5773_v51 = vld [vmem:[%s5999_s10 + $0x8] sm:$0xff]  ;;  %v5774_v18 = vld [vmem:[%s5999_s10 + $0x30] sm:$0xff] }
 0xa39   : > { %v3071_v24 = vpack.c.bf16 %v3060_v40, %v3059_v38  ;;  %v3062_v12 = vmul.f32 %v5694_v52, %v7321_v0 }
 0xa3a   : > { %5184 = vmatmul.mubr.bf16.vlgmr.msra.gmra.mrb[64].mxu1 %v3068_v37 }
 0xa3b   : > { %5187 = vmatprep.mubr.bf16.mxu1 %v3069_v33  ;;  %5200 = vmatpush3.bf16.msra.mxu1 %v3229_v26  ;;  %v5772_v33 = vld [vmem:[%s5999_s10 + $0x18] sm:$0xff] }
 0xa3c   : > { %v5696_v4 = vpop.eup %5695 }
 0xa3d   : > { %v5698_v15 = vpop.eup %5697  ;;  %v3063_v23 = vmul.f32 %v5696_v4, %v7324_v39 }
 0xa3e   : > { %v5700_v36 = vpop.eup %5699  ;;  %v3064_v9 = vmul.f32 %v5698_v15, %v7326_v35 }
 0xa3f   : > { %v3061_v54 = vmul.f32 %v5700_v36, %v7313_v1 }
 0xa40   : > { %v3073_v32 = vpack.c.bf16 %v3064_v9, %v3063_v23 }
 0xa41   : > { %v3072_v7 = vpack.c.bf16 %v3062_v12, %v3061_v54  ;;  %v5702_v6 = vpop.eup %5701  ;;  %v5775_v12 = vld [vmem:[%s5999_s10 + $0x20] sm:$0xff] }
 0xa42   : > { %5188 = vmatmul.mubr.bf16.gmra.mrb[68].mxu1 %v3070_v60  ;;  %v5704_v13 = vpop.eup %5703  ;;  %v3066_v41 = vmul.f32 %v5702_v6, %v7330_v57 }
 0xa43   : > { %5191 = vmatprep.mubr.bf16.mxu1 %v3071_v24  ;;  %v3065_v17 = vmul.f32 %v5704_v13, %v7311_v49 }
 0xa45   : > { %v3074_v25 = vpack.c.bf16 %v3066_v41, %v3065_v17 }
 0xa4a   : > { %5192 = vmatmul.mubr.bf16.gmra.mrb[72].mxu1 %v3072_v7 }
 0xa4b   : > { %5195 = vmatprep.mubr.bf16.mxu1 %v3073_v32  ;;  %v5776_v32 = vld [vmem:[%s5999_s10 + $0x38] sm:$0xff] }
 0xa52   : > { %5196 = vmatmul.mubr.bf16.gmra.mrb[76].mxu1 %v3074_v25 }
 0xb0d   : > { %v5185_v46 = vpop.f32.mrb[64].mxu1 }
 0xb0e   : > { %v3133_v0 = vpop.f32.mrb[65].mxu1 }
 0xb0f   : > { %v5186_v22 = vpop.f32.mrb[66].mxu1 }
 0xb10   : > { %v3197_v39 = vpack.c.bf16 %v5186_v22, %v5185_v46  ;;  %v3136_v43 = vpop.f32.mrb[67].mxu1  ;;  %v5777_v22 = vld [vmem:[%s5999_s10 + $0x28] sm:$0xff] }
 0xb11   : > { %v3196_v35 = vpack.c.bf16 %v3136_v43, %v3133_v0 }
 0xb13   : > { %5201 = vmatprep.mubr.msk.bf16.mxu1 %vm1014_vm2, %v3196_v35 }
 0xb14   : > { %5202 = vmatmul.mubr.msk.bf16.vlgmr.msra.gmra.mrb[32].mxu1 %vm1014_vm2, %v3197_v39 }
 0xb15   : > { %v5189_v1 = vpop.f32.mrb[68].mxu1 }
 0xb16   : > { %v3149_v61 = vpop.f32.mrb[69].mxu1 }
 0xb17   : > { %v5190_v21 = vpop.f32.mrb[70].mxu1 }
 0xb18   : > { %v3199_v30 = vpack.c.bf16 %v5190_v21, %v5189_v1  ;;  %v3152_v63 = vpop.f32.mrb[71].mxu1 }
 0xb19   : > { %v3198_v57 = vpack.c.bf16 %v3152_v63, %v3149_v61  ;;  %v5778_v61 = vld [vmem:[%s5999_s10 + $0x50] sm:$0xff] }
 0xb1b   : > { %5205 = vmatprep.mubr.msk.bf16.mxu1 %vm1014_vm2, %v3198_v57 }
 0xb1c   : > { %5206 = vmatmul.mubr.msk.bf16.gmra.mrb[36].mxu1 %vm1014_vm2, %v3199_v30  ;;  %v5779_v30 = vld [vmem:[%s5999_s10 + $0x70] sm:$0xff] }
 0xb1d   : > { %v5193_v49 = vpop.f32.mrb[72].mxu1 }
 0xb1e   : > { %v3165_v10 = vpop.f32.mrb[73].mxu1 }
 0xb1f   : > { %v5194_v5 = vpop.f32.mrb[74].mxu1 }
 0xb20   : > { %v3201_v19 = vpack.c.bf16 %v5194_v5, %v5193_v49  ;;  %v3168_v47 = vpop.f32.mrb[75].mxu1 }
 0xb21   : > { %v3200_v45 = vpack.c.bf16 %v3168_v47, %v3165_v10 }
 0xb23   : > { %5209 = vmatprep.mubr.msk.bf16.mxu1 %vm1014_vm2, %v3200_v45  ;;  %v5780_v45 = vld [vmem:[%s5999_s10 + $0x40] sm:$0xff] }
 0xb24   : > { %5210 = vmatmul.mubr.msk.bf16.gmra.mrb[40].mxu1 %vm1014_vm2, %v3201_v19 }
 0xb25   : > { %v5197_v48 = vpop.f32.mrb[76].mxu1 }
 0xb26   : > { %v3181_v31 = vpop.f32.mrb[77].mxu1 }
 0xb27   : > { %v5198_v34 = vpop.f32.mrb[78].mxu1 }
 0xb28   : > { %v3203_v58 = vpack.c.bf16 %v5198_v34, %v5197_v48  ;;  %v3184_v3 = vpop.f32.mrb[79].mxu1 }
 0xb29   : > { %v3202_v42 = vpack.c.bf16 %v3184_v3, %v3181_v31  ;;  %v5781_v3 = vld [vmem:[%s5999_s10 + $0x58] sm:$0xff] }
 0xb2b   : > { %5213 = vmatprep.mubr.msk.bf16.mxu1 %vm1014_vm2, %v3202_v42 }
 0xb2c   : > { %5214 = vmatmul.mubr.msk.bf16.gmra.mrb[44].mxu1 %vm1014_vm2, %v3203_v58 }
 0xbe7   : > { %v5203_v14 = vpop.f32.mrb[32].mxu1 }
 0xbe8   : > { %v3346_v8 = vadd.f32 %v5770_v62, %v5203_v14  ;;  %v3265_v16 = vpop.f32.mrb[33].mxu1  ;;  %v5782_v62 = vld [vmem:[%s5999_s10 + $0x48] sm:$0xff] }
 0xbe9   : > { %v3344_v50 = vadd.f32 %v5771_v59, %v3265_v16  ;;  %v5204_v44 = vpop.f32.mrb[34].mxu1 }
 0xbea   : > { %v7381_v37 = vadd.f32 %v7376_v11, %v3346_v8  ;;  %v3268_v26 = vpop.f32.mrb[35].mxu1  ;;  %v3347_v29 = vadd.f32 %v5772_v33, %v5204_v44 }
 0xbeb   : > { %v7384_v20 = vadd.f32 %v7376_v11, %v3344_v50  ;;  %v3345_v38 = vadd.f32 %v5773_v51, %v3268_v26  ;;  %v5783_v50 = vld [vmem:[%s5999_s10 + $0x60] sm:$0xff]  ;;  %v5785_v51 = vld [vmem:[%s5999_s10 + $0x78] sm:$0xff] }
 0xbec   : > { %v3386_v53 = vsel %vm525_vm1, %v7381_v37, 0.0  ;;  %v7390_v56 = vadd.f32 %v7376_v11, %v3347_v29  ;;  %v5784_v29 = vld [vmem:[%s5999_s10 + $0x68] sm:$0xff] }
 0xbed   : > { %3387 = vadd.xlane.f32.xlu1 %v3386_v53  ;;  %v3380_v60 = vsel %vm525_vm1, %v7384_v20, 0.0  ;;  %v7400_v36 = vadd.f32 %v7376_v11, %v3345_v38 }
 0xbee   : > { %v3389_v9 = vsel %vm525_vm1, %v7390_v56, 0.0 }
 0xbef   : > { %v5207_v55 = vpop.f32.mrb[36].mxu1  ;;  %v3383_v17 = vsel %vm525_vm1, %v7400_v36, 0.0 }
 0xbf0   : > { %v3350_v40 = vadd.f32 %v5774_v18, %v5207_v55  ;;  %v3281_v52 = vpop.f32.mrb[37].mxu1 }
 0xbf1   : > { %3381 = vadd.xlane.f32.xlu1 %v3380_v60  ;;  %v5208_v4 = vpop.f32.mrb[38].mxu1  ;;  %v3348_v23 = vadd.f32 %v5775_v12, %v3281_v52 }
 0xbf2   : > { %v7397_v24 = vadd.f32 %v7376_v11, %v3350_v40  ;;  %v3284_v15 = vpop.f32.mrb[39].mxu1  ;;  %v3351_v13 = vadd.f32 %v5776_v32, %v5208_v4 }
 0xbf3   : > { %v7408_v6 = vadd.f32 %v7376_v11, %v3348_v23  ;;  %v3349_v39 = vadd.f32 %v5777_v22, %v3284_v15 }
 0xbf4   : > { %v3398_v54 = vsel %vm525_vm1, %v7397_v24, 0.0  ;;  %v7414_v0 = vadd.f32 %v7376_v11, %v3351_v13 }
 0xbf5   : > { %3390 = vadd.xlane.f32.xlu1 %v3389_v9  ;;  %3399 = vadd.xlane.f32.xlu0 %v3398_v54  ;;  %v3392_v43 = vsel %vm525_vm1, %v7408_v6, 0.0  ;;  %v7420_v1 = vadd.f32 %v7376_v11, %v3349_v39 }
 0xbf6   : > { %v3401_v49 = vsel %vm525_vm1, %v7414_v0, 0.0 }
 0xbf7   : > { %v5211_v7 = vpop.f32.mrb[40].mxu1  ;;  %v3395_v31 = vsel %vm525_vm1, %v7420_v1, 0.0 }
 0xbf8   : > { %v3297_v41 = vpop.f32.mrb[41].mxu1  ;;  %v3354_v21 = vadd.f32 %v5778_v61, %v5211_v7 }
 0xbf9   : > { %3384 = vadd.xlane.f32.xlu1 %v3383_v17  ;;  %v5212_v25 = vpop.f32.mrb[42].mxu1  ;;  %v3352_v48 = vadd.f32 %v5780_v45, %v3297_v41 }
 0xbfa   : > { %v3300_v46 = vpop.f32.mrb[43].mxu1  ;;  %v7430_v47 = vadd.f32 %v7376_v11, %v3354_v21  ;;  %v3355_v42 = vadd.f32 %v5781_v3, %v5212_v25 }
 0xbfb   : > { %v7438_v58 = vadd.f32 %v7376_v11, %v3352_v48  ;;  %v3353_v8 = vadd.f32 %v5782_v62, %v3300_v46 }
 0xbfc   : > { %v3410_v2 = vsel %vm525_vm1, %v7430_v47, 0.0  ;;  %v7444_v14 = vadd.f32 %v7376_v11, %v3355_v42 }
 0xbfd   : > { %3393 = vadd.xlane.f32.xlu1 %v3392_v43  ;;  %v3404_v16 = vsel %vm525_vm1, %v7438_v58, 0.0  ;;  %v7450_v59 = vadd.f32 %v7376_v11, %v3353_v8 }
 0xbfe   : > { %v3413_v26 = vsel %vm525_vm1, %v7444_v14, 0.0 }
 0xbff   : > { %v5215_v35 = vpop.f32.mrb[44].mxu1  ;;  %v3407_v55 = vsel %vm525_vm1, %v7450_v59, 0.0 }
 0xc00   : > { %v3358_v63 = vadd.f32 %v5779_v30, %v5215_v35  ;;  %v3313_v57 = vpop.f32.mrb[45].mxu1 }
 0xc01   : > { %3402 = vadd.xlane.f32.xlu1 %v3401_v49  ;;  %v5216_v10 = vpop.f32.mrb[46].mxu1  ;;  %v3356_v44 = vadd.f32 %v5783_v50, %v3313_v57 }
 0xc02   : > { %v7427_v5 = vadd.f32 %v7376_v11, %v3358_v63  ;;  %v3316_v19 = vpop.f32.mrb[47].mxu1  ;;  %v3359_v38 = vadd.f32 %v5785_v51, %v5216_v10 }
 0xc03   : > { %v7456_v33 = vadd.f32 %v7376_v11, %v3356_v44  ;;  %v3357_v53 = vadd.f32 %v5784_v29, %v3316_v19 }
 0xc04   : > { %v3422_v34 = vsel %vm525_vm1, %v7427_v5, 0.0  ;;  %v7468_v52 = vadd.f32 %v7376_v11, %v3359_v38 }
 0xc05   : > { %3396 = vadd.xlane.f32.xlu1 %v3395_v31  ;;  %3423 = vadd.xlane.f32.xlu0 %v3422_v34  ;;  %v7463_v18 = vadd.f32 %v7376_v11, %v3357_v53  ;;  %v3416_v40 = vsel %vm525_vm1, %v7456_v33, 0.0 }
 0xc06   : > { %v3425_v4 = vsel %vm525_vm1, %v7468_v52, 0.0 }
 0xc07   : > { %v3419_v60 = vsel %vm525_vm1, %v7463_v18, 0.0 }
 0xc09   : > { %3411 = vadd.xlane.f32.xlu1 %v3410_v2 }
 0xc0d   : > { %3405 = vadd.xlane.f32.xlu1 %v3404_v16 }
 0xc11   : > { %3414 = vadd.xlane.f32.xlu1 %v3413_v26 }
 0xc15   : > { %3408 = vadd.xlane.f32.xlu1 %v3407_v55 }
 0xc19   : > { %3417 = vadd.xlane.f32.xlu1 %v3416_v40 }
 0xc1d   : > { %3420 = vadd.xlane.f32.xlu1 %v3419_v60 }
 0xc21   : > { %3426 = vadd.xlane.f32.xlu1 %v3425_v4 }
 0xc7a   : > { %v3388_v15 = vpop.xlane.xlu1 %3387 }
 0xc7b   : > { %v3430_v12 = vmul.f32 0.03125, %v3388_v15 }
 0xc7d   : > { %v7475_v54 = vsub.f32 %v7381_v37, %v3430_v12 }
 0xc7e   : > { %v3382_v23 = vpop.xlane.xlu1 %3381 }
 0xc7f   : > { %v3428_v9 = vmul.f32 0.03125, %v3382_v23  ;;  %v3462_v17 = vmul.f32 %v7475_v54, %v7475_v54 }
 0xc81   : > { %v7478_v7 = vsub.f32 %v7384_v20, %v3428_v9  ;;  %v3482_v61 = vsel %vm525_vm1, %v3462_v17, 0.0 }
 0xc82   : > { %v3391_v11 = vpop.xlane.xlu1 %3390  ;;  %v3400_v25 = vpop.xlane.xlu0 %3399 }
 0xc83   : > { %v3460_v32 = vmul.f32 %v7478_v7, %v7478_v7  ;;  %v3431_v13 = vmul.f32 0.03125, %v3391_v11  ;;  %v3434_v43 = vmul.f32 0.03125, %v3400_v25 }
 0xc85   : > { %v3476_v41 = vsel %vm525_vm1, %v3460_v32, 0.0  ;;  %v7486_v39 = vsub.f32 %v7390_v56, %v3431_v13  ;;  %v7495_v57 = vsub.f32 %v7397_v24, %v3434_v43 }
 0xc86   : > { %v3385_v46 = vpop.xlane.xlu1 %3384  ;;  %3477 = vadd.xlane.f32.xlu0 %v3476_v41 }
 0xc87   : > { %v3429_v22 = vmul.f32 0.03125, %v3385_v46  ;;  %v3463_v19 = vmul.f32 %v7486_v39, %v7486_v39  ;;  %v3466_v42 = vmul.f32 %v7495_v57, %v7495_v57 }
 0xc89   : > { %v7489_v35 = vsub.f32 %v7400_v36, %v3429_v22  ;;  %v3485_v3 = vsel %vm525_vm1, %v3463_v19, 0.0  ;;  %v3494_v50 = vsel %vm525_vm1, %v3466_v42, 0.0 }
 0xc8a   : > { %v3394_v21 = vpop.xlane.xlu1 %3393  ;;  %3483 = vadd.xlane.f32.xlu0 %v3482_v61 }
 0xc8b   : > { %v3432_v30 = vmul.f32 0.03125, %v3394_v21  ;;  %v3461_v63 = vmul.f32 %v7489_v35, %v7489_v35 }
 0xc8d   : > { %v7498_v49 = vsub.f32 %v7408_v6, %v3432_v30  ;;  %v3479_v10 = vsel %vm525_vm1, %v3461_v63, 0.0 }
 0xc8e   : > { %v3403_v45 = vpop.xlane.xlu1 %3402  ;;  %3480 = vadd.xlane.f32.xlu1 %v3479_v10 }
 0xc8f   : > { %v3464_v48 = vmul.f32 %v7498_v49, %v7498_v49  ;;  %v3435_v31 = vmul.f32 0.03125, %v3403_v45 }
 0xc91   : > { %v3488_v34 = vsel %vm525_vm1, %v3464_v48, 0.0  ;;  %v7510_v8 = vsub.f32 %v7414_v0, %v3435_v31 }
 0xc92   : > { %v3397_v2 = vpop.xlane.xlu1 %3396  ;;  %3489 = vadd.xlane.f32.xlu0 %v3488_v34  ;;  %3486 = vadd.xlane.f32.xlu1 %v3485_v3  ;;  %v3424_v32 = vpop.xlane.xlu0 %3423 }
 0xc93   : > { %v3433_v62 = vmul.f32 0.03125, %v3397_v2  ;;  %v3467_v55 = vmul.f32 %v7510_v8, %v7510_v8  ;;  %v3442_v17 = vmul.f32 0.03125, %v3424_v32 }
 0xc95   : > { %v7513_v16 = vsub.f32 %v7420_v1, %v3433_v62  ;;  %v3497_v4 = vsel %vm525_vm1, %v3467_v55, 0.0  ;;  %v7543_v30 = vsub.f32 %v7427_v5, %v3442_v17 }
 0xc96   : > { %v3412_v44 = vpop.xlane.xlu1 %3411  ;;  %3495 = vadd.xlane.f32.xlu0 %v3494_v50 }
 0xc97   : > { %v3465_v26 = vmul.f32 %v7513_v16, %v7513_v16  ;;  %v3438_v29 = vmul.f32 0.03125, %v3412_v44  ;;  %v3474_v2 = vmul.f32 %v7543_v30, %v7543_v30 }
 0xc99   : > { %v3491_v53 = vsel %vm525_vm1, %v3465_v26, 0.0  ;;  %v7522_v40 = vsub.f32 %v7430_v47, %v3438_v29  ;;  %v5407_v26 = vld [vmem:[%s5988_s25] sm:$0xff]  }
 0xc9a   : > { %v3406_v51 = vpop.xlane.xlu1 %3405  ;;  %3492 = vadd.xlane.f32.xlu1 %v3491_v53  ;;  %v3518_v53 = vsel %vm525_vm1, %v3474_v2, 0.0  ;;  %5217 = vmatprep.subr.bf16.mxu0 %v5407_v26 }
 0xc9b   : > { %v3436_v38 = vmul.f32 0.03125, %v3406_v51  ;;  %v3470_v11 = vmul.f32 %v7522_v40, %v7522_v40  ;;  %5218 = vmatpush3.bf16.msra.mxu0 %v5407_v26 }
 0xc9d   : > { %v7525_v60 = vsub.f32 %v7438_v58, %v3436_v38  ;;  %v3506_v22 = vsel %vm525_vm1, %v3470_v11, 0.0  ;;  %v5408_v38 = vld [vmem:[%s5988_s25 + $0x8] sm:$0xff]  }
 0xc9e   : > { %v3415_v15 = vpop.xlane.xlu1 %3414  ;;  %3498 = vadd.xlane.f32.xlu1 %v3497_v4  ;;  %5219 = vmatprep.subr.bf16.mxu0 %v5408_v38 }
 0xc9f   : > { %v3468_v12 = vmul.f32 %v7525_v60, %v7525_v60  ;;  %v3439_v23 = vmul.f32 0.03125, %v3415_v15  ;;  %5220 = vmatpush3.bf16.msra.mxu0 %v5408_v38 }
 0xca1   : > { %v3500_v9 = vsel %vm525_vm1, %v3468_v12, 0.0  ;;  %v7534_v25 = vsub.f32 %v7444_v14, %v3439_v23 }
 0xca2   : > { %v3409_v13 = vpop.xlane.xlu1 %3408  ;;  %3501 = vadd.xlane.f32.xlu0 %v3500_v9 }
 0xca3   : > { %v3437_v41 = vmul.f32 0.03125, %v3409_v13  ;;  %v3471_v19 = vmul.f32 %v7534_v25, %v7534_v25 }
 0xca5   : > { %v7537_v46 = vsub.f32 %v7450_v59, %v3437_v41  ;;  %v3509_v42 = vsel %vm525_vm1, %v3471_v19, 0.0 }
 0xca6   : > { %3507 = vadd.xlane.f32.xlu0 %v3506_v22  ;;  %v3418_v43 = vpop.xlane.xlu1 %3417 }
 0xca7   : > { %v3440_v61 = vmul.f32 0.03125, %v3418_v43  ;;  %v3469_v21 = vmul.f32 %v7537_v46, %v7537_v46 }
 0xca9   : > { %v7546_v63 = vsub.f32 %v7456_v33, %v3440_v61  ;;  %v3503_v10 = vsel %vm525_vm1, %v3469_v21, 0.0 }
 0xcaa   : > { %3504 = vadd.xlane.f32.xlu1 %v3503_v10  ;;  %v3421_v45 = vpop.xlane.xlu1 %3420 }
 0xcab   : > { %v3441_v48 = vmul.f32 0.03125, %v3421_v45  ;;  %v3472_v31 = vmul.f32 %v7546_v63, %v7546_v63  ;;  %v3590_v45 = vsub.s32 2, %v8205_v28 }
 0xcad   : > { %v7554_v34 = vsub.f32 %v7463_v18, %v3441_v48  ;;  %v3512_v3 = vsel %vm525_vm1, %v3472_v31, 0.0 }
 0xcae   : > { %3513 = vadd.xlane.f32.xlu0 %v3512_v3  ;;  %3510 = vadd.xlane.f32.xlu1 %v3509_v42  ;;  %v3427_v62 = vpop.xlane.xlu1 %3426 }
 0xcaf   : > { %v3443_v50 = vmul.f32 0.03125, %v3427_v62  ;;  %v3473_v44 = vmul.f32 %v7554_v34, %v7554_v34  ;;  %v7575_v62 = vrot.slane %v7373_v27, %v3590_v45 }
 0xcb1   : > { %v7564_v29 = vsub.f32 %v7468_v52, %v3443_v50  ;;  %v3515_v55 = vsel %vm525_vm1, %v3473_v44, 0.0  ;;  %v3610_v50 = vsub.s32 3, %v8205_v28 }
 0xcb2   : > { %3519 = vadd.xlane.f32.xlu0 %v3518_v53  ;;  %3516 = vadd.xlane.f32.xlu1 %v3515_v55 }
 0xcb3   : > { %v3475_v51 = vmul.f32 %v7564_v29, %v7564_v29  ;;  %v7579_v38 = vrot.slane %v7373_v27, %v3610_v50 }
 0xcb5   : > { %v3521_v4 = vsel %vm525_vm1, %v3475_v51, 0.0 }
 0xcb6   : > { %3522 = vadd.xlane.f32.xlu1 %v3521_v4 }
 0xd13   : > { %v3478_v15 = vpop.xlane.xlu0 %3477 }
 0xd14   : > { %v3524_v12 = vmul.f32 0.03125, %v3478_v15 }
 0xd16   : > { %v3540_v23 = vadd.f32 1e-06, %v3524_v12 }
 0xd17   : > { %v3484_v9 = vpop.xlane.xlu0 %3483 }
 0xd18   : > { %v3526_v11 = vmul.f32 0.03125, %v3484_v9  ;;  %5705 = vrsqrt.f32 %v3540_v23 }
 0xd1a   : > { %v3542_v32 = vadd.f32 1e-06, %v3526_v11 }
 0xd1b   : > { %v3481_v13 = vpop.xlane.xlu1 %3480 }
 0xd1c   : > { %v3525_v41 = vmul.f32 0.03125, %v3481_v13  ;;  %5707 = vrsqrt.f32 %v3542_v32 }
 0xd1e   : > { %v3541_v17 = vadd.f32 1e-06, %v3525_v41 }
 0xd1f   : > { %v3490_v22 = vpop.xlane.xlu0 %3489  ;;  %v3487_v43 = vpop.xlane.xlu1 %3486 }
 0xd20   : > { %5709 = vrsqrt.f32 %v3541_v17  ;;  %v3528_v61 = vmul.f32 0.03125, %v3490_v22  ;;  %v3527_v21 = vmul.f32 0.03125, %v3487_v43 }
 0xd22   : > { %v3544_v10 = vadd.f32 1e-06, %v3528_v61  ;;  %v3543_v19 = vadd.f32 1e-06, %v3527_v21  ;;  %v5706_v31 = vpop.eup %5705 }
 0xd23   : > { %v3496_v48 = vpop.xlane.xlu0 %3495  ;;  %v3572_v2 = vmul.f32 %v5706_v31, %v7478_v7 }
 0xd24   : > { %5711 = vrsqrt.f32 %v3544_v10  ;;  %v3530_v3 = vmul.f32 0.03125, %v3496_v48 }
 0xd25   : > { %5713 = vrsqrt.f32 %v3543_v19  ;;  %v3592_v12 = vmul.f32 %v7575_v62, %v3572_v2 }
 0xd26   : > { %v3546_v42 = vadd.f32 1e-06, %v3530_v3  ;;  %v5708_v53 = vpop.eup %5707 }
 0xd27   : > { %v3493_v44 = vpop.xlane.xlu1 %3492  ;;  %v3574_v7 = vmul.f32 %v5708_v53, %v7475_v54  ;;  %v3612_v17 = vadd.f32 %v7579_v38, %v3592_v12 }
 0xd28   : > { %v3529_v26 = vmul.f32 0.03125, %v3493_v44  ;;  %5715 = vrsqrt.f32 %v3546_v42 }
 0xd29   : > { %v3594_v22 = vmul.f32 %v7575_v62, %v3574_v7 }
 0xd2a   : > { %v5710_v55 = vpop.eup %5709  ;;  %v3545_v51 = vadd.f32 1e-06, %v3529_v26 }
 0xd2b   : > { %v3573_v4 = vmul.f32 %v5710_v55, %v7489_v35  ;;  %v3499_v15 = vpop.xlane.xlu1 %3498  ;;  %v3614_v48 = vadd.f32 %v7579_v38, %v3594_v22 }
 0xd2c   : > { %5717 = vrsqrt.f32 %v3545_v51  ;;  %v3531_v23 = vmul.f32 0.03125, %v3499_v15 }
 0xd2d   : > { %v3593_v9 = vmul.f32 %v7575_v62, %v3573_v4 }
 0xd2e   : > { %v5712_v11 = vpop.eup %5711  ;;  %v3547_v32 = vadd.f32 1e-06, %v3531_v23 }
 0xd2f   : > { %v5714_v13 = vpop.eup %5713  ;;  %v3502_v41 = vpop.xlane.xlu0 %3501  ;;  %v3613_v27 = vadd.f32 %v7579_v38, %v3593_v9  ;;  %v3576_v54 = vmul.f32 %v5712_v11, %v7498_v49 }
 0xd30   : > { %v3575_v35 = vmul.f32 %v5714_v13, %v7486_v39  ;;  %5719 = vrsqrt.f32 %v3547_v32  ;;  %v3532_v43 = vmul.f32 0.03125, %v3502_v41 }
 0xd31   : > { %v3628_v61 = vpack.c.bf16 %v3613_v27, %v3612_v17  ;;  %v3596_v2 = vmul.f32 %v7575_v62, %v3576_v54 }
 0xd32   : > { %v3595_v21 = vmul.f32 %v7575_v62, %v3575_v35  ;;  %v3548_v10 = vadd.f32 1e-06, %v3532_v43  ;;  %v5716_v45 = vpop.eup %5715 }
 0xd33   : > { %v3508_v19 = vpop.xlane.xlu0 %3507  ;;  %5221 = vmatprep.mubr.msk.bf16.mxu0 %vm525_vm1, %v3628_v61  ;;  %v3578_v50 = vmul.f32 %v5716_v45, %v7495_v57  ;;  %v3616_v15 = vadd.f32 %v7579_v38, %v3596_v2 }
 0xd34   : > { %v3615_v31 = vadd.f32 %v7579_v38, %v3595_v21  ;;  %v3534_v3 = vmul.f32 0.03125, %v3508_v19  ;;  %5721 = vrsqrt.f32 %v3548_v10 }
 0xd36   : > { %v5718_v42 = vpop.eup %5717  ;;  %v3629_v39 = vpack.c.bf16 %v3615_v31, %v3614_v48  ;;  %v3550_v44 = vadd.f32 1e-06, %v3534_v3 }
 0xd37   : > { %v3577_v49 = vmul.f32 %v5718_v42, %v7513_v16  ;;  %v3505_v26 = vpop.xlane.xlu1 %3504  ;;  %v3598_v16 = vmul.f32 %v7575_v62, %v3578_v50 }
 0xd38   : > { %5222 = vmatmul.mubr.msk.bf16.vlgmr.msra.gmra.mrb[80].mxu0 %vm525_vm1, %v3629_v39  ;;  %v3533_v53 = vmul.f32 0.03125, %v3505_v26  ;;  %5723 = vrsqrt.f32 %v3550_v44 }
 0xd39   : > { %v3597_v55 = vmul.f32 %v7575_v62, %v3577_v49 }
 0xd3a   : > { %v5720_v51 = vpop.eup %5719  ;;  %v3549_v4 = vadd.f32 1e-06, %v3533_v53 }
 0xd3b   : > { %v3579_v12 = vmul.f32 %v5720_v51, %v7510_v8  ;;  %v3514_v7 = vpop.xlane.xlu0 %3513  ;;  %v3511_v23 = vpop.xlane.xlu1 %3510  ;;  %v3617_v57 = vadd.f32 %v7579_v38, %v3597_v55  ;;  %v3618_v8 = vadd.f32 %v7579_v38, %v3598_v16 }
 0xd3c   : > { %5725 = vrsqrt.f32 %v3549_v4  ;;  %v3536_v9 = vmul.f32 0.03125, %v3514_v7  ;;  %v3535_v11 = vmul.f32 0.03125, %v3511_v23 }
 0xd3d   : > { %v3630_v32 = vpack.c.bf16 %v3617_v57, %v3616_v15  ;;  %v3599_v13 = vmul.f32 %v7575_v62, %v3579_v12 }
 0xd3e   : > { %v3552_v41 = vadd.f32 1e-06, %v3536_v9  ;;  %v3551_v17 = vadd.f32 1e-06, %v3535_v11  ;;  %v5722_v43 = vpop.eup %5721 }
 0xd3f   : > { %v3520_v27 = vpop.xlane.xlu0 %3519  ;;  %5225 = vmatprep.mubr.msk.bf16.mxu0 %vm525_vm1, %v3630_v32  ;;  %v3517_v22 = vpop.xlane.xlu1 %3516  ;;  %v3619_v35 = vadd.f32 %v7579_v38, %v3599_v13  ;;  %v3580_v45 = vmul.f32 %v5722_v43, %v7525_v60  ;;  %v5410_v43 = vld [vmem:[%s5994_s29 + $0x8] sm:$0xff]  }
 0xd40   : > { %5727 = vrsqrt.f32 %v3552_v41  ;;  %v3538_v61 = vmul.f32 0.03125, %v3520_v27  ;;  %v3537_v54 = vmul.f32 0.03125, %v3517_v22 }
 0xd41   : > { %5729 = vrsqrt.f32 %v3551_v17  ;;  %v3631_v21 = vpack.c.bf16 %v3619_v35, %v3618_v8  ;;  %v3600_v50 = vmul.f32 %v7575_v62, %v3580_v45  ;;  %v5409_v35 = vld [vmem:[%s5994_s29] sm:$0xff]  }
 0xd42   : > { %v3554_v10 = vadd.f32 1e-06, %v3538_v61  ;;  %v3553_v19 = vadd.f32 1e-06, %v3537_v54  ;;  %v5724_v3 = vpop.eup %5723  ;;  %5237 = vmatprep.subr.bf16.mxu0 %v5409_v35  ;;  %v5413_v61 = vld [vmem:[%s5994_s29 + $0x20] sm:$0xff]   ;;  %v5414_v54 = vld [vmem:[%s5994_s29 + $0x28] sm:$0xff]  }
 0xd43   : > { %5226 = vmatmul.mubr.msk.bf16.gmra.mrb[84].mxu0 %vm525_vm1, %v3631_v21  ;;  %v3523_v48 = vpop.xlane.xlu1 %3522  ;;  %v3582_v49 = vmul.f32 %v5724_v3, %v7522_v40  ;;  %v3620_v53 = vadd.f32 %v7579_v38, %v3600_v50  ;;  %v5415_v21 = vld [vmem:[%s5994_s29 + $0x30] sm:$0xff]  }
 0xd44   : > { %5731 = vrsqrt.f32 %v3554_v10  ;;  %v3539_v31 = vmul.f32 0.03125, %v3523_v48  ;;  %5238 = vmatpush3.bf16.msra.mxu0 %v5409_v35  ;;  %v5416_v10 = vld [vmem:[%s5994_s29 + $0x38] sm:$0xff]  }
 0xd45   : > { %5733 = vrsqrt.f32 %v3553_v19  ;;  %v3602_v15 = vmul.f32 %v7575_v62, %v3582_v49  ;;  %5239 = vmatprep.subr.bf16.mxu0 %v5410_v43  ;;  %v7649_v19 = vld [vmem:[%s8206_s14] ss:$0 sm:$0xff] }
 0xd46   : > { %v5726_v42 = vpop.eup %5725  ;;  %v3555_v39 = vadd.f32 1e-06, %v3539_v31 }
 0xd47   : > { %v3581_v2 = vmul.f32 %v5726_v42, %v7537_v46  ;;  %v3622_v16 = vadd.f32 %v7579_v38, %v3602_v15 }
 0xd48   : > { %5735 = vrsqrt.f32 %v3555_v39  ;;  %5240 = vmatpush3.bf16.msra.mxu0 %v5410_v43 }
 0xd49   : > { %v3601_v44 = vmul.f32 %v7575_v62, %v3581_v2 }
 0xd4a   : > { %v5728_v26 = vpop.eup %5727 }
 0xd4b   : > { %v5730_v60 = vpop.eup %5729  ;;  %v3621_v55 = vadd.f32 %v7579_v38, %v3601_v44  ;;  %v3584_v51 = vmul.f32 %v5728_v26, %v7546_v63 }
 0xd4c   : > { %v3583_v4 = vmul.f32 %v5730_v60, %v7534_v25 }
 0xd4d   : > { %v3632_v46 = vpack.c.bf16 %v3621_v55, %v3620_v53  ;;  %v3604_v63 = vmul.f32 %v7575_v62, %v3584_v51 }
 0xd4e   : > { %v5732_v12 = vpop.eup %5731  ;;  %v3603_v7 = vmul.f32 %v7575_v62, %v3583_v4 }
 0xd4f   : > { %v5734_v40 = vpop.eup %5733  ;;  %v3586_v23 = vmul.f32 %v5732_v12, %v7543_v30  ;;  %5229 = vmatprep.mubr.msk.bf16.mxu0 %vm525_vm1, %v3632_v46 }
 0xd50   : > { %v3585_v57 = vmul.f32 %v5734_v40, %v7554_v34  ;;  %v3623_v9 = vadd.f32 %v7579_v38, %v3603_v7  ;;  %v3624_v34 = vadd.f32 %v7579_v38, %v3604_v63 }
 0xd51   : > { %v3606_v30 = vmul.f32 %v7575_v62, %v3586_v23 }
 0xd52   : > { %v5736_v25 = vpop.eup %5735  ;;  %v3633_v11 = vpack.c.bf16 %v3623_v9, %v3622_v16  ;;  %v3605_v32 = vmul.f32 %v7575_v62, %v3585_v57 }
 0xd53   : > { %v3587_v13 = vmul.f32 %v5736_v25, %v7564_v29  ;;  %v3626_v22 = vadd.f32 %v7579_v38, %v3606_v30 }
 0xd54   : > { %5230 = vmatmul.mubr.msk.bf16.gmra.mrb[88].mxu0 %vm525_vm1, %v3633_v11  ;;  %v3625_v41 = vadd.f32 %v7579_v38, %v3605_v32 }
 0xd55   : > { %v3607_v17 = vmul.f32 %v7575_v62, %v3587_v13  ;;  %v5411_v62 = vld [vmem:[%s5994_s29 + $0x10] sm:$0xff]  }
 0xd56   : > { %v3634_v27 = vpack.c.bf16 %v3625_v41, %v3624_v34  ;;  %5241 = vmatprep.subr.bf16.mxu0 %v5411_v62 }
 0xd57   : > { %v3627_v8 = vadd.f32 %v7579_v38, %v3607_v17  ;;  %5242 = vmatpush3.bf16.msra.mxu0 %v5411_v62  ;;  %v5412_v38 = vld [vmem:[%s5994_s29 + $0x18] sm:$0xff]  }
 0xd58   : > { %5233 = vmatprep.mubr.msk.bf16.mxu0 %vm525_vm1, %v3634_v27  ;;  %5243 = vmatprep.subr.bf16.mxu0 %v5412_v38 }
 0xd59   : > { %v3635_v29 = vpack.c.bf16 %v3627_v8, %v3626_v22 }
 0xd5b   : > { %5244 = vmatpush3.bf16.msra.mxu0 %v5412_v38 }
 0xd5c   : > { %5234 = vmatmul.mubr.msk.bf16.gmra.mrb[92].mxu0 %vm525_vm1, %v3635_v29  ;;  %5245 = vmatprep.subr.bf16.mxu0 %v5413_v61 }
 0xd5f   : > { %5246 = vmatpush3.bf16.msra.mxu0 %v5413_v61 }
 0xd60   : > { %5247 = vmatprep.subr.bf16.mxu0 %v5414_v54 }
 0xd63   : > { %5248 = vmatpush3.bf16.msra.mxu0 %v5414_v54 }
 0xd64   : > { %5249 = vmatprep.subr.bf16.mxu0 %v5415_v21 }
 0xd67   : > { %5250 = vmatpush3.bf16.msra.mxu0 %v5415_v21 }
 0xd68   : > { %5251 = vmatprep.subr.bf16.mxu0 %v5416_v10 }
 0xd6b   : > { %5252 = vmatpush3.bf16.msra.mxu0 %v5416_v10 }
 0xe0b   : > { %v5223_v45 = vpop.f32.mrb[80].mxu0 }
 0xe0c   : > { %v7652_v48 = vadd.f32 %v5223_v45, %v7649_v19  ;;  %v3717_v31 = vpop.f32.mrb[81].mxu0 }
 0xe0d   : > { %v7655_v3 = vadd.f32 %v7649_v19, %v3717_v31  ;;  %v5224_v42 = vpop.f32.mrb[82].mxu0 }
 0xe0e   : > { %v3798_v39 = vmul.f32 0.044715, %v7652_v48  ;;  %v3729_v2 = vadd.f32 %v5224_v42, %v7649_v19  ;;  %v3720_v50 = vpop.f32.mrb[83].mxu0 }
 0xe0f   : > { %v3796_v49 = vmul.f32 0.044715, %v7655_v3  ;;  %v7661_v44 = vadd.f32 %v7649_v19, %v3720_v50 }
 0xe10   : > { %v3814_v26 = vmul.f32 %v3798_v39, %v7652_v48  ;;  %v3799_v60 = vmul.f32 0.044715, %v3729_v2 }
 0xe11   : > { %v3812_v53 = vmul.f32 %v3796_v49, %v7655_v3  ;;  %v3797_v55 = vmul.f32 0.044715, %v7661_v44 }
 0xe12   : > { %v3830_v51 = vmul.f32 %v3814_v26, %v7652_v48  ;;  %v3815_v4 = vmul.f32 %v3799_v60, %v3729_v2 }
 0xe13   : > { %v3828_v15 = vmul.f32 %v3812_v53, %v7655_v3  ;;  %v3813_v46 = vmul.f32 %v3797_v55, %v7661_v44 }
 0xe14   : > { %v3846_v12 = vadd.f32 %v3830_v51, %v7652_v48  ;;  %v3831_v7 = vmul.f32 %v3815_v4, %v3729_v2 }
 0xe15   : > { %v3829_v40 = vmul.f32 %v3813_v46, %v7661_v44  ;;  %v3844_v23 = vadd.f32 %v3828_v15, %v7655_v3 }
 0xe16   : > { %v3862_v57 = vmul.f32 0.7978846, %v3846_v12  ;;  %v3847_v16 = vadd.f32 %v3831_v7, %v3729_v2  ;;  %v5227_v9 = vpop.f32.mrb[84].mxu0 }
 0xe17   : > { %v7673_v63 = vadd.f32 %v5227_v9, %v7649_v19  ;;  %v3733_v25 = vpop.f32.mrb[85].mxu0  ;;  %v3845_v11 = vadd.f32 %v3829_v40, %v7661_v44  ;;  %v3860_v32 = vmul.f32 0.7978846, %v3844_v23  ;;  %v3782_v40 = vmul.f32 0.5, %v7652_v48 }
 0xe18   : > { %5737 = vtanh.f32 %v3862_v57  ;;  %v3863_v13 = vmul.f32 0.7978846, %v3847_v16  ;;  %v7677_v30 = vadd.f32 %v7649_v19, %v3733_v25  ;;  %v5228_v34 = vpop.f32.mrb[86].mxu0  ;;  %v3783_v23 = vmul.f32 0.5, %v3729_v2 }
 0xe19   : > { %v3802_v41 = vmul.f32 0.044715, %v7673_v63  ;;  %v7681_v17 = vadd.f32 %v5228_v34, %v7649_v19  ;;  %v3736_v27 = vpop.f32.mrb[87].mxu0  ;;  %v3861_v22 = vmul.f32 0.7978846, %v3845_v11  ;;  %5739 = vtanh.f32 %v3860_v32 }
 0xe1a   : > { %5741 = vtanh.f32 %v3863_v13  ;;  %v3800_v8 = vmul.f32 0.044715, %v7677_v30  ;;  %v7685_v29 = vadd.f32 %v7649_v19, %v3736_v27  ;;  %v3780_v16 = vmul.f32 0.5, %v7655_v3 }
 0xe1b   : > { %v3818_v35 = vmul.f32 %v3802_v41, %v7673_v63  ;;  %v3803_v43 = vmul.f32 0.044715, %v7681_v17  ;;  %5743 = vtanh.f32 %v3861_v22  ;;  %v3781_v9 = vmul.f32 0.5, %v7661_v44 }
 0xe1c   : > { %v3816_v62 = vmul.f32 %v3800_v8, %v7677_v30  ;;  %v3801_v38 = vmul.f32 0.044715, %v7685_v29 }
 0xe1d   : > { %v3834_v61 = vmul.f32 %v3818_v35, %v7673_v63  ;;  %v3819_v54 = vmul.f32 %v3803_v43, %v7681_v17 }
 0xe1e   : > { %v3832_v21 = vmul.f32 %v3816_v62, %v7677_v30  ;;  %v3817_v10 = vmul.f32 %v3801_v38, %v7685_v29 }
 0xe1f   : > { %v3835_v45 = vmul.f32 %v3819_v54, %v7681_v17  ;;  %v3850_v31 = vadd.f32 %v3834_v61, %v7673_v63 }
 0xe20   : > { %v3833_v42 = vmul.f32 %v3817_v10, %v7685_v29  ;;  %v3848_v39 = vadd.f32 %v3832_v21, %v7677_v30 }
 0xe21   : > { %v3851_v50 = vadd.f32 %v3835_v45, %v7681_v17  ;;  %v3866_v49 = vmul.f32 0.7978846, %v3850_v31  ;;  %v3784_v31 = vmul.f32 0.5, %v7677_v30 }
 0xe22   : > { %v5738_v26 = vpop.eup %5737  ;;  %v3849_v60 = vadd.f32 %v3833_v42, %v7685_v29  ;;  %v3864_v53 = vmul.f32 0.7978846, %v3848_v39  ;;  %v3786_v42 = vmul.f32 0.5, %v7673_v63 }
 0xe23   : > { %v5740_v55 = vpop.eup %5739  ;;  %v3894_v51 = vadd.f32 1.0, %v5738_v26  ;;  %v3867_v4 = vmul.f32 0.7978846, %v3851_v50  ;;  %5745 = vtanh.f32 %v3866_v49  ;;  %v3785_v49 = vmul.f32 0.5, %v7685_v29 }
 0xe24   : > { %v5742_v15 = vpop.eup %5741  ;;  %v3892_v46 = vadd.f32 1.0, %v5740_v55  ;;  %v3865_v12 = vmul.f32 0.7978846, %v3849_v60  ;;  %5747 = vtanh.f32 %v3864_v53  ;;  %v3787_v26 = vmul.f32 0.5, %v7681_v17 }
 0xe25   : > { %v5744_v7 = vpop.eup %5743  ;;  %v3895_v57 = vadd.f32 1.0, %v5742_v15  ;;  %5749 = vtanh.f32 %v3867_v4  ;;  %v3910_v32 = vmul.f32 %v3894_v51, %v3782_v40 }
 0xe26   : > { %v3893_v25 = vadd.f32 1.0, %v5744_v7  ;;  %5751 = vtanh.f32 %v3865_v12  ;;  %v3908_v27 = vmul.f32 %v3892_v46, %v3780_v16 }
 0xe27   : > { %v5231_v11 = vpop.f32.mrb[88].mxu0  ;;  %v3911_v13 = vmul.f32 %v3895_v57, %v3783_v23 }
 0xe28   : > { %v7705_v34 = vadd.f32 %v5231_v11, %v7649_v19  ;;  %v3749_v41 = vpop.f32.mrb[89].mxu0  ;;  %v3909_v22 = vmul.f32 %v3893_v25, %v3781_v9 }
 0xe29   : > { %v7708_v48 = vadd.f32 %v7649_v19, %v3749_v41  ;;  %v5232_v2 = vpop.f32.mrb[90].mxu0  ;;  %v3925_v8 = vpack.c.bf16 %v3911_v13, %v3910_v32 }
 0xe2a   : > { %v3806_v3 = vmul.f32 0.044715, %v7705_v34  ;;  %v7712_v44 = vadd.f32 %v5232_v2, %v7649_v19  ;;  %v3752_v35 = vpop.f32.mrb[91].mxu0  ;;  %v3924_v43 = vpack.c.bf16 %v3909_v22, %v3908_v27 }
 0xe2b   : > { %v3804_v62 = vmul.f32 0.044715, %v7708_v48  ;;  %v7716_v38 = vadd.f32 %v7649_v19, %v3752_v35 }
 0xe2c   : > { %v3822_v61 = vmul.f32 %v3806_v3, %v7705_v34  ;;  %v3807_v54 = vmul.f32 0.044715, %v7712_v44  ;;  %5253 = vmatprep.mubr.bf16.mxu0 %v3924_v43 }
 0xe2d   : > { %v5746_v21 = vpop.eup %5745  ;;  %v3820_v10 = vmul.f32 %v3804_v62, %v7708_v48  ;;  %v3805_v45 = vmul.f32 0.044715, %v7716_v38  ;;  %5254 = vmatmul.mubr.bf16.vlgmr.msra.gmra.mrb[96].mxu0 %v3925_v8 }
 0xe2e   : > { %v5748_v39 = vpop.eup %5747  ;;  %v3823_v50 = vmul.f32 %v3807_v54, %v7712_v44  ;;  %v3898_v60 = vadd.f32 1.0, %v5746_v21  ;;  %v3838_v55 = vmul.f32 %v3822_v61, %v7705_v34 }
 0xe2f   : > { %v5750_v53 = vpop.eup %5749  ;;  %v3836_v51 = vmul.f32 %v3820_v10, %v7708_v48  ;;  %v3821_v4 = vmul.f32 %v3805_v45, %v7716_v38  ;;  %v5235_v15 = vpop.f32.mrb[92].mxu0  ;;  %v3896_v46 = vadd.f32 1.0, %v5748_v39 }
 0xe30   : > { %v5752_v30 = vpop.eup %5751  ;;  %v3839_v63 = vmul.f32 %v3823_v50, %v7712_v44  ;;  %v7732_v12 = vadd.f32 %v5235_v15, %v7649_v19  ;;  %v3765_v7 = vpop.f32.mrb[93].mxu0  ;;  %v3899_v29 = vadd.f32 1.0, %v5750_v53  ;;  %v3914_v40 = vmul.f32 %v3898_v60, %v3786_v42 }
 0xe31   : > { %v3837_v17 = vmul.f32 %v3821_v4, %v7716_v38  ;;  %v7736_v23 = vadd.f32 %v7649_v19, %v3765_v7  ;;  %v5236_v57 = vpop.f32.mrb[94].mxu0  ;;  %v3897_v16 = vadd.f32 1.0, %v5752_v30  ;;  %v3912_v9 = vmul.f32 %v3896_v46, %v3784_v31 }
 0xe32   : > { %v3810_v25 = vmul.f32 0.044715, %v7732_v12  ;;  %v7740_v11 = vadd.f32 %v5236_v57, %v7649_v19  ;;  %v3768_v32 = vpop.f32.mrb[95].mxu0  ;;  %v3915_v13 = vmul.f32 %v3899_v29, %v3787_v26  ;;  %v3852_v41 = vadd.f32 %v3836_v51, %v7708_v48 }
 0xe33   : > { %v3808_v27 = vmul.f32 0.044715, %v7736_v23  ;;  %v7745_v22 = vadd.f32 %v7649_v19, %v3768_v32  ;;  %v3913_v2 = vmul.f32 %v3897_v16, %v3785_v49  ;;  %v3853_v8 = vadd.f32 %v3837_v17, %v7716_v38 }
 0xe34   : > { %v3826_v3 = vmul.f32 %v3810_v25, %v7732_v12  ;;  %v3811_v35 = vmul.f32 0.044715, %v7740_v11  ;;  %v3927_v43 = vpack.c.bf16 %v3915_v13, %v3914_v40  ;;  %v3868_v62 = vmul.f32 0.7978846, %v3852_v41 }
 0xe35   : > { %v3824_v61 = vmul.f32 %v3808_v27, %v7736_v23  ;;  %v3809_v54 = vmul.f32 0.044715, %v7745_v22  ;;  %v3926_v21 = vpack.c.bf16 %v3913_v2, %v3912_v9  ;;  %v3869_v10 = vmul.f32 0.7978846, %v3853_v8 }
 0xe36   : > { %v3842_v45 = vmul.f32 %v3826_v3, %v7732_v12  ;;  %v3827_v19 = vmul.f32 %v3811_v35, %v7740_v11  ;;  %5753 = vtanh.f32 %v3868_v62  ;;  %v3854_v31 = vadd.f32 %v3838_v55, %v7705_v34 }
 0xe37   : > { %v3840_v42 = vmul.f32 %v3824_v61, %v7736_v23  ;;  %v3825_v39 = vmul.f32 %v3809_v54, %v7745_v22  ;;  %5257 = vmatprep.mubr.bf16.mxu0 %v3926_v21  ;;  %5755 = vtanh.f32 %v3869_v10  ;;  %v3855_v50 = vadd.f32 %v3839_v63, %v7712_v44 }
 0xe38   : > { %v3843_v49 = vmul.f32 %v3827_v19, %v7740_v11  ;;  %5258 = vmatmul.mubr.bf16.gmra.mrb[100].mxu0 %v3927_v43  ;;  %v3870_v26 = vmul.f32 0.7978846, %v3854_v31  ;;  %v3858_v55 = vadd.f32 %v3842_v45, %v7732_v12  ;;  %v3788_v57 = vmul.f32 0.5, %v7708_v48 }
 0xe39   : > { %v3841_v60 = vmul.f32 %v3825_v39, %v7745_v22  ;;  %v3871_v53 = vmul.f32 0.7978846, %v3855_v50  ;;  %v3856_v51 = vadd.f32 %v3840_v42, %v7736_v23  ;;  %v3789_v16 = vmul.f32 0.5, %v7716_v38 }
 0xe3a   : > { %5757 = vtanh.f32 %v3870_v26  ;;  %v3859_v4 = vadd.f32 %v3843_v49, %v7740_v11  ;;  %v3874_v30 = vmul.f32 0.7978846, %v3858_v55  ;;  %v3790_v8 = vmul.f32 0.5, %v7705_v34  ;;  %v5786_v55 = vld [vmem:[%s5964_s24] sm:$0x3f] }
 0xe3b   : > { %5759 = vtanh.f32 %v3871_v53  ;;  %v3857_v15 = vadd.f32 %v3841_v60, %v7745_v22  ;;  %v3872_v46 = vmul.f32 0.7978846, %v3856_v51  ;;  %v3791_v3 = vmul.f32 0.5, %v7712_v44 }
 0xe3c   : > { %v3875_v63 = vmul.f32 0.7978846, %v3859_v4  ;;  %v3792_v19 = vmul.f32 0.5, %v7736_v23  ;;  %v3793_v31 = vmul.f32 0.5, %v7745_v22  ;;  %v3794_v34 = vmul.f32 0.5, %v7732_v12 }
 0xe3d   : > { %v3873_v7 = vmul.f32 0.7978846, %v3857_v15  ;;  %5761 = vtanh.f32 %v3872_v46  ;;  %v3795_v44 = vmul.f32 0.5, %v7740_v11  ;;  %v3950_v23 = vsub.s32 5, %v8205_v28 }
 0xe3e   : > { %5763 = vtanh.f32 %v3874_v30 }
 0xe3f   : > { %5765 = vtanh.f32 %v3873_v7  ;;  %v3951_v4 = vrot.slane %v5786_v55, %v3950_v23 }
 0xe40   : > { %v5754_v29 = vpop.eup %5753  ;;  %5767 = vtanh.f32 %v3875_v63 }
 0xe41   : > { %v5756_v40 = vpop.eup %5755  ;;  %v3900_v17 = vadd.f32 1.0, %v5754_v29 }
 0xe42   : > { %v3901_v9 = vadd.f32 1.0, %v5756_v40 }
 0xe43   : > { %v3916_v32 = vmul.f32 %v3900_v17, %v3788_v57 }
 0xe44   : > { %v5758_v25 = vpop.eup %5757  ;;  %v3917_v13 = vmul.f32 %v3901_v9, %v3789_v16 }
 0xe45   : > { %v5760_v41 = vpop.eup %5759  ;;  %v3902_v27 = vadd.f32 1.0, %v5758_v25 }
 0xe46   : > { %v3928_v2 = vpack.c.bf16 %v3917_v13, %v3916_v32  ;;  %v3903_v35 = vadd.f32 1.0, %v5760_v41 }
 0xe47   : > { %v5762_v43 = vpop.eup %5761  ;;  %v3918_v61 = vmul.f32 %v3902_v27, %v3790_v8 }
 0xe48   : > { %v5764_v62 = vpop.eup %5763  ;;  %5261 = vmatprep.mubr.bf16.mxu0 %v3928_v2  ;;  %v3919_v54 = vmul.f32 %v3903_v35, %v3791_v3  ;;  %v3904_v48 = vadd.f32 1.0, %v5762_v43 }
 0xe49   : > { %v5766_v21 = vpop.eup %5765  ;;  %v3906_v38 = vadd.f32 1.0, %v5764_v62 }
 0xe4a   : > { %v5768_v10 = vpop.eup %5767  ;;  %v3929_v45 = vpack.c.bf16 %v3919_v54, %v3918_v61  ;;  %v3905_v42 = vadd.f32 1.0, %v5766_v21  ;;  %v3920_v50 = vmul.f32 %v3904_v48, %v3792_v19 }
 0xe4b   : > { %v3907_v39 = vadd.f32 1.0, %v5768_v10  ;;  %v3922_v26 = vmul.f32 %v3906_v38, %v3794_v34 }
 0xe4c   : > { %5262 = vmatmul.mubr.bf16.gmra.mrb[104].mxu0 %v3929_v45  ;;  %v3921_v49 = vmul.f32 %v3905_v42, %v3793_v31 }
 0xe4d   : > { %v3923_v60 = vmul.f32 %v3907_v39, %v3795_v44 }
 0xe4e   : > { %v3930_v53 = vpack.c.bf16 %v3921_v49, %v3920_v50 }
 0xe4f   : > { %v3931_v51 = vpack.c.bf16 %v3923_v60, %v3922_v26 }
 0xe50   : > { %5265 = vmatprep.mubr.bf16.mxu0 %v3930_v53 }
 0xe54   : > { %5266 = vmatmul.mubr.bf16.gmra.mrb[108].mxu0 %v3931_v51 }
 0xf00   : > { %v5255_v22 = vpop.f32.mrb[96].mxu0 }
 0xf01   : > { %v4043_v15 = vadd.f32 %v5255_v22, %v3951_v4  ;;  %v4034_v46 = vpop.f32.mrb[97].mxu0 }
 0xf02   : > { %v4035_v12 = vadd.f32 %v4034_v46, %v3951_v4  ;;  %v5256_v30 = vpop.f32.mrb[98].mxu0 }
 0xf03   : > { %v7775_v11 = vadd.f32 %v4043_v15, %v7381_v37  ;;  %v4046_v63 = vadd.f32 %v5256_v30, %v3951_v4  ;;  %v4037_v7 = vpop.f32.mrb[99].mxu0 }
 0xf04   : > { %v7778_v29 = vadd.f32 %v4035_v12, %v7384_v20  ;;  %v4038_v40 = vadd.f32 %v4037_v7, %v3951_v4 }
 0xf05   : > { %v7781_v17 = vadd.f32 %v4046_v63, %v7390_v56  ;;  %4119 = vst.msk [vmem:[%s5999_s10 + $0x10] sm:$0xff] (!%p4659_p8), %vm525_vm1, %v7775_v11 }
 0xf06   : > { %v7784_v28 = vadd.f32 %v4038_v40, %v7400_v36  ;;  %4117 = vst.msk [vmem:[%s5999_s10] sm:$0xff] (!%p4659_p8), %vm525_vm1, %v7778_v29 }
 0xf07   : > { %4120 = vst.msk [vmem:[%s5999_s10 + $0x18] sm:$0xff] (!%p4659_p8), %vm525_vm1, %v7781_v17 }
 0xf08   : > { %4118 = vst.msk [vmem:[%s5999_s10 + $0x8] sm:$0xff] (!%p4659_p8), %vm525_vm1, %v7784_v28 }
 0xf0b   : > { %v5259_v57 = vpop.f32.mrb[100].mxu0 }
 0xf0c   : > { %v4059_v16 = vadd.f32 %v5259_v57, %v3951_v4  ;;  %v4050_v9 = vpop.f32.mrb[101].mxu0 }
 0xf0d   : > { %v4051_v25 = vadd.f32 %v4050_v9, %v3951_v4  ;;  %v5260_v32 = vpop.f32.mrb[102].mxu0 }
 0xf0e   : > { %v7787_v37 = vadd.f32 %v4059_v16, %v7397_v24  ;;  %v4062_v13 = vadd.f32 %v5260_v32, %v3951_v4  ;;  %v4053_v41 = vpop.f32.mrb[103].mxu0 }
 0xf0f   : > { %v7790_v20 = vadd.f32 %v4051_v25, %v7408_v6  ;;  %v4054_v27 = vadd.f32 %v4053_v41, %v3951_v4 }
 0xf10   : > { %v7793_v56 = vadd.f32 %v4062_v13, %v7414_v0  ;;  %4123 = vst.msk [vmem:[%s5999_s10 + $0x30] sm:$0xff] (!%p4659_p8), %vm525_vm1, %v7787_v37 }
 0xf11   : > { %v7796_v36 = vadd.f32 %v4054_v27, %v7420_v1  ;;  %4121 = vst.msk [vmem:[%s5999_s10 + $0x20] sm:$0xff] (!%p4659_p8), %vm525_vm1, %v7790_v20 }
 0xf12   : > { %4124 = vst.msk [vmem:[%s5999_s10 + $0x38] sm:$0xff] (!%p4659_p8), %vm525_vm1, %v7793_v56 }
 0xf13   : > { %4122 = vst.msk [vmem:[%s5999_s10 + $0x28] sm:$0xff] (!%p4659_p8), %vm525_vm1, %v7796_v36 }
 0xf1f   : > { %v5263_v2 = vpop.f32.mrb[104].mxu0 }
 0xf20   : > { %v4075_v8 = vadd.f32 %v5263_v2, %v3951_v4  ;;  %v4066_v3 = vpop.f32.mrb[105].mxu0 }
 0xf21   : > { %v4067_v35 = vadd.f32 %v4066_v3, %v3951_v4  ;;  %v5264_v43 = vpop.f32.mrb[106].mxu0 }
 0xf22   : > { %v7799_v24 = vadd.f32 %v4075_v8, %v7430_v47  ;;  %v4078_v62 = vadd.f32 %v5264_v43, %v3951_v4  ;;  %v4069_v61 = vpop.f32.mrb[107].mxu0 }
 0xf23   : > { %v7802_v6 = vadd.f32 %v4067_v35, %v7438_v58  ;;  %v4070_v54 = vadd.f32 %v4069_v61, %v3951_v4 }
 0xf24   : > { %v7805_v0 = vadd.f32 %v4078_v62, %v7444_v14  ;;  %4127 = vst.msk [vmem:[%s5999_s10 + $0x50] sm:$0xff] (!%p4659_p8), %vm525_vm1, %v7799_v24 }
 0xf25   : > { %v7808_v1 = vadd.f32 %v4070_v54, %v7450_v59  ;;  %4125 = vst.msk [vmem:[%s5999_s10 + $0x40] sm:$0xff] (!%p4659_p8), %vm525_vm1, %v7802_v6 }
 0xf26   : > { %4128 = vst.msk [vmem:[%s5999_s10 + $0x58] sm:$0xff] (!%p4659_p8), %vm525_vm1, %v7805_v0 }
 0xf27   : > { %v5267_v48 = vpop.f32.mrb[108].mxu0  ;;  %4116 = sbr.rel (%p4659_p8) target bundleno = 3888 (0xf30), region = 64  ;;  %4126 = vst.msk [vmem:[%s5999_s10 + $0x48] sm:$0xff] (!%p4659_p8), %vm525_vm1, %v7808_v1 }
 0xf28   : > { %v4091_v21 = vadd.f32 %v5267_v48, %v3951_v4  ;;  %v4082_v38 = vpop.f32.mrb[109].mxu0 }
 0xf29   : > { %v4083_v10 = vadd.f32 %v4082_v38, %v3951_v4  ;;  %v5268_v45 = vpop.f32.mrb[110].mxu0 }
 0xf2a   : > { %v7811_v47 = vadd.f32 %v4091_v21, %v7427_v5  ;;  %v4094_v19 = vadd.f32 %v5268_v45, %v3951_v4  ;;  %v4085_v31 = vpop.f32.mrb[111].mxu0 }
 0xf2b   : > { %v7814_v58 = vadd.f32 %v4083_v10, %v7456_v33  ;;  %v4086_v42 = vadd.f32 %v4085_v31, %v3951_v4 }
 0xf2c   : > { %v7817_v14 = vadd.f32 %v4094_v19, %v7468_v52  ;;  %4131 = vst.msk [vmem:[%s5999_s10 + $0x70] sm:$0xff] (!%p4659_p8), %vm525_vm1, %v7811_v47 }
 0xf2d   : > { %v7820_v59 = vadd.f32 %v4086_v42, %v7463_v18  ;;  %4129 = vst.msk [vmem:[%s5999_s10 + $0x60] sm:$0xff] (!%p4659_p8), %vm525_vm1, %v7814_v58 }
 0xf2e   : > { %4132 = vst.msk [vmem:[%s5999_s10 + $0x78] sm:$0xff] %vm525_vm1, %v7817_v14 }
 0xf2f   : > { %4130 = vst.msk [vmem:[%s5999_s10 + $0x68] sm:$0xff] %vm525_vm1, %v7820_v59 }
 0xf30 PF: > { %p4660_p9 = scmp.ne.s32.totalorder %s5841_s30, 1 }
 0xf31   : > { %v4138_v5 = vsel (!%p4660_p9), %vm525_vm1, %v7778_v29, 0.0  ;;  %v4144_v33 = vsel (!%p4660_p9), %vm525_vm1, %v7775_v11, 0.0  ;;  %v4141_v18 = vsel (!%p4660_p9), %vm525_vm1, %v7784_v28, 0.0  ;;  %v4147_v52 = vsel (!%p4660_p9), %vm525_vm1, %v7781_v17, 0.0 }
 0xf32   : > { %4136 = sbr.rel (%p4660_p9) target bundleno = 4235 (0x108b), region = 68  ;;  %4139 = vadd.xlane.f32.xlu0 (!%p4660_p9), %v4138_v5  ;;  %4145 = vadd.xlane.f32.xlu1 (!%p4660_p9), %v4144_v33  ;;  %v4150_v34 = vsel (!%p4660_p9), %vm525_vm1, %v7790_v20, 0.0  ;;  %v4153_v44 = vsel (!%p4660_p9), %vm525_vm1, %v7796_v36, 0.0  ;;  %v4156_v39 = vsel (!%p4660_p9), %vm525_vm1, %v7787_v37, 0.0  ;;  %v4159_v50 = vsel (!%p4660_p9), %vm525_vm1, %v7793_v56, 0.0 }
 0xf33   : > { %v4162_v49 = vsel (!%p4660_p9), %vm525_vm1, %v7802_v6, 0.0  ;;  %v4165_v26 = vsel (!%p4660_p9), %vm525_vm1, %v7808_v1, 0.0  ;;  %v4168_v60 = vsel (!%p4660_p9), %vm525_vm1, %v7799_v24, 0.0  ;;  %v4171_v53 = vsel (!%p4660_p9), %vm525_vm1, %v7805_v0, 0.0 }
 0xf34   : > { %v4174_v51 = vsel (!%p4660_p9), %vm525_vm1, %v7814_v58, 0.0  ;;  %v4177_v23 = vsel (!%p4660_p9), %vm525_vm1, %v7820_v59, 0.0  ;;  %v4180_v55 = vsel (!%p4660_p9), %vm525_vm1, %v7811_v47, 0.0  ;;  %v4183_v4 = vsel (!%p4660_p9), %vm525_vm1, %v7817_v14, 0.0 }
 0xf36   : > { %4142 = vadd.xlane.f32.xlu0 (!%p4660_p9), %v4141_v18  ;;  %4148 = vadd.xlane.f32.xlu1 (!%p4660_p9), %v4147_v52 }
 0xf3a   : > { %4151 = vadd.xlane.f32.xlu0 %v4150_v34  ;;  %4154 = vadd.xlane.f32.xlu1 %v4153_v44 }
 0xf3e   : > { %4157 = vadd.xlane.f32.xlu0 %v4156_v39  ;;  %4160 = vadd.xlane.f32.xlu1 %v4159_v50 }
 0xf42   : > { %4163 = vadd.xlane.f32.xlu0 %v4162_v49  ;;  %4166 = vadd.xlane.f32.xlu1 %v4165_v26 }
 0xf46   : > { %4169 = vadd.xlane.f32.xlu0 %v4168_v60  ;;  %4172 = vadd.xlane.f32.xlu1 %v4171_v53 }
 0xf4a   : > { %4175 = vadd.xlane.f32.xlu0 %v4174_v51  ;;  %4178 = vadd.xlane.f32.xlu1 %v4177_v23 }
 0xf4e   : > { %4181 = vadd.xlane.f32.xlu0 %v4180_v55  ;;  %4184 = vadd.xlane.f32.xlu1 %v4183_v4 }
 0xfbf   : > { %v4140_v22 = vpop.xlane.xlu0 %4139  ;;  %v4146_v15 = vpop.xlane.xlu1 %4145 }
 0xfc0   : > { %v4186_v46 = vmul.f32 0.03125, %v4140_v22  ;;  %v4188_v12 = vmul.f32 0.03125, %v4146_v15 }
 0xfc2   : > { %v7905_v30 = vsub.f32 %v7778_v29, %v4186_v46  ;;  %v7908_v63 = vsub.f32 %v7775_v11, %v4188_v12 }
 0xfc3   : > { %v4143_v7 = vpop.xlane.xlu0 %4142  ;;  %v4149_v40 = vpop.xlane.xlu1 %4148 }
 0xfc4   : > { %v4187_v57 = vmul.f32 0.03125, %v4143_v7  ;;  %v4189_v16 = vmul.f32 0.03125, %v4149_v40  ;;  %v4218_v9 = vmul.f32 %v7905_v30, %v7905_v30  ;;  %v4220_v25 = vmul.f32 %v7908_v63, %v7908_v63 }
 0xfc6   : > { %v7915_v32 = vsub.f32 %v7784_v28, %v4187_v57  ;;  %v7918_v13 = vsub.f32 %v7781_v17, %v4189_v16  ;;  %v4234_v29 = vsel %vm525_vm1, %v4218_v9, 0.0  ;;  %v4240_v27 = vsel %vm525_vm1, %v4220_v25, 0.0 }
 0xfc7   : > { %4235 = vadd.xlane.f32.xlu0 %v4234_v29  ;;  %v4152_v11 = vpop.xlane.xlu0 %4151  ;;  %v4155_v41 = vpop.xlane.xlu1 %4154 }
 0xfc8   : > { %v4190_v2 = vmul.f32 0.03125, %v4152_v11  ;;  %v4191_v8 = vmul.f32 0.03125, %v4155_v41  ;;  %v4219_v3 = vmul.f32 %v7915_v32, %v7915_v32  ;;  %v4221_v35 = vmul.f32 %v7918_v13, %v7918_v13 }
 0xfca   : > { %v7927_v28 = vsub.f32 %v7790_v20, %v4190_v2  ;;  %v7930_v17 = vsub.f32 %v7796_v36, %v4191_v8  ;;  %v4237_v43 = vsel %vm525_vm1, %v4219_v3, 0.0  ;;  %v4243_v54 = vsel %vm525_vm1, %v4221_v35, 0.0 }
 0xfcb   : > { %4241 = vadd.xlane.f32.xlu0 %v4240_v27  ;;  %4238 = vadd.xlane.f32.xlu1 %v4237_v43  ;;  %v4158_v62 = vpop.xlane.xlu0 %4157  ;;  %v4161_v61 = vpop.xlane.xlu1 %4160 }
 0xfcc   : > { %v4192_v48 = vmul.f32 0.03125, %v4158_v62  ;;  %v4193_v21 = vmul.f32 0.03125, %v4161_v61  ;;  %v4222_v38 = vmul.f32 %v7927_v28, %v7927_v28  ;;  %v4223_v20 = vmul.f32 %v7930_v17, %v7930_v17 }
 0xfce   : > { %v7939_v10 = vsub.f32 %v7787_v37, %v4192_v48  ;;  %v7942_v36 = vsub.f32 %v7793_v56, %v4193_v21  ;;  %v4246_v45 = vsel %vm525_vm1, %v4222_v38, 0.0  ;;  %v4249_v42 = vsel %vm525_vm1, %v4223_v20, 0.0 }
 0xfcf   : > { %4244 = vadd.xlane.f32.xlu1 %v4243_v54  ;;  %4247 = vadd.xlane.f32.xlu0 %v4246_v45  ;;  %v4164_v19 = vpop.xlane.xlu0 %4163  ;;  %v4167_v31 = vpop.xlane.xlu1 %4166 }
 0xfd0   : > { %v4194_v5 = vmul.f32 0.03125, %v4164_v19  ;;  %v4195_v33 = vmul.f32 0.03125, %v4167_v31  ;;  %v4224_v18 = vmul.f32 %v7939_v10, %v7939_v10  ;;  %v4225_v37 = vmul.f32 %v7942_v36, %v7942_v36 }
 0xfd2   : > { %v7951_v52 = vsub.f32 %v7802_v6, %v4194_v5  ;;  %v7954_v56 = vsub.f32 %v7808_v1, %v4195_v33  ;;  %v4252_v34 = vsel %vm525_vm1, %v4224_v18, 0.0  ;;  %v4255_v50 = vsel %vm525_vm1, %v4225_v37, 0.0 }
 0xfd3   : > { %4250 = vadd.xlane.f32.xlu1 %v4249_v42  ;;  %4253 = vadd.xlane.f32.xlu0 %v4252_v34  ;;  %v4170_v44 = vpop.xlane.xlu0 %4169  ;;  %v4173_v39 = vpop.xlane.xlu1 %4172  ;;  %v4137_v42 = vld [vmem:[%s8114_s8] sm:$0x3] }
 0xfd4   : > { %v4196_v49 = vmul.f32 0.03125, %v4170_v44  ;;  %v4197_v26 = vmul.f32 0.03125, %v4173_v39  ;;  %v4226_v60 = vmul.f32 %v7951_v52, %v7951_v52  ;;  %v4227_v6 = vmul.f32 %v7954_v56, %v7954_v56  ;;  %v8207_v39 = vld [vmem:[#allocation5_spill] sm:$0xff] }
 0xfd6   : > { %v7963_v53 = vsub.f32 %v7799_v24, %v4196_v49  ;;  %v7966_v1 = vsub.f32 %v7805_v0, %v4197_v26  ;;  %v4258_v51 = vsel %vm525_vm1, %v4226_v60, 0.0  ;;  %v4261_v4 = vsel %vm525_vm1, %v4227_v6, 0.0 }
 0xfd7   : > { %4256 = vadd.xlane.f32.xlu1 %v4255_v50  ;;  %4259 = vadd.xlane.f32.xlu0 %v4258_v51  ;;  %v4176_v23 = vpop.xlane.xlu0 %4175  ;;  %v4179_v55 = vpop.xlane.xlu1 %4178  ;;  %v8208_v50 = vsub.s32 0, %v8207_v39 }
 0xfd8   : > { %v4198_v22 = vmul.f32 0.03125, %v4176_v23  ;;  %v4199_v15 = vmul.f32 0.03125, %v4179_v55  ;;  %v4228_v46 = vmul.f32 %v7963_v53, %v7963_v53  ;;  %v4229_v24 = vmul.f32 %v7966_v1, %v7966_v1 }
 0xfd9   : > { %v8005_v49 = vrot.slane %v4137_v42, %v8208_v50  ;;  %v8209_v23 = vsub.s32 1, %v8207_v39 }
 0xfda   : > { %v7975_v12 = vsub.f32 %v7814_v58, %v4198_v22  ;;  %v7978_v0 = vsub.f32 %v7820_v59, %v4199_v15  ;;  %v4264_v7 = vsel %vm525_vm1, %v4228_v46, 0.0  ;;  %v4267_v16 = vsel %vm525_vm1, %v4229_v24, 0.0 }
 0xfdb   : > { %4262 = vadd.xlane.f32.xlu1 %v4261_v4  ;;  %4265 = vadd.xlane.f32.xlu0 %v4264_v7  ;;  %v4182_v40 = vpop.xlane.xlu0 %4181  ;;  %v4185_v57 = vpop.xlane.xlu1 %4184  ;;  %v8010_v55 = vrot.slane %v4137_v42, %v8209_v23 }
 0xfdc   : > { %v4200_v9 = vmul.f32 0.03125, %v4182_v40  ;;  %v4201_v25 = vmul.f32 0.03125, %v4185_v57  ;;  %v4230_v29 = vmul.f32 %v7975_v12, %v7975_v12  ;;  %v4231_v58 = vmul.f32 %v7978_v0, %v7978_v0 }
 0xfde   : > { %v7987_v11 = vsub.f32 %v7811_v47, %v4200_v9  ;;  %v7990_v59 = vsub.f32 %v7817_v14, %v4201_v25  ;;  %v4270_v41 = vsel %vm525_vm1, %v4230_v29, 0.0  ;;  %v4273_v27 = vsel %vm525_vm1, %v4231_v58, 0.0 }
 0xfdf   : > { %4268 = vadd.xlane.f32.xlu1 %v4267_v16  ;;  %4271 = vadd.xlane.f32.xlu0 %v4270_v41 }
 0xfe0   : > { %v4232_v2 = vmul.f32 %v7987_v11, %v7987_v11  ;;  %v4233_v8 = vmul.f32 %v7990_v59, %v7990_v59 }
 0xfe2   : > { %v4276_v3 = vsel %vm525_vm1, %v4232_v2, 0.0  ;;  %v4279_v47 = vsel %vm525_vm1, %v4233_v8, 0.0 }
 0xfe3   : > { %4274 = vadd.xlane.f32.xlu1 %v4273_v27  ;;  %4277 = vadd.xlane.f32.xlu0 %v4276_v3 }
 0xfe7   : > { %4280 = vadd.xlane.f32.xlu1 %v4279_v47 }
0x1054   : > { %v4236_v14 = vpop.xlane.xlu0 %4235 }
0x1055   : > { %v4282_v35 = vmul.f32 0.03125, %v4236_v14 }
0x1057   : > { %v4298_v43 = vadd.f32 1e-05, %v4282_v35 }
0x1058   : > { %v4239_v62 = vpop.xlane.xlu1 %4238  ;;  %v4242_v61 = vpop.xlane.xlu0 %4241 }
0x1059   : > { %5787 = vrsqrt.f32 %v4298_v43  ;;  %v4283_v54 = vmul.f32 0.03125, %v4239_v62  ;;  %v4284_v48 = vmul.f32 0.03125, %v4242_v61 }
0x105b   : > { %v4299_v21 = vadd.f32 1e-05, %v4283_v54  ;;  %v4300_v38 = vadd.f32 1e-05, %v4284_v48 }
0x105c   : > { %v4245_v20 = vpop.xlane.xlu1 %4244  ;;  %v4248_v45 = vpop.xlane.xlu0 %4247 }
0x105d   : > { %5789 = vrsqrt.f32 %v4299_v21  ;;  %v4285_v19 = vmul.f32 0.03125, %v4245_v20  ;;  %v4286_v31 = vmul.f32 0.03125, %v4248_v45 }
0x105e   : > { %5791 = vrsqrt.f32 %v4300_v38 }
0x105f   : > { %v4301_v5 = vadd.f32 1e-05, %v4285_v19  ;;  %v4302_v33 = vadd.f32 1e-05, %v4286_v31 }
0x1060   : > { %v4251_v18 = vpop.xlane.xlu1 %4250  ;;  %v4254_v37 = vpop.xlane.xlu0 %4253 }
0x1061   : > { %5793 = vrsqrt.f32 %v4301_v5  ;;  %v4287_v34 = vmul.f32 0.03125, %v4251_v18  ;;  %v4288_v44 = vmul.f32 0.03125, %v4254_v37 }
0x1062   : > { %5795 = vrsqrt.f32 %v4302_v33 }
0x1063   : > { %v5788_v26 = vpop.eup %5787  ;;  %v4303_v60 = vadd.f32 1e-05, %v4287_v34  ;;  %v4304_v6 = vadd.f32 1e-05, %v4288_v44 }
0x1064   : > { %v4330_v51 = vmul.f32 %v5788_v26, %v7905_v30  ;;  %v4257_v4 = vpop.xlane.xlu1 %4256  ;;  %v4260_v22 = vpop.xlane.xlu0 %4259 }
0x1065   : > { %5797 = vrsqrt.f32 %v4303_v60  ;;  %v4289_v15 = vmul.f32 0.03125, %v4257_v4  ;;  %v4290_v46 = vmul.f32 0.03125, %v4260_v22 }
0x1066   : > { %v4350_v24 = vmul.f32 %v8005_v49, %v4330_v51  ;;  %5799 = vrsqrt.f32 %v4304_v6 }
0x1067   : > { %v5790_v7 = vpop.eup %5789  ;;  %v4305_v40 = vadd.f32 1e-05, %v4289_v15  ;;  %v4306_v57 = vadd.f32 1e-05, %v4290_v46 }
0x1068   : > { %v5792_v16 = vpop.eup %5791  ;;  %v4370_v9 = vadd.f32 %v8010_v55, %v4350_v24  ;;  %v4331_v30 = vmul.f32 %v5790_v7, %v7915_v32  ;;  %v4263_v25 = vpop.xlane.xlu1 %4262 }
0x1069   : > { %v4266_v29 = vpop.xlane.xlu0 %4265  ;;  %v4332_v58 = vmul.f32 %v5792_v16, %v7908_v63  ;;  %5801 = vrsqrt.f32 %v4305_v40  ;;  %v4291_v41 = vmul.f32 0.03125, %v4263_v25 }
0x106a   : > { %v4292_v27 = vmul.f32 0.03125, %v4266_v29  ;;  %4386 = vst.msk [vmem:[%s5999_s10] sm:$0xff] %vm525_vm1, %v4370_v9  ;;  %v4351_v2 = vmul.f32 %v8005_v49, %v4331_v30  ;;  %5803 = vrsqrt.f32 %v4306_v57 }
0x106b   : > { %v5794_v8 = vpop.eup %5793  ;;  %v4352_v3 = vmul.f32 %v8005_v49, %v4332_v58  ;;  %v4307_v47 = vadd.f32 1e-05, %v4291_v41 }
0x106c   : > { %v4308_v14 = vadd.f32 1e-05, %v4292_v27  ;;  %v5796_v32 = vpop.eup %5795  ;;  %v4371_v35 = vadd.f32 %v8010_v55, %v4351_v2  ;;  %v4333_v63 = vmul.f32 %v5794_v8, %v7918_v13  ;;  %v4269_v43 = vpop.xlane.xlu1 %4268 }
0x106d   : > { %v4272_v62 = vpop.xlane.xlu0 %4271  ;;  %v4372_v61 = vadd.f32 %v8010_v55, %v4352_v3  ;;  %v4334_v54 = vmul.f32 %v5796_v32, %v7927_v28  ;;  %5805 = vrsqrt.f32 %v4307_v47  ;;  %v4293_v48 = vmul.f32 0.03125, %v4269_v43 }
0x106e   : > { %4387 = vst.msk [vmem:[%s5999_s10 + $0x8] sm:$0xff] %vm525_vm1, %v4371_v35  ;;  %v4353_v21 = vmul.f32 %v8005_v49, %v4333_v63  ;;  %5807 = vrsqrt.f32 %v4308_v14  ;;  %v4294_v38 = vmul.f32 0.03125, %v4272_v62 }
0x106f   : > { %v5798_v20 = vpop.eup %5797  ;;  %4388 = vst.msk [vmem:[%s5999_s10 + $0x10] sm:$0xff] %vm525_vm1, %v4372_v61  ;;  %v4354_v13 = vmul.f32 %v8005_v49, %v4334_v54  ;;  %v4309_v45 = vadd.f32 1e-05, %v4293_v48 }
0x1070   : > { %v5800_v19 = vpop.eup %5799  ;;  %v4373_v31 = vadd.f32 %v8010_v55, %v4353_v21  ;;  %v4335_v28 = vmul.f32 %v5798_v20, %v7930_v17  ;;  %v4310_v42 = vadd.f32 1e-05, %v4294_v38  ;;  %v4275_v5 = vpop.xlane.xlu1 %4274 }
0x1071   : > { %v4278_v33 = vpop.xlane.xlu0 %4277  ;;  %v4374_v18 = vadd.f32 %v8010_v55, %v4354_v13  ;;  %v4336_v37 = vmul.f32 %v5800_v19, %v7939_v10  ;;  %5809 = vrsqrt.f32 %v4309_v45  ;;  %v4295_v34 = vmul.f32 0.03125, %v4275_v5 }
0x1072   : > { %4389 = vst.msk [vmem:[%s5999_s10 + $0x18] sm:$0xff] %vm525_vm1, %v4373_v31  ;;  %v4355_v44 = vmul.f32 %v8005_v49, %v4335_v28  ;;  %5811 = vrsqrt.f32 %v4310_v42  ;;  %v4296_v39 = vmul.f32 0.03125, %v4278_v33 }
0x1073   : > { %v5802_v50 = vpop.eup %5801  ;;  %4390 = vst.msk [vmem:[%s5999_s10 + $0x20] sm:$0xff] %vm525_vm1, %v4374_v18  ;;  %v4356_v17 = vmul.f32 %v8005_v49, %v4336_v37  ;;  %v4311_v26 = vadd.f32 1e-05, %v4295_v34 }
0x1074   : > { %v5804_v60 = vpop.eup %5803  ;;  %v4375_v6 = vadd.f32 %v8010_v55, %v4355_v44  ;;  %v4337_v10 = vmul.f32 %v5802_v50, %v7942_v36  ;;  %v4312_v51 = vadd.f32 1e-05, %v4296_v39  ;;  %v4281_v23 = vpop.xlane.xlu1 %4280 }
0x1075   : > { %v4376_v4 = vadd.f32 %v8010_v55, %v4356_v17  ;;  %v4338_v22 = vmul.f32 %v5804_v60, %v7951_v52  ;;  %5813 = vrsqrt.f32 %v4311_v26  ;;  %v4297_v15 = vmul.f32 0.03125, %v4281_v23 }
0x1076   : > { %4391 = vst.msk [vmem:[%s5999_s10 + $0x28] sm:$0xff] %vm525_vm1, %v4375_v6  ;;  %v4357_v46 = vmul.f32 %v8005_v49, %v4337_v10  ;;  %5815 = vrsqrt.f32 %v4312_v51 }
0x1077   : > { %v5806_v24 = vpop.eup %5805  ;;  %4392 = vst.msk [vmem:[%s5999_s10 + $0x30] sm:$0xff] %vm525_vm1, %v4376_v4  ;;  %v4358_v36 = vmul.f32 %v8005_v49, %v4338_v22  ;;  %v4313_v7 = vadd.f32 1e-05, %v4297_v15 }
0x1078   : > { %v5808_v40 = vpop.eup %5807  ;;  %v4377_v57 = vadd.f32 %v8010_v55, %v4357_v46  ;;  %v4339_v52 = vmul.f32 %v5806_v24, %v7954_v56 }
0x1079   : > { %v4378_v16 = vadd.f32 %v8010_v55, %v4358_v36  ;;  %v4340_v9 = vmul.f32 %v5808_v40, %v7963_v53  ;;  %5817 = vrsqrt.f32 %v4313_v7 }
0x107a   : > { %4393 = vst.msk [vmem:[%s5999_s10 + $0x38] sm:$0xff] %vm525_vm1, %v4377_v57  ;;  %v4359_v30 = vmul.f32 %v8005_v49, %v4339_v52 }
0x107b   : > { %v5810_v25 = vpop.eup %5809  ;;  %4394 = vst.msk [vmem:[%s5999_s10 + $0x40] sm:$0xff] %vm525_vm1, %v4378_v16  ;;  %v4360_v29 = vmul.f32 %v8005_v49, %v4340_v9 }
0x107c   : > { %v5812_v58 = vpop.eup %5811  ;;  %v4379_v41 = vadd.f32 %v8010_v55, %v4359_v30  ;;  %v4341_v56 = vmul.f32 %v5810_v25, %v7966_v1 }
0x107d   : > { %v4380_v27 = vadd.f32 %v8010_v55, %v4360_v29  ;;  %v4342_v53 = vmul.f32 %v5812_v58, %v7975_v12 }
0x107e   : > { %4395 = vst.msk [vmem:[%s5999_s10 + $0x48] sm:$0xff] %vm525_vm1, %v4379_v41  ;;  %v4361_v2 = vmul.f32 %v8005_v49, %v4341_v56 }
0x107f   : > { %v5814_v8 = vpop.eup %5813  ;;  %4396 = vst.msk [vmem:[%s5999_s10 + $0x50] sm:$0xff] %vm525_vm1, %v4380_v27  ;;  %v4362_v3 = vmul.f32 %v8005_v49, %v4342_v53 }
0x1080   : > { %v5816_v47 = vpop.eup %5815  ;;  %v4381_v14 = vadd.f32 %v8010_v55, %v4361_v2  ;;  %v4343_v1 = vmul.f32 %v5814_v8, %v7978_v0 }
0x1081   : > { %v4382_v32 = vadd.f32 %v8010_v55, %v4362_v3  ;;  %v4344_v12 = vmul.f32 %v5816_v47, %v7987_v11 }
0x1082   : > { %4397 = vst.msk [vmem:[%s5999_s10 + $0x58] sm:$0xff] %vm525_vm1, %v4381_v14  ;;  %v4363_v35 = vmul.f32 %v8005_v49, %v4343_v1 }
0x1083   : > { %v5818_v63 = vpop.eup %5817  ;;  %4398 = vst.msk [vmem:[%s5999_s10 + $0x60] sm:$0xff] %vm525_vm1, %v4382_v32  ;;  %v4364_v43 = vmul.f32 %v8005_v49, %v4344_v12 }
0x1084   : > { %v4383_v62 = vadd.f32 %v8010_v55, %v4363_v35  ;;  %v4345_v61 = vmul.f32 %v5818_v63, %v7990_v59 }
0x1085   : > { %v4384_v54 = vadd.f32 %v8010_v55, %v4364_v43 }
0x1086   : > { %4399 = vst.msk [vmem:[%s5999_s10 + $0x68] sm:$0xff] %vm525_vm1, %v4383_v62  ;;  %v4365_v0 = vmul.f32 %v8005_v49, %v4345_v61 }
0x1087   : > { %4400 = vst.msk [vmem:[%s5999_s10 + $0x70] sm:$0xff] %vm525_vm1, %v4384_v54 }
0x1088   : > { %v4385_v11 = vadd.f32 %v8010_v55, %v4365_v0 }
0x108a   : > { %4401 = vst.msk [vmem:[%s5999_s10 + $0x78] sm:$0xff] %vm525_vm1, %v4385_v11 }
0x108b PF: > { %s19_s13 = sadd.s32 1, %s5857_s13   ;;  %s8210_s10 = sld [smem:[#allocation2_spill]] }
0x108c   : > { %p16_p10 = scmp.ge.s32.totalorder %s19_s13, 6   ;;  %s8211_s24 = sld [smem:[#allocation3_spill]] }
0x108d   : > { %s8212_s12 = sld [smem:[#allocation4_spill]]  ;;  %s8213_s30 = smov %s5849_s11 }
0x108e   :  { %18 = sbr.rel (!%p16_p10) target bundleno = 3 (0x3), region = 119 }
0x1092   : > { %s8214_s11 = smov %s8211_s24 }

</bundles_post_ra>
